<compile_context>
chip_gen: v6e
topology: v6e:2x2x1
jax: 0.10.0
libtpu: 0.0.40
codegen_flags: <defaults>
</compile_context>

<pallas_src>
import math

import jax
import jax.numpy as jnp
from jax.experimental import pallas as pl
from jax.experimental.pallas import tpu as pltpu


def _round_up(x, m):
    return ((x + m - 1) // m) * m


# ---------------------------------------------------------------------------
# Fused (X @ W + bias [+ ReLU]) kernel — used for every conv layer (on im2col
# patches, with BN folded into W/bias) and for the GRU input projection.
# ---------------------------------------------------------------------------
def _matmul_bias_relu_kernel(x_ref, w_ref, b_ref, o_ref):
    acc = jnp.dot(x_ref[...], w_ref[...], preferred_element_type=jnp.float32)
    o_ref[...] = jnp.maximum(acc + b_ref[...], 0.0)


def _matmul_bias_kernel(x_ref, w_ref, b_ref, o_ref):
    acc = jnp.dot(x_ref[...], w_ref[...], preferred_element_type=jnp.float32)
    o_ref[...] = acc + b_ref[...]


def matmul_bias(x, w, bias, *, relu, tile_m=512):
    """(M, K) @ (K, N) + bias[N], optional ReLU, f32 MXU accumulation."""
    M, K = x.shape
    Kw, N = w.shape
    assert K == Kw
    tm = min(tile_m, _round_up(M, 8))
    m_pad = _round_up(M, tm)
    k_pad = _round_up(K, 128)  # zero-padded contraction: aligned & harmless
    if m_pad != M or k_pad != K:
        x = jnp.pad(x, ((0, m_pad - M), (0, k_pad - K)))
    if k_pad != K:
        w = jnp.pad(w, ((0, k_pad - K), (0, 0)))
    kernel = _matmul_bias_relu_kernel if relu else _matmul_bias_kernel
    out = pl.pallas_call(
        kernel,
        out_shape=jax.ShapeDtypeStruct((m_pad, N), jnp.float32),
        grid=(m_pad // tm,),
        in_specs=[
            pl.BlockSpec((tm, k_pad), lambda i: (i, 0)),
            pl.BlockSpec((k_pad, N), lambda i: (0, 0)),   # resident across grid
            pl.BlockSpec((1, N), lambda i: (0, 0)),       # resident across grid
        ],
        out_specs=pl.BlockSpec((tm, N), lambda i: (i, 0)),
        compiler_params=pltpu.CompilerParams(dimension_semantics=("parallel",)),
    )(x, w, bias.reshape(1, N).astype(jnp.float32))
    return out[:M] if m_pad != M else out


# ---------------------------------------------------------------------------
# Conv2d(3x3, stride 2, pad 1, bias=False) + BatchNorm2d (inference) + ReLU
# ---------------------------------------------------------------------------
def _im2col(x_nhwc, kh, kw, stride, pad):
    b, h, w, c = x_nhwc.shape
    xp = jnp.pad(x_nhwc, ((0, 0), (pad, pad), (pad, pad), (0, 0)))
    ho = (h + 2 * pad - kh) // stride + 1
    wo = (w + 2 * pad - kw) // stride + 1
    cols = []
    for i in range(kh):
        for j in range(kw):
            cols.append(xp[:, i:i + stride * (ho - 1) + 1:stride,
                           j:j + stride * (wo - 1) + 1:stride, :])
    patches = jnp.concatenate(cols, axis=-1)  # (B, Ho, Wo, kh*kw*C)
    return patches.reshape(b * ho * wo, kh * kw * c), ho, wo


def conv_bn_relu(x_nhwc, w_oihw, gamma, beta, mean, var, *, stride=2, eps=1e-5):
    b, _, _, cin = x_nhwc.shape
    cout, cin2, kh, kw = w_oihw.shape
    assert cin == cin2
    pad = (kh - 1) // 2
    patches, ho, wo = _im2col(x_nhwc, kh, kw, stride, pad)
    # weight matrix matches patch feature order: ((kh_idx*kw + kw_idx)*Cin + cin)
    w_mat = jnp.transpose(w_oihw, (2, 3, 1, 0)).reshape(kh * kw * cin, cout)
    # Fold inference-mode BN into the matmul (conv has no bias -> exact fold).
    scale = gamma * jax.lax.rsqrt(var + eps)
    shift = beta - mean * scale
    w_mat = w_mat * scale[None, :]
    y = matmul_bias(patches, w_mat, shift, relu=True)
    return y.reshape(b, ho, wo, cout)


# ---------------------------------------------------------------------------
# GRU recurrence kernel: grid over time, hidden state lives in VMEM scratch.
# gx = x_t @ W_ih^T + b_ih is precomputed for all timesteps (big MXU matmul).
# ---------------------------------------------------------------------------
def _gru_cell_kernel(gx_ref, whh_ref, bhh_ref, o_ref, h_ref):
    t = pl.program_id(0)

    @pl.when(t == 0)
    def _init():
        h_ref[...] = jnp.zeros_like(h_ref)

    h = h_ref[...]          # (Bp, H)
    gx = gx_ref[0]          # (Bp, 3H), already includes b_ih
    gh = jnp.dot(h, whh_ref[...], preferred_element_type=jnp.float32) + bhh_ref[...]
    hd = h.shape[-1]
    r = jax.nn.sigmoid(gx[:, :hd] + gh[:, :hd])
    z = jax.nn.sigmoid(gx[:, hd:2 * hd] + gh[:, hd:2 * hd])
    n = jnp.tanh(gx[:, 2 * hd:] + r * gh[:, 2 * hd:])
    h_new = (1.0 - z) * n + z * h
    h_ref[...] = h_new

    @pl.when(t == pl.num_programs(0) - 1)
    def _finalize():
        o_ref[...] = h_new


def gru_last_hidden(gates_x, w_hh_t, b_hh_2d):
    """gates_x: (T, Bp, 3H) = x @ W_ih^T + b_ih. Returns h_T of shape (Bp, H)."""
    t_steps, bp, g3 = gates_x.shape
    h = g3 // 3
    return pl.pallas_call(
        _gru_cell_kernel,
        out_shape=jax.ShapeDtypeStruct((bp, h), jnp.float32),
        grid=(t_steps,),
        in_specs=[
            pl.BlockSpec((1, bp, g3), lambda t: (t, 0, 0)),
            pl.BlockSpec((h, g3), lambda t: (0, 0)),      # resident across grid
            pl.BlockSpec((1, g3), lambda t: (0, 0)),      # resident across grid
        ],
        out_specs=pl.BlockSpec((bp, h), lambda t: (0, 0)),
        scratch_shapes=[pltpu.VMEM((bp, h), jnp.float32)],
        compiler_params=pltpu.CompilerParams(dimension_semantics=("arbitrary",)),
    )(gates_x, w_hh_t, b_hh_2d)


# ---------------------------------------------------------------------------
# Full ReferenceEncoder forward (Pallas pipeline)
# ---------------------------------------------------------------------------
@jax.jit
def reference_encoder_forward(speech, params):
    b = speech.shape[0]
    x = speech[..., None]  # NHWC: (B, L, idim, 1)
    for layer in params["conv"]:
        x = conv_bn_relu(x, layer["w"], layer["gamma"], layer["beta"],
                         layer["mean"], layer["var"])
    _, t_len, f_len, c = x.shape
    # match torch: (B, C, T, F) -> transpose(1, 2) -> view(B, T, C*F)
    hs = jnp.transpose(x, (0, 1, 3, 2)).reshape(b, t_len, c * f_len)

    g = params["gru"]
    h_units = g["w_hh"].shape[1]
    gates_x = matmul_bias(
        hs.reshape(b * t_len, c * f_len), jnp.transpose(g["w_ih"]),
        g["b_ih"], relu=False)
    gates_x = gates_x.reshape(b, t_len, 3 * h_units).transpose(1, 0, 2)  # (T, B, 3H)
    bp = _round_up(b, 8)
    if bp != b:
        gates_x = jnp.pad(gates_x, ((0, 0), (0, bp - b), (0, 0)))
    h_last = gru_last_hidden(gates_x, jnp.transpose(g["w_hh"]),
                             g["b_hh"].reshape(1, 3 * h_units))
    return h_last[:b]


# ---------------------------------------------------------------------------
# Pure-JAX reference of the PyTorch forward
# ---------------------------------------------------------------------------
@jax.jit
def reference_encoder_ref(speech, params):
    x = speech[:, None, :, :]  # NCHW
    for layer in params["conv"]:
        x = jax.lax.conv_general_dilated(
            x, layer["w"], window_strides=(2, 2), padding=((1, 1), (1, 1)),
            dimension_numbers=("NCHW", "OIHW", "NCHW"),
            precision=jax.lax.Precision.HIGHEST)
        scale = layer["gamma"] * jax.lax.rsqrt(layer["var"] + 1e-5)
        shift = layer["beta"] - layer["mean"] * scale
        x = jnp.maximum(x * scale[None, :, None, None] + shift[None, :, None, None], 0.0)
    b, c, t_len, f_len = x.shape
    hs = jnp.transpose(x, (0, 2, 1, 3)).reshape(b, t_len, c * f_len)

    g = params["gru"]
    h_units = g["w_hh"].shape[1]

    def step(h, x_t):
        gx = jnp.dot(x_t, g["w_ih"].T, precision=jax.lax.Precision.HIGHEST) + g["b_ih"]
        gh = jnp.dot(h, g["w_hh"].T, precision=jax.lax.Precision.HIGHEST) + g["b_hh"]
        r = jax.nn.sigmoid(gx[:, :h_units] + gh[:, :h_units])
        z = jax.nn.sigmoid(gx[:, h_units:2 * h_units] + gh[:, h_units:2 * h_units])
        n = jnp.tanh(gx[:, 2 * h_units:] + r * gh[:, 2 * h_units:])
        return (1.0 - z) * n + z * h, None

    h0 = jnp.zeros((b, h_units), jnp.float32)
    h_t, _ = jax.lax.scan(step, h0, jnp.transpose(hs, (1, 0, 2)))
    return h_t


def init_params(key, idim, conv_chans, gru_units, kernel_size=3):
    conv_params = []
    in_ch = 1
    for out_ch in conv_chans:
        key, kw_, kg, kb, km, kv = jax.random.split(key, 6)
        fan_in = in_ch * kernel_size * kernel_size
        conv_params.append(dict(
            w=jax.random.normal(kw_, (out_ch, in_ch, kernel_size, kernel_size),
                                jnp.float32) / math.sqrt(fan_in),
            gamma=1.0 + 0.1 * jax.random.normal(kg, (out_ch,), jnp.float32),
            beta=0.1 * jax.random.normal(kb, (out_ch,), jnp.float32),
            mean=0.1 * jax.random.normal(km, (out_ch,), jnp.float32),
            var=jax.random.uniform(kv, (out_ch,), jnp.float32, 0.5, 1.5),
        ))
        in_ch = out_ch
    f = idim
    pad = (kernel_size - 1) // 2
    for _ in conv_chans:
        f = (f - kernel_size + 2 * pad) // 2 + 1
    gru_in = f * conv_chans[-1]
    key, k1, k2, k3, k4 = jax.random.split(key, 5)
    gru_params = dict(
        w_ih=jax.random.normal(k1, (3 * gru_units, gru_in), jnp.float32) / math.sqrt(gru_in),
        w_hh=jax.random.normal(k2, (3 * gru_units, gru_units), jnp.float32) / math.sqrt(gru_units),
        b_ih=0.1 * jax.random.normal(k3, (3 * gru_units,), jnp.float32),
        b_hh=0.1 * jax.random.normal(k4, (3 * gru_units,), jnp.float32),
    )
    return {"conv": conv_params, "gru": gru_params}


if __name__ == "__main__":
    key = jax.random.PRNGKey(0)

    # Smallest shapes consistent with the module defaults (6 stride-2 convs
    # need L >= 64 to leave at least one GRU timestep).
    batch, seq_len, idim = 2, 128, 80
    conv_chans = [32, 32, 64, 64, 128, 128]
    gru_units = 128

    key, pkey, xkey = jax.random.split(key, 3)
    params = init_params(pkey, idim, conv_chans, gru_units)
    speech = jax.random.normal(xkey, (batch, seq_len, idim), dtype=jnp.float32)

    out = jax.block_until_ready(reference_encoder_forward(speech, params))
    ref = jax.block_until_ready(reference_encoder_ref(speech, params))

    assert out.shape == (batch, gru_units), out.shape
    assert bool(jnp.all(jnp.isfinite(out)))
    max_err = float(jnp.max(jnp.abs(out - ref)))
    assert jnp.allclose(out, ref, rtol=2e-3, atol=2e-3), f"max abs err {max_err}"
    print("KERNEL_OK")
</pallas_src>

<mosaic_0001>
module attributes {stable_mosaic.version = 11 : i64} {
  func.func @_matmul_bias_relu_kernel(%arg0: i32, %arg1: memref<512x128xf32, #tpu.memory_space<vmem>>, %arg2: memref<128x32xf32, #tpu.memory_space<vmem>>, %arg3: memref<1x32xf32, #tpu.memory_space<vmem>>, %arg4: memref<512x32xf32, #tpu.memory_space<vmem>>) attributes {dimension_semantics = [#tpu.dimension_semantics<parallel>], iteration_bounds = array<i64: 10>, scalar_prefetch = 0 : i64, scratch_operands = 0 : i64, tpu.core_type = #tpu.core_type<tc>, window_params = [{transform_indices = @transform_0, window_bounds = array<i64: 512, 128>}, {pipeline_mode = #tpu.pipeline_mode<synchronous>, transform_indices = @transform_1, window_bounds = array<i64: 128, 32>}, {pipeline_mode = #tpu.pipeline_mode<synchronous>, transform_indices = @transform_2, window_bounds = array<i64: 1, 32>}, {transform_indices = @transform_3, window_bounds = array<i64: 512, 32>}]} {
    %c0 = arith.constant 0 : index
    %c0_0 = arith.constant 0 : index
    %0 = vector.load %arg1[%c0, %c0_0] : memref<512x128xf32, #tpu.memory_space<vmem>>, vector<512x128xf32>
    %c0_1 = arith.constant 0 : index
    %c0_2 = arith.constant 0 : index
    %1 = vector.load %arg2[%c0_1, %c0_2] : memref<128x32xf32, #tpu.memory_space<vmem>>, vector<128x32xf32>
    %cst = arith.constant dense<0.000000e+00> : vector<512x32xf32>
    %2 = tpu.matmul %0, %1, %cst {dimension_numbers = #tpu.dot_dimension_numbers<[1], [0], [0], [1], [0, 0, 1, 1], [], []>} : vector<512x128xf32>, vector<128x32xf32>, vector<512x32xf32> -> vector<512x32xf32>
    %c0_3 = arith.constant 0 : index
    %c0_4 = arith.constant 0 : index
    %3 = vector.load %arg3[%c0_3, %c0_4] : memref<1x32xf32, #tpu.memory_space<vmem>>, vector<1x32xf32>
    %4 = vector.broadcast %3 : vector<1x32xf32> to vector<512x32xf32>
    %5 = arith.addf %2, %4 : vector<512x32xf32>
    %cst_5 = arith.constant 0.000000e+00 : f32
    %6 = vector.broadcast %cst_5 : f32 to vector<512x32xf32>
    %7 = arith.maximumf %5, %6 : vector<512x32xf32>
    %c0_6 = arith.constant 0 : index
    %c0_7 = arith.constant 0 : index
    %8 = vector.load %arg4[%c0_6, %c0_7] : memref<512x32xf32, #tpu.memory_space<vmem>>, vector<512x32xf32>
    tpu.vector_store %arg4[%c0_6, %c0_7], %7 {strides = array<i32>} : memref<512x32xf32, #tpu.memory_space<vmem>>, vector<512x32xf32>,
    return
  }
  func.func @transform_0(%arg0: i32) -> (i32, i32) {
    %c0_i32 = arith.constant 0 : i32
    %c0_i32_0 = arith.constant 0 : i32
    return %arg0, %c0_i32 : i32, i32
  }
  func.func @transform_1(%arg0: i32) -> (i32, i32) {
    %c0_i32 = arith.constant 0 : i32
    %c0_i32_0 = arith.constant 0 : i32
    %c0_i32_1 = arith.constant 0 : i32
    return %c0_i32, %c0_i32_0 : i32, i32
  }
  func.func @transform_2(%arg0: i32) -> (i32, i32) {
    %c0_i32 = arith.constant 0 : i32
    %c0_i32_0 = arith.constant 0 : i32
    %c0_i32_1 = arith.constant 0 : i32
    return %c0_i32, %c0_i32_0 : i32, i32
  }
  func.func @transform_3(%arg0: i32) -> (i32, i32) {
    %c0_i32 = arith.constant 0 : i32
    %c0_i32_0 = arith.constant 0 : i32
    return %arg0, %c0_i32 : i32, i32
  }
}

module attributes {stable_mosaic.version = 11 : i64} {
  func.func @_matmul_bias_relu_kernel(%arg0: i32, %arg1: memref<512x384xf32, #tpu.memory_space<vmem>>, %arg2: memref<384x32xf32, #tpu.memory_space<vmem>>, %arg3: memref<1x32xf32, #tpu.memory_space<vmem>>, %arg4: memref<512x32xf32, #tpu.memory_space<vmem>>) attributes {dimension_semantics = [#tpu.dimension_semantics<parallel>], iteration_bounds = array<i64: 3>, scalar_prefetch = 0 : i64, scratch_operands = 0 : i64, tpu.core_type = #tpu.core_type<tc>, window_params = [{transform_indices = @transform_0, window_bounds = array<i64: 512, 384>}, {pipeline_mode = #tpu.pipeline_mode<synchronous>, transform_indices = @transform_1, window_bounds = array<i64: 384, 32>}, {pipeline_mode = #tpu.pipeline_mode<synchronous>, transform_indices = @transform_2, window_bounds = array<i64: 1, 32>}, {transform_indices = @transform_3, window_bounds = array<i64: 512, 32>}]} {
    %c0 = arith.constant 0 : index
    %c0_0 = arith.constant 0 : index
    %0 = vector.load %arg1[%c0, %c0_0] : memref<512x384xf32, #tpu.memory_space<vmem>>, vector<512x384xf32>
    %c0_1 = arith.constant 0 : index
    %c0_2 = arith.constant 0 : index
    %1 = vector.load %arg2[%c0_1, %c0_2] : memref<384x32xf32, #tpu.memory_space<vmem>>, vector<384x32xf32>
    %cst = arith.constant dense<0.000000e+00> : vector<512x32xf32>
    %2 = tpu.matmul %0, %1, %cst {dimension_numbers = #tpu.dot_dimension_numbers<[1], [0], [0], [1], [0, 0, 1, 1], [], []>} : vector<512x384xf32>, vector<384x32xf32>, vector<512x32xf32> -> vector<512x32xf32>
    %c0_3 = arith.constant 0 : index
    %c0_4 = arith.constant 0 : index
    %3 = vector.load %arg3[%c0_3, %c0_4] : memref<1x32xf32, #tpu.memory_space<vmem>>, vector<1x32xf32>
    %4 = vector.broadcast %3 : vector<1x32xf32> to vector<512x32xf32>
    %5 = arith.addf %2, %4 : vector<512x32xf32>
    %cst_5 = arith.constant 0.000000e+00 : f32
    %6 = vector.broadcast %cst_5 : f32 to vector<512x32xf32>
    %7 = arith.maximumf %5, %6 : vector<512x32xf32>
    %c0_6 = arith.constant 0 : index
    %c0_7 = arith.constant 0 : index
    %8 = vector.load %arg4[%c0_6, %c0_7] : memref<512x32xf32, #tpu.memory_space<vmem>>, vector<512x32xf32>
    tpu.vector_store %arg4[%c0_6, %c0_7], %7 {strides = array<i32>} : memref<512x32xf32, #tpu.memory_space<vmem>>, vector<512x32xf32>,
    return
  }
  func.func @transform_0(%arg0: i32) -> (i32, i32) {
    %c0_i32 = arith.constant 0 : i32
    %c0_i32_0 = arith.constant 0 : i32
    return %arg0, %c0_i32 : i32, i32
  }
  func.func @transform_1(%arg0: i32) -> (i32, i32) {
    %c0_i32 = arith.constant 0 : i32
    %c0_i32_0 = arith.constant 0 : i32
    %c0_i32_1 = arith.constant 0 : i32
    return %c0_i32, %c0_i32_0 : i32, i32
  }
  func.func @transform_2(%arg0: i32) -> (i32, i32) {
    %c0_i32 = arith.constant 0 : i32
    %c0_i32_0 = arith.constant 0 : i32
    %c0_i32_1 = arith.constant 0 : i32
    return %c0_i32, %c0_i32_0 : i32, i32
  }
  func.func @transform_3(%arg0: i32) -> (i32, i32) {
    %c0_i32 = arith.constant 0 : i32
    %c0_i32_0 = arith.constant 0 : i32
    return %arg0, %c0_i32 : i32, i32
  }
}

module attributes {stable_mosaic.version = 11 : i64} {
  func.func @_matmul_bias_relu_kernel(%arg0: i32, %arg1: memref<320x384xf32, #tpu.memory_space<vmem>>, %arg2: memref<384x64xf32, #tpu.memory_space<vmem>>, %arg3: memref<1x64xf32, #tpu.memory_space<vmem>>, %arg4: memref<320x64xf32, #tpu.memory_space<vmem>>) attributes {dimension_semantics = [#tpu.dimension_semantics<parallel>], iteration_bounds = array<i64: 1>, scalar_prefetch = 0 : i64, scratch_operands = 0 : i64, tpu.core_type = #tpu.core_type<tc>, window_params = [{transform_indices = @transform_0, window_bounds = array<i64: 320, 384>}, {pipeline_mode = #tpu.pipeline_mode<synchronous>, transform_indices = @transform_1, window_bounds = array<i64: 384, 64>}, {pipeline_mode = #tpu.pipeline_mode<synchronous>, transform_indices = @transform_2, window_bounds = array<i64: 1, 64>}, {transform_indices = @transform_3, window_bounds = array<i64: 320, 64>}]} {
    %c0 = arith.constant 0 : index
    %c0_0 = arith.constant 0 : index
    %0 = vector.load %arg1[%c0, %c0_0] : memref<320x384xf32, #tpu.memory_space<vmem>>, vector<320x384xf32>
    %c0_1 = arith.constant 0 : index
    %c0_2 = arith.constant 0 : index
    %1 = vector.load %arg2[%c0_1, %c0_2] : memref<384x64xf32, #tpu.memory_space<vmem>>, vector<384x64xf32>
    %cst = arith.constant dense<0.000000e+00> : vector<320x64xf32>
    %2 = tpu.matmul %0, %1, %cst {dimension_numbers = #tpu.dot_dimension_numbers<[1], [0], [0], [1], [0, 0, 1, 1], [], []>} : vector<320x384xf32>, vector<384x64xf32>, vector<320x64xf32> -> vector<320x64xf32>
    %c0_3 = arith.constant 0 : index
    %c0_4 = arith.constant 0 : index
    %3 = vector.load %arg3[%c0_3, %c0_4] : memref<1x64xf32, #tpu.memory_space<vmem>>, vector<1x64xf32>
    %4 = vector.broadcast %3 : vector<1x64xf32> to vector<320x64xf32>
    %5 = arith.addf %2, %4 : vector<320x64xf32>
    %cst_5 = arith.constant 0.000000e+00 : f32
    %6 = vector.broadcast %cst_5 : f32 to vector<320x64xf32>
    %7 = arith.maximumf %5, %6 : vector<320x64xf32>
    %c0_6 = arith.constant 0 : index
    %c0_7 = arith.constant 0 : index
    %8 = vector.load %arg4[%c0_6, %c0_7] : memref<320x64xf32, #tpu.memory_space<vmem>>, vector<320x64xf32>
    tpu.vector_store %arg4[%c0_6, %c0_7], %7 {strides = array<i32>} : memref<320x64xf32, #tpu.memory_space<vmem>>, vector<320x64xf32>,
    return
  }
  func.func @transform_0(%arg0: i32) -> (i32, i32) {
    %c0_i32 = arith.constant 0 : i32
    %c0_i32_0 = arith.constant 0 : i32
    return %arg0, %c0_i32 : i32, i32
  }
  func.func @transform_1(%arg0: i32) -> (i32, i32) {
    %c0_i32 = arith.constant 0 : i32
    %c0_i32_0 = arith.constant 0 : i32
    %c0_i32_1 = arith.constant 0 : i32
    return %c0_i32, %c0_i32_0 : i32, i32
  }
  func.func @transform_2(%arg0: i32) -> (i32, i32) {
    %c0_i32 = arith.constant 0 : i32
    %c0_i32_0 = arith.constant 0 : i32
    %c0_i32_1 = arith.constant 0 : i32
    return %c0_i32, %c0_i32_0 : i32, i32
  }
  func.func @transform_3(%arg0: i32) -> (i32, i32) {
    %c0_i32 = arith.constant 0 : i32
    %c0_i32_0 = arith.constant 0 : i32
    return %arg0, %c0_i32 : i32, i32
  }
}

module attributes {stable_mosaic.version = 11 : i64} {
  func.func @_matmul_bias_relu_kernel(%arg0: i32, %arg1: memref<80x640xf32, #tpu.memory_space<vmem>>, %arg2: memref<640x64xf32, #tpu.memory_space<vmem>>, %arg3: memref<1x64xf32, #tpu.memory_space<vmem>>, %arg4: memref<80x64xf32, #tpu.memory_space<vmem>>) attributes {dimension_semantics = [#tpu.dimension_semantics<parallel>], iteration_bounds = array<i64: 1>, scalar_prefetch = 0 : i64, scratch_operands = 0 : i64, tpu.core_type = #tpu.core_type<tc>, window_params = [{transform_indices = @transform_0, window_bounds = array<i64: 80, 640>}, {pipeline_mode = #tpu.pipeline_mode<synchronous>, transform_indices = @transform_1, window_bounds = array<i64: 640, 64>}, {pipeline_mode = #tpu.pipeline_mode<synchronous>, transform_indices = @transform_2, window_bounds = array<i64: 1, 64>}, {transform_indices = @transform_3, window_bounds = array<i64: 80, 64>}]} {
    %c0 = arith.constant 0 : index
    %c0_0 = arith.constant 0 : index
    %0 = vector.load %arg1[%c0, %c0_0] : memref<80x640xf32, #tpu.memory_space<vmem>>, vector<80x640xf32>
    %c0_1 = arith.constant 0 : index
    %c0_2 = arith.constant 0 : index
    %1 = vector.load %arg2[%c0_1, %c0_2] : memref<640x64xf32, #tpu.memory_space<vmem>>, vector<640x64xf32>
    %cst = arith.constant dense<0.000000e+00> : vector<80x64xf32>
    %2 = tpu.matmul %0, %1, %cst {dimension_numbers = #tpu.dot_dimension_numbers<[1], [0], [0], [1], [0, 0, 1, 1], [], []>} : vector<80x640xf32>, vector<640x64xf32>, vector<80x64xf32> -> vector<80x64xf32>
    %c0_3 = arith.constant 0 : index
    %c0_4 = arith.constant 0 : index
    %3 = vector.load %arg3[%c0_3, %c0_4] : memref<1x64xf32, #tpu.memory_space<vmem>>, vector<1x64xf32>
    %4 = vector.broadcast %3 : vector<1x64xf32> to vector<80x64xf32>
    %5 = arith.addf %2, %4 : vector<80x64xf32>
    %cst_5 = arith.constant 0.000000e+00 : f32
    %6 = vector.broadcast %cst_5 : f32 to vector<80x64xf32>
    %7 = arith.maximumf %5, %6 : vector<80x64xf32>
    %c0_6 = arith.constant 0 : index
    %c0_7 = arith.constant 0 : index
    %8 = vector.load %arg4[%c0_6, %c0_7] : memref<80x64xf32, #tpu.memory_space<vmem>>, vector<80x64xf32>
    tpu.vector_store %arg4[%c0_6, %c0_7], %7 {strides = array<i32>} : memref<80x64xf32, #tpu.memory_space<vmem>>, vector<80x64xf32>,
    return
  }
  func.func @transform_0(%arg0: i32) -> (i32, i32) {
    %c0_i32 = arith.constant 0 : i32
    %c0_i32_0 = arith.constant 0 : i32
    return %arg0, %c0_i32 : i32, i32
  }
  func.func @transform_1(%arg0: i32) -> (i32, i32) {
    %c0_i32 = arith.constant 0 : i32
    %c0_i32_0 = arith.constant 0 : i32
    %c0_i32_1 = arith.constant 0 : i32
    return %c0_i32, %c0_i32_0 : i32, i32
  }
  func.func @transform_2(%arg0: i32) -> (i32, i32) {
    %c0_i32 = arith.constant 0 : i32
    %c0_i32_0 = arith.constant 0 : i32
    %c0_i32_1 = arith.constant 0 : i32
    return %c0_i32, %c0_i32_0 : i32, i32
  }
  func.func @transform_3(%arg0: i32) -> (i32, i32) {
    %c0_i32 = arith.constant 0 : i32
    %c0_i32_0 = arith.constant 0 : i32
    return %arg0, %c0_i32 : i32, i32
  }
}

module attributes {stable_mosaic.version = 11 : i64} {
  func.func @_matmul_bias_relu_kernel(%arg0: i32, %arg1: memref<24x640xf32, #tpu.memory_space<vmem>>, %arg2: memref<640x128xf32, #tpu.memory_space<vmem>>, %arg3: memref<1x128xf32, #tpu.memory_space<vmem>>, %arg4: memref<24x128xf32, #tpu.memory_space<vmem>>) attributes {dimension_semantics = [#tpu.dimension_semantics<parallel>], iteration_bounds = array<i64: 1>, scalar_prefetch = 0 : i64, scratch_operands = 0 : i64, tpu.core_type = #tpu.core_type<tc>, window_params = [{transform_indices = @transform_0, window_bounds = array<i64: 24, 640>}, {pipeline_mode = #tpu.pipeline_mode<synchronous>, transform_indices = @transform_1, window_bounds = array<i64: 640, 128>}, {pipeline_mode = #tpu.pipeline_mode<synchronous>, transform_indices = @transform_2, window_bounds = array<i64: 1, 128>}, {transform_indices = @transform_3, window_bounds = array<i64: 24, 128>}]} {
    %c0 = arith.constant 0 : index
    %c0_0 = arith.constant 0 : index
    %0 = vector.load %arg1[%c0, %c0_0] : memref<24x640xf32, #tpu.memory_space<vmem>>, vector<24x640xf32>
    %c0_1 = arith.constant 0 : index
    %c0_2 = arith.constant 0 : index
    %1 = vector.load %arg2[%c0_1, %c0_2] : memref<640x128xf32, #tpu.memory_space<vmem>>, vector<640x128xf32>
    %cst = arith.constant dense<0.000000e+00> : vector<24x128xf32>
    %2 = tpu.matmul %0, %1, %cst {dimension_numbers = #tpu.dot_dimension_numbers<[1], [0], [0], [1], [0, 0, 1, 1], [], []>} : vector<24x640xf32>, vector<640x128xf32>, vector<24x128xf32> -> vector<24x128xf32>
    %c0_3 = arith.constant 0 : index
    %c0_4 = arith.constant 0 : index
    %3 = vector.load %arg3[%c0_3, %c0_4] : memref<1x128xf32, #tpu.memory_space<vmem>>, vector<1x128xf32>
    %4 = vector.broadcast %3 : vector<1x128xf32> to vector<24x128xf32>
    %5 = arith.addf %2, %4 : vector<24x128xf32>
    %cst_5 = arith.constant 0.000000e+00 : f32
    %6 = vector.broadcast %cst_5 : f32 to vector<24x128xf32>
    %7 = arith.maximumf %5, %6 : vector<24x128xf32>
    %c0_6 = arith.constant 0 : index
    %c0_7 = arith.constant 0 : index
    %8 = vector.load %arg4[%c0_6, %c0_7] : memref<24x128xf32, #tpu.memory_space<vmem>>, vector<24x128xf32>
    tpu.vector_store %arg4[%c0_6, %c0_7], %7 {strides = array<i32>} : memref<24x128xf32, #tpu.memory_space<vmem>>, vector<24x128xf32>,
    return
  }
  func.func @transform_0(%arg0: i32) -> (i32, i32) {
    %c0_i32 = arith.constant 0 : i32
    %c0_i32_0 = arith.constant 0 : i32
    return %arg0, %c0_i32 : i32, i32
  }
  func.func @transform_1(%arg0: i32) -> (i32, i32) {
    %c0_i32 = arith.constant 0 : i32
    %c0_i32_0 = arith.constant 0 : i32
    %c0_i32_1 = arith.constant 0 : i32
    return %c0_i32, %c0_i32_0 : i32, i32
  }
  func.func @transform_2(%arg0: i32) -> (i32, i32) {
    %c0_i32 = arith.constant 0 : i32
    %c0_i32_0 = arith.constant 0 : i32
    %c0_i32_1 = arith.constant 0 : i32
    return %c0_i32, %c0_i32_0 : i32, i32
  }
  func.func @transform_3(%arg0: i32) -> (i32, i32) {
    %c0_i32 = arith.constant 0 : i32
    %c0_i32_0 = arith.constant 0 : i32
    return %arg0, %c0_i32 : i32, i32
  }
}

module attributes {stable_mosaic.version = 11 : i64} {
  func.func @_matmul_bias_relu_kernel(%arg0: i32, %arg1: memref<8x1152xf32, #tpu.memory_space<vmem>>, %arg2: memref<1152x128xf32, #tpu.memory_space<vmem>>, %arg3: memref<1x128xf32, #tpu.memory_space<vmem>>, %arg4: memref<8x128xf32, #tpu.memory_space<vmem>>) attributes {dimension_semantics = [#tpu.dimension_semantics<parallel>], iteration_bounds = array<i64: 1>, scalar_prefetch = 0 : i64, scratch_operands = 0 : i64, tpu.core_type = #tpu.core_type<tc>, window_params = [{transform_indices = @transform_0, window_bounds = array<i64: 8, 1152>}, {pipeline_mode = #tpu.pipeline_mode<synchronous>, transform_indices = @transform_1, window_bounds = array<i64: 1152, 128>}, {pipeline_mode = #tpu.pipeline_mode<synchronous>, transform_indices = @transform_2, window_bounds = array<i64: 1, 128>}, {transform_indices = @transform_3, window_bounds = array<i64: 8, 128>}]} {
    %c0 = arith.constant 0 : index
    %c0_0 = arith.constant 0 : index
    %0 = vector.load %arg1[%c0, %c0_0] : memref<8x1152xf32, #tpu.memory_space<vmem>>, vector<8x1152xf32>
    %c0_1 = arith.constant 0 : index
    %c0_2 = arith.constant 0 : index
    %1 = vector.load %arg2[%c0_1, %c0_2] : memref<1152x128xf32, #tpu.memory_space<vmem>>, vector<1152x128xf32>
    %cst = arith.constant dense<0.000000e+00> : vector<8x128xf32>
    %2 = tpu.matmul %0, %1, %cst {dimension_numbers = #tpu.dot_dimension_numbers<[1], [0], [0], [1], [0, 0, 1, 1], [], []>} : vector<8x1152xf32>, vector<1152x128xf32>, vector<8x128xf32> -> vector<8x128xf32>
    %c0_3 = arith.constant 0 : index
    %c0_4 = arith.constant 0 : index
    %3 = vector.load %arg3[%c0_3, %c0_4] : memref<1x128xf32, #tpu.memory_space<vmem>>, vector<1x128xf32>
    %4 = vector.broadcast %3 : vector<1x128xf32> to vector<8x128xf32>
    %5 = arith.addf %2, %4 : vector<8x128xf32>
    %cst_5 = arith.constant 0.000000e+00 : f32
    %6 = vector.broadcast %cst_5 : f32 to vector<8x128xf32>
    %7 = arith.maximumf %5, %6 : vector<8x128xf32>
    %c0_6 = arith.constant 0 : index
    %c0_7 = arith.constant 0 : index
    %8 = vector.load %arg4[%c0_6, %c0_7] : memref<8x128xf32, #tpu.memory_space<vmem>>, vector<8x128xf32>
    tpu.vector_store %arg4[%c0_6, %c0_7], %7 {strides = array<i32>} : memref<8x128xf32, #tpu.memory_space<vmem>>, vector<8x128xf32>,
    return
  }
  func.func @transform_0(%arg0: i32) -> (i32, i32) {
    %c0_i32 = arith.constant 0 : i32
    %c0_i32_0 = arith.constant 0 : i32
    return %arg0, %c0_i32 : i32, i32
  }
  func.func @transform_1(%arg0: i32) -> (i32, i32) {
    %c0_i32 = arith.constant 0 : i32
    %c0_i32_0 = arith.constant 0 : i32
    %c0_i32_1 = arith.constant 0 : i32
    return %c0_i32, %c0_i32_0 : i32, i32
  }
  func.func @transform_2(%arg0: i32) -> (i32, i32) {
    %c0_i32 = arith.constant 0 : i32
    %c0_i32_0 = arith.constant 0 : i32
    %c0_i32_1 = arith.constant 0 : i32
    return %c0_i32, %c0_i32_0 : i32, i32
  }
  func.func @transform_3(%arg0: i32) -> (i32, i32) {
    %c0_i32 = arith.constant 0 : i32
    %c0_i32_0 = arith.constant 0 : i32
    return %arg0, %c0_i32 : i32, i32
  }
}

module attributes {stable_mosaic.version = 11 : i64} {
  func.func @_matmul_bias_kernel(%arg0: i32, %arg1: memref<8x256xf32, #tpu.memory_space<vmem>>, %arg2: memref<256x384xf32, #tpu.memory_space<vmem>>, %arg3: memref<1x384xf32, #tpu.memory_space<vmem>>, %arg4: memref<8x384xf32, #tpu.memory_space<vmem>>) attributes {dimension_semantics = [#tpu.dimension_semantics<parallel>], iteration_bounds = array<i64: 1>, scalar_prefetch = 0 : i64, scratch_operands = 0 : i64, tpu.core_type = #tpu.core_type<tc>, window_params = [{transform_indices = @transform_0, window_bounds = array<i64: 8, 256>}, {pipeline_mode = #tpu.pipeline_mode<synchronous>, transform_indices = @transform_1, window_bounds = array<i64: 256, 384>}, {pipeline_mode = #tpu.pipeline_mode<synchronous>, transform_indices = @transform_2, window_bounds = array<i64: 1, 384>}, {transform_indices = @transform_3, window_bounds = array<i64: 8, 384>}]} {
    %c0 = arith.constant 0 : index
    %c0_0 = arith.constant 0 : index
    %0 = vector.load %arg1[%c0, %c0_0] : memref<8x256xf32, #tpu.memory_space<vmem>>, vector<8x256xf32>
    %c0_1 = arith.constant 0 : index
    %c0_2 = arith.constant 0 : index
    %1 = vector.load %arg2[%c0_1, %c0_2] : memref<256x384xf32, #tpu.memory_space<vmem>>, vector<256x384xf32>
    %cst = arith.constant dense<0.000000e+00> : vector<8x384xf32>
    %2 = tpu.matmul %0, %1, %cst {dimension_numbers = #tpu.dot_dimension_numbers<[1], [0], [0], [1], [0, 0, 1, 1], [], []>} : vector<8x256xf32>, vector<256x384xf32>, vector<8x384xf32> -> vector<8x384xf32>
    %c0_3 = arith.constant 0 : index
    %c0_4 = arith.constant 0 : index
    %3 = vector.load %arg3[%c0_3, %c0_4] : memref<1x384xf32, #tpu.memory_space<vmem>>, vector<1x384xf32>
    %4 = vector.broadcast %3 : vector<1x384xf32> to vector<8x384xf32>
    %5 = arith.addf %2, %4 : vector<8x384xf32>
    %c0_5 = arith.constant 0 : index
    %c0_6 = arith.constant 0 : index
    %6 = vector.load %arg4[%c0_5, %c0_6] : memref<8x384xf32, #tpu.memory_space<vmem>>, vector<8x384xf32>
    tpu.vector_store %arg4[%c0_5, %c0_6], %5 {strides = array<i32>} : memref<8x384xf32, #tpu.memory_space<vmem>>, vector<8x384xf32>,
    return
  }
  func.func @transform_0(%arg0: i32) -> (i32, i32) {
    %c0_i32 = arith.constant 0 : i32
    %c0_i32_0 = arith.constant 0 : i32
    return %arg0, %c0_i32 : i32, i32
  }
  func.func @transform_1(%arg0: i32) -> (i32, i32) {
    %c0_i32 = arith.constant 0 : i32
    %c0_i32_0 = arith.constant 0 : i32
    %c0_i32_1 = arith.constant 0 : i32
    return %c0_i32, %c0_i32_0 : i32, i32
  }
  func.func @transform_2(%arg0: i32) -> (i32, i32) {
    %c0_i32 = arith.constant 0 : i32
    %c0_i32_0 = arith.constant 0 : i32
    %c0_i32_1 = arith.constant 0 : i32
    return %c0_i32, %c0_i32_0 : i32, i32
  }
  func.func @transform_3(%arg0: i32) -> (i32, i32) {
    %c0_i32 = arith.constant 0 : i32
    %c0_i32_0 = arith.constant 0 : i32
    return %arg0, %c0_i32 : i32, i32
  }
}

module attributes {stable_mosaic.version = 11 : i64} {
  func.func @_gru_cell_kernel(%arg0: i32, %arg1: memref<1x8x384xf32, #tpu.memory_space<vmem>>, %arg2: memref<128x384xf32, #tpu.memory_space<vmem>>, %arg3: memref<1x384xf32, #tpu.memory_space<vmem>>, %arg4: memref<8x128xf32, #tpu.memory_space<vmem>>, %arg5: memref<8x128xf32, #tpu.memory_space<vmem>>) attributes {dimension_semantics = [#tpu.dimension_semantics<arbitrary>], iteration_bounds = array<i64: 2>, scalar_prefetch = 0 : i64, scratch_operands = 1 : i64, tpu.core_type = #tpu.core_type<tc>, window_params = [{transform_indices = @transform_0, window_bounds = array<i64: 1, 8, 384>}, {pipeline_mode = #tpu.pipeline_mode<synchronous>, transform_indices = @transform_1, window_bounds = array<i64: 128, 384>}, {pipeline_mode = #tpu.pipeline_mode<synchronous>, transform_indices = @transform_2, window_bounds = array<i64: 1, 384>}, {pipeline_mode = #tpu.pipeline_mode<synchronous>, transform_indices = @transform_3, window_bounds = array<i64: 8, 128>}]} {
    %c0_i32 = arith.constant 0 : i32
    %0 = arith.cmpi eq, %arg0, %c0_i32 : i32
    %1 = arith.extui %0 : i1 to i32
    %c0_i32_0 = arith.constant 0 : i32
    %2 = arith.cmpi ne, %1, %c0_i32_0 : i32
    scf.if %2 {
      %cst_15 = arith.constant 0.000000e+00 : f32
      %41 = vector.broadcast %cst_15 : f32 to vector<8x128xf32>
      %c0_16 = arith.constant 0 : index
      %c0_17 = arith.constant 0 : index
      %42 = vector.load %arg5[%c0_16, %c0_17] : memref<8x128xf32, #tpu.memory_space<vmem>>, vector<8x128xf32>
      tpu.vector_store %arg5[%c0_16, %c0_17], %41 {strides = array<i32>} : memref<8x128xf32, #tpu.memory_space<vmem>>, vector<8x128xf32>,
    } else {
    }
    %c0 = arith.constant 0 : index
    %c0_1 = arith.constant 0 : index
    %3 = vector.load %arg5[%c0, %c0_1] : memref<8x128xf32, #tpu.memory_space<vmem>>, vector<8x128xf32>
    %c0_2 = arith.constant 0 : index
    %c0_3 = arith.constant 0 : index
    %c0_4 = arith.constant 0 : index
    %4 = vector.load %arg1[%c0_2, %c0_3, %c0_4] : memref<1x8x384xf32, #tpu.memory_space<vmem>>, vector<1x8x384xf32>
    %5 = vector.shape_cast %4 : vector<1x8x384xf32> to vector<8x384xf32>
    %c0_5 = arith.constant 0 : index
    %c0_6 = arith.constant 0 : index
    %6 = vector.load %arg2[%c0_5, %c0_6] : memref<128x384xf32, #tpu.memory_space<vmem>>, vector<128x384xf32>
    %cst = arith.constant dense<0.000000e+00> : vector<8x384xf32>
    %7 = tpu.matmul %3, %6, %cst {dimension_numbers = #tpu.dot_dimension_numbers<[1], [0], [0], [1], [0, 0, 1, 1], [], []>} : vector<8x128xf32>, vector<128x384xf32>, vector<8x384xf32> -> vector<8x384xf32>
    %c0_7 = arith.constant 0 : index
    %c0_8 = arith.constant 0 : index
    %8 = vector.load %arg3[%c0_7, %c0_8] : memref<1x384xf32, #tpu.memory_space<vmem>>, vector<1x384xf32>
    %9 = vector.broadcast %8 : vector<1x384xf32> to vector<8x384xf32>
    %10 = arith.addf %7, %9 : vector<8x384xf32>
    %11 = vector.extract_strided_slice %5 {offsets = [0, 0], sizes = [8, 128], strides = [1, 1]} : vector<8x384xf32> to vector<8x128xf32>
    %12 = vector.extract_strided_slice %10 {offsets = [0, 0], sizes = [8, 128], strides = [1, 1]} : vector<8x384xf32> to vector<8x128xf32>
    %13 = arith.addf %11, %12 : vector<8x128xf32>
    %14 = arith.negf %13 : vector<8x128xf32>
    %15 = math.exp %14 : vector<8x128xf32>
    %cst_9 = arith.constant 1.000000e+00 : f32
    %16 = vector.broadcast %cst_9 : f32 to vector<8x128xf32>
    %17 = arith.addf %16, %15 : vector<8x128xf32>
    %18 = arith.divf %16, %17 : vector<8x128xf32>
    %19 = vector.extract_strided_slice %5 {offsets = [0, 128], sizes = [8, 128], strides = [1, 1]} : vector<8x384xf32> to vector<8x128xf32>
    %20 = vector.extract_strided_slice %10 {offsets = [0, 128], sizes = [8, 128], strides = [1, 1]} : vector<8x384xf32> to vector<8x128xf32>
    %21 = arith.addf %19, %20 : vector<8x128xf32>
    %22 = arith.negf %21 : vector<8x128xf32>
    %23 = math.exp %22 : vector<8x128xf32>
    %cst_10 = arith.constant 1.000000e+00 : f32
    %24 = vector.broadcast %cst_10 : f32 to vector<8x128xf32>
    %25 = arith.addf %24, %23 : vector<8x128xf32>
    %26 = arith.divf %24, %25 : vector<8x128xf32>
    %27 = vector.extract_strided_slice %5 {offsets = [0, 256], sizes = [8, 128], strides = [1, 1]} : vector<8x384xf32> to vector<8x128xf32>
    %28 = vector.extract_strided_slice %10 {offsets = [0, 256], sizes = [8, 128], strides = [1, 1]} : vector<8x384xf32> to vector<8x128xf32>
    %29 = arith.mulf %18, %28 : vector<8x128xf32>
    %30 = arith.addf %27, %29 : vector<8x128xf32>
    %31 = math.tanh %30 : vector<8x128xf32>
    %cst_11 = arith.constant 1.000000e+00 : f32
    %32 = vector.broadcast %cst_11 : f32 to vector<8x128xf32>
    %33 = arith.subf %32, %26 : vector<8x128xf32>
    %34 = arith.mulf %33, %31 : vector<8x128xf32>
    %35 = arith.mulf %26, %3 : vector<8x128xf32>
    %36 = arith.addf %34, %35 : vector<8x128xf32>
    %c0_12 = arith.constant 0 : index
    %c0_13 = arith.constant 0 : index
    %37 = vector.load %arg5[%c0_12, %c0_13] : memref<8x128xf32, #tpu.memory_space<vmem>>, vector<8x128xf32>
    tpu.vector_store %arg5[%c0_12, %c0_13], %36 {strides = array<i32>} : memref<8x128xf32, #tpu.memory_space<vmem>>, vector<8x128xf32>,
    %c1_i32 = arith.constant 1 : i32
    %38 = arith.cmpi eq, %arg0, %c1_i32 : i32
    %39 = arith.extui %38 : i1 to i32
    %c0_i32_14 = arith.constant 0 : i32
    %40 = arith.cmpi ne, %39, %c0_i32_14 : i32
    scf.if %40 {
      %c0_15 = arith.constant 0 : index
      %c0_16 = arith.constant 0 : index
      %41 = vector.load %arg4[%c0_15, %c0_16] : memref<8x128xf32, #tpu.memory_space<vmem>>, vector<8x128xf32>
      tpu.vector_store %arg4[%c0_15, %c0_16], %36 {strides = array<i32>} : memref<8x128xf32, #tpu.memory_space<vmem>>, vector<8x128xf32>,
    } else {
    }
    return
  }
  func.func @transform_0(%arg0: i32) -> (i32, i32, i32) {
    %c0_i32 = arith.constant 0 : i32
    %c0_i32_0 = arith.constant 0 : i32
    %c0_i32_1 = arith.constant 0 : i32
    return %arg0, %c0_i32, %c0_i32_0 : i32, i32, i32
  }
  func.func @transform_1(%arg0: i32) -> (i32, i32) {
    %c0_i32 = arith.constant 0 : i32
    %c0_i32_0 = arith.constant 0 : i32
    %c0_i32_1 = arith.constant 0 : i32
    return %c0_i32, %c0_i32_0 : i32, i32
  }
  func.func @transform_2(%arg0: i32) -> (i32, i32) {
    %c0_i32 = arith.constant 0 : i32
    %c0_i32_0 = arith.constant 0 : i32
    %c0_i32_1 = arith.constant 0 : i32
    return %c0_i32, %c0_i32_0 : i32, i32
  }
  func.func @transform_3(%arg0: i32) -> (i32, i32) {
    %c0_i32 = arith.constant 0 : i32
    %c0_i32_0 = arith.constant 0 : i32
    %c0_i32_1 = arith.constant 0 : i32
    return %c0_i32, %c0_i32_0 : i32, i32
  }
}

</mosaic_0001>

<bundles_post_ra>
// kernel: reference_encoder_forward.8
= control target key start
LH: loop header
LB: loop body
LE: loop exit
PB: predicated region body
PF: predicated region fallthrough
CT: control target
= control target key end

     0   :  { %s1119_s12 = smov 0   ;;  %s1458_s0 = inlined_call_operand.vmem [shape: f32[5120,128], index: 0, kind: input, shape index: {}]   ;;  %s1459_s1 = inlined_call_operand.vmem [shape: f32[128,32], index: 1, kind: input, shape index: {}]   ;;  %s1460_s2 = inlined_call_operand.vmem [shape: f32[1,32], index: 2, kind: input, shape index: {}]   ;;  %s1461_s3 = inlined_call_operand.vmem [shape: f32[5120,32], index: 3, kind: output, shape index: {}]  }
   0x1 LB: > { %s831_s13 = sadd.s32 4294967295, %s1097_s12   ;;  %p835_p0 = scmp.ge.s32.totalorder %s1097_s12, 1  ;;  %s1097_s12 = sphi %s1119_s12, %s13_s12  }
   0x2   : > { %p138_p1 = scmp.lt.s32.totalorder %s1097_s12, 11 }
   0x4   : > { %p139_p2 = pnand %p835_p0, %p138_p1 }
   0x5   : > { %s836_s30 = sshll.u32 (!%p139_p2), %s831_s13, 6 }
   0x6   : > { %142 = sbr.rel (%p139_p2) target bundleno = 305 (0x131), region = 32  ;;  %p163_p3 = scmp.lt.s32.totalorder (!%p139_p2), %s836_s30, 639 }
   0xb   : > { %v253_v0 = vld [vmem:[%s1459_s1 + $0x78] sm:$0xff]  ;;  %v252_v1 = vld [vmem:[%s1459_s1 + $0x70] sm:$0xff]  ;;  %v251_v2 = vld [vmem:[%s1459_s1 + $0x68] sm:$0xff]  ;;  %s1463_s30 = smov (!%p163_p3, %s836_s30), 639  ;;  %vm710_vm0 = vcmask 261120  }
   0xc   : > { %923 = vmatprep.subr.mxu0 %v253_v0  ;;  %1051 = vmatprep.subr.mxu1 %v253_v0  ;;  %v250_v3 = vld [vmem:[%s1459_s1 + $0x60] sm:$0xff]  ;;  %v249_v4 = vld [vmem:[%s1459_s1 + $0x58] sm:$0xff]  ;;  %v248_v5 = vld [vmem:[%s1459_s1 + $0x50] sm:$0xff]  ;;  %s837_s17 = sshll.u32 %s1463_s30, 3 }
   0xd   : > { %924 = vmatpush3.msra.mxu0 %v253_v0  ;;  %1067 = vmatpush3.msra.mxu1 %v253_v0  ;;  %v247_v6 = vld [vmem:[%s1459_s1 + $0x48] sm:$0xff]  ;;  %v246_v7 = vld [vmem:[%s1459_s1 + $0x40] sm:$0xff]  ;;  %v245_v8 = vld [vmem:[%s1459_s1 + $0x38] sm:$0xff]  ;;  %s1182_s22 = scalar_lea.vmem %s1458_s0, %s837_s17  ;;  %s1263_s29 = scalar_lea.vmem %s1461_s3, %s837_s17 }
   0xe   : > { %925 = vmatprep.subr.mxu0 %v252_v1  ;;  %1052 = vmatprep.subr.mxu1 %v252_v1  ;;  %v244_v9 = vld [vmem:[%s1459_s1 + $0x30] sm:$0xff]  ;;  %v243_v10 = vld [vmem:[%s1459_s1 + $0x28] sm:$0xff]  ;;  %v242_v11 = vld [vmem:[%s1459_s1 + $0x20] sm:$0xff] }
   0xf   : > { %926 = vmatpush3.msra.mxu0 %v252_v1  ;;  %1068 = vmatpush3.msra.mxu1 %v252_v1  ;;  %v241_v12 = vld [vmem:[%s1459_s1 + $0x18] sm:$0xff]  ;;  %v240_v13 = vld [vmem:[%s1459_s1 + $0x10] sm:$0xff]  ;;  %v239_v14 = vld [vmem:[%s1459_s1 + $0x8] sm:$0xff] }
  0x10   : > { %927 = vmatprep.subr.mxu0 %v251_v2  ;;  %1053 = vmatprep.subr.mxu1 %v251_v2  ;;  %v238_v15 = vld [vmem:[%s1459_s1] sm:$0xff]  ;;  %v175_v18 = vld [vmem:[%s1182_s22 + $0x8] sm:$0xff]  ;;  %v176_v20 = vld [vmem:[%s1182_s22 + $0x10] sm:$0xff] }
  0x11   : > { %928 = vmatpush3.msra.mxu0 %v251_v2  ;;  %1069 = vmatpush3.msra.mxu1 %v251_v2  ;;  %v174_v16 = vld [vmem:[%s1182_s22] sm:$0xff]  ;;  %v207_v19 = vld [vmem:[%s1182_s22 + $0x108] sm:$0xff]  ;;  %v208_v21 = vld [vmem:[%s1182_s22 + $0x110] sm:$0xff] }
  0x12   : > { %929 = vmatprep.subr.mxu0 %v250_v3  ;;  %1054 = vmatprep.subr.mxu1 %v250_v3  ;;  %v206_v17 = vld [vmem:[%s1182_s22 + $0x100] sm:$0xff]  ;;  %v177_v22 = vld [vmem:[%s1182_s22 + $0x18] sm:$0xff]  ;;  %v179_v26 = vld [vmem:[%s1182_s22 + $0x28] sm:$0xff] }
  0x13   : > { %930 = vmatpush3.msra.mxu0 %v250_v3  ;;  %1070 = vmatpush3.msra.mxu1 %v250_v3  ;;  %v209_v23 = vld [vmem:[%s1182_s22 + $0x118] sm:$0xff]  ;;  %v178_v24 = vld [vmem:[%s1182_s22 + $0x20] sm:$0xff]  ;;  %v211_v27 = vld [vmem:[%s1182_s22 + $0x128] sm:$0xff] }
  0x14   : > { %931 = vmatprep.subr.mxu0 %v249_v4  ;;  %1055 = vmatprep.subr.mxu1 %v249_v4  ;;  %v210_v25 = vld [vmem:[%s1182_s22 + $0x120] sm:$0xff]  ;;  %v180_v28 = vld [vmem:[%s1182_s22 + $0x30] sm:$0xff]  ;;  %v181_v30 = vld [vmem:[%s1182_s22 + $0x38] sm:$0xff] }
  0x15   : > { %932 = vmatpush3.msra.mxu0 %v249_v4  ;;  %1071 = vmatpush3.msra.mxu1 %v249_v4  ;;  %v212_v29 = vld [vmem:[%s1182_s22 + $0x130] sm:$0xff]  ;;  %v213_v31 = vld [vmem:[%s1182_s22 + $0x138] sm:$0xff]  ;;  %v182_v32 = vld [vmem:[%s1182_s22 + $0x40] sm:$0xff] }
  0x16   : > { %933 = vmatprep.subr.mxu0 %v248_v5  ;;  %1056 = vmatprep.subr.mxu1 %v248_v5  ;;  %v214_v33 = vld [vmem:[%s1182_s22 + $0x140] sm:$0xff]  ;;  %v183_v34 = vld [vmem:[%s1182_s22 + $0x48] sm:$0xff]  ;;  %v184_v36 = vld [vmem:[%s1182_s22 + $0x50] sm:$0xff] }
  0x17   : > { %934 = vmatpush3.msra.mxu0 %v248_v5  ;;  %1072 = vmatpush3.msra.mxu1 %v248_v5  ;;  %v215_v35 = vld [vmem:[%s1182_s22 + $0x148] sm:$0xff]  ;;  %v216_v37 = vld [vmem:[%s1182_s22 + $0x150] sm:$0xff]  ;;  %v185_v38 = vld [vmem:[%s1182_s22 + $0x58] sm:$0xff] }
  0x18   : > { %935 = vmatprep.subr.mxu0 %v247_v6  ;;  %1057 = vmatprep.subr.mxu1 %v247_v6  ;;  %v217_v39 = vld [vmem:[%s1182_s22 + $0x158] sm:$0xff]  ;;  %v186_v40 = vld [vmem:[%s1182_s22 + $0x60] sm:$0xff]  ;;  %v187_v42 = vld [vmem:[%s1182_s22 + $0x68] sm:$0xff] }
  0x19   : > { %936 = vmatpush3.msra.mxu0 %v247_v6  ;;  %1073 = vmatpush3.msra.mxu1 %v247_v6  ;;  %v218_v41 = vld [vmem:[%s1182_s22 + $0x160] sm:$0xff]  ;;  %v219_v43 = vld [vmem:[%s1182_s22 + $0x168] sm:$0xff]  ;;  %v188_v44 = vld [vmem:[%s1182_s22 + $0x70] sm:$0xff] }
  0x1a   : > { %937 = vmatprep.subr.mxu0 %v246_v7  ;;  %1058 = vmatprep.subr.mxu1 %v246_v7  ;;  %v220_v45 = vld [vmem:[%s1182_s22 + $0x170] sm:$0xff]  ;;  %v189_v46 = vld [vmem:[%s1182_s22 + $0x78] sm:$0xff]  ;;  %v190_v48 = vld [vmem:[%s1182_s22 + $0x80] sm:$0xff] }
  0x1b   : > { %938 = vmatpush3.msra.mxu0 %v246_v7  ;;  %1074 = vmatpush3.msra.mxu1 %v246_v7  ;;  %v221_v47 = vld [vmem:[%s1182_s22 + $0x178] sm:$0xff]  ;;  %v222_v49 = vld [vmem:[%s1182_s22 + $0x180] sm:$0xff]  ;;  %v191_v50 = vld [vmem:[%s1182_s22 + $0x88] sm:$0xff] }
  0x1c   : > { %939 = vmatprep.subr.mxu0 %v245_v8  ;;  %1059 = vmatprep.subr.mxu1 %v245_v8  ;;  %v223_v51 = vld [vmem:[%s1182_s22 + $0x188] sm:$0xff]  ;;  %v192_v52 = vld [vmem:[%s1182_s22 + $0x90] sm:$0xff]  ;;  %v193_v54 = vld [vmem:[%s1182_s22 + $0x98] sm:$0xff] }
  0x1d   : > { %940 = vmatpush3.msra.mxu0 %v245_v8  ;;  %1075 = vmatpush3.msra.mxu1 %v245_v8  ;;  %v224_v53 = vld [vmem:[%s1182_s22 + $0x190] sm:$0xff]  ;;  %v225_v55 = vld [vmem:[%s1182_s22 + $0x198] sm:$0xff]  ;;  %v194_v56 = vld [vmem:[%s1182_s22 + $0xa0] sm:$0xff] }
  0x1e   : > { %941 = vmatprep.subr.mxu0 %v244_v9  ;;  %1060 = vmatprep.subr.mxu1 %v244_v9  ;;  %v226_v57 = vld [vmem:[%s1182_s22 + $0x1a0] sm:$0xff]  ;;  %v195_v58 = vld [vmem:[%s1182_s22 + $0xa8] sm:$0xff]  ;;  %v196_v60 = vld [vmem:[%s1182_s22 + $0xb0] sm:$0xff] }
  0x1f   : > { %942 = vmatpush3.msra.mxu0 %v244_v9  ;;  %1076 = vmatpush3.msra.mxu1 %v244_v9  ;;  %v227_v59 = vld [vmem:[%s1182_s22 + $0x1a8] sm:$0xff]  ;;  %v228_v61 = vld [vmem:[%s1182_s22 + $0x1b0] sm:$0xff]  ;;  %v197_v62 = vld [vmem:[%s1182_s22 + $0xb8] sm:$0xff] }
  0x20   : > { %943 = vmatprep.subr.mxu0 %v243_v10  ;;  %1061 = vmatprep.subr.mxu1 %v243_v10  ;;  %v229_v63 = vld [vmem:[%s1182_s22 + $0x1b8] sm:$0xff]  ;;  %v198_v0 = vld [vmem:[%s1182_s22 + $0xc0] sm:$0xff]  ;;  %v199_v2 = vld [vmem:[%s1182_s22 + $0xc8] sm:$0xff] }
  0x21   : > { %944 = vmatpush3.msra.mxu0 %v243_v10  ;;  %1077 = vmatpush3.msra.mxu1 %v243_v10  ;;  %v230_v1 = vld [vmem:[%s1182_s22 + $0x1c0] sm:$0xff]  ;;  %v231_v3 = vld [vmem:[%s1182_s22 + $0x1c8] sm:$0xff]  ;;  %v200_v4 = vld [vmem:[%s1182_s22 + $0xd0] sm:$0xff] }
  0x22   : > { %945 = vmatprep.subr.mxu0 %v242_v11  ;;  %1062 = vmatprep.subr.mxu1 %v242_v11  ;;  %v232_v5 = vld [vmem:[%s1182_s22 + $0x1d0] sm:$0xff]  ;;  %v201_v6 = vld [vmem:[%s1182_s22 + $0xd8] sm:$0xff]  ;;  %v202_v8 = vld [vmem:[%s1182_s22 + $0xe0] sm:$0xff] }
  0x23   : > { %946 = vmatpush3.msra.mxu0 %v242_v11  ;;  %1078 = vmatpush3.msra.mxu1 %v242_v11  ;;  %v233_v7 = vld [vmem:[%s1182_s22 + $0x1d8] sm:$0xff]  ;;  %v234_v9 = vld [vmem:[%s1182_s22 + $0x1e0] sm:$0xff]  ;;  %v203_v10 = vld [vmem:[%s1182_s22 + $0xe8] sm:$0xff] }
  0x24   : > { %947 = vmatprep.subr.mxu0 %v241_v12  ;;  %1063 = vmatprep.subr.mxu1 %v241_v12  ;;  %v235_v11 = vld [vmem:[%s1182_s22 + $0x1e8] sm:$0xff] }
  0x25   : > { %948 = vmatpush3.msra.mxu0 %v241_v12  ;;  %1079 = vmatpush3.msra.mxu1 %v241_v12  ;;  %v204_v12 = vld [vmem:[%s1182_s22 + $0xf0] sm:$0xff] }
  0x26   : > { %949 = vmatprep.subr.mxu0 %v240_v13  ;;  %1064 = vmatprep.subr.mxu1 %v240_v13 }
  0x27   : > { %950 = vmatpush3.msra.mxu0 %v240_v13  ;;  %1080 = vmatpush3.msra.mxu1 %v240_v13  ;;  %v236_v13 = vld [vmem:[%s1182_s22 + $0x1f0] sm:$0xff] }
  0x28   : > { %951 = vmatprep.subr.mxu0 %v239_v14  ;;  %1065 = vmatprep.subr.mxu1 %v239_v14 }
  0x29   : > { %952 = vmatpush3.msra.mxu0 %v239_v14  ;;  %1081 = vmatpush3.msra.mxu1 %v239_v14  ;;  %v205_v14 = vld [vmem:[%s1182_s22 + $0xf8] sm:$0xff] }
  0x2a   : > { %953 = vmatprep.subr.mxu0 %v238_v15  ;;  %1066 = vmatprep.subr.mxu1 %v238_v15 }
  0x2b   : > { %954 = vmatpush3.msra.mxu0 %v238_v15  ;;  %1082 = vmatpush3.msra.mxu1 %v238_v15  ;;  %v237_v15 = vld [vmem:[%s1182_s22 + $0x1f8] sm:$0xff] }
  0x2c   : > { %955 = vmatprep.mubr.f32.mxu0 %v174_v16  ;;  %1003 = vmatprep.mubr.f32.mxu1 %v206_v17  ;;  %v1254_v16 = vld [vmem:[%s1460_s2] ss:$0 sm:$0xff] }
  0x2d   : > { %956 = vmatmul.mubr.f32.vlgmr.msra.gmra.mxu0 %v175_v18  ;;  %1004 = vmatmul.mubr.f32.vlgmr.msra.gmra.mxu1 %v207_v19 }
  0x2e   : > { %958 = vmatprep.mubr.f32.mxu0 %v176_v20  ;;  %1006 = vmatprep.mubr.f32.mxu1 %v208_v21 }
  0x31   : > { %959 = vmatmul.mubr.f32.gmra.mxu0 %v177_v22  ;;  %1007 = vmatmul.mubr.f32.gmra.mxu1 %v209_v23 }
  0x32   : > { %961 = vmatprep.mubr.f32.mxu0 %v178_v24  ;;  %1009 = vmatprep.mubr.f32.mxu1 %v210_v25 }
  0x35   : > { %962 = vmatmul.mubr.f32.gmra.mxu0 %v179_v26  ;;  %1010 = vmatmul.mubr.f32.gmra.mxu1 %v211_v27 }
  0x36   : > { %964 = vmatprep.mubr.f32.mxu0 %v180_v28  ;;  %1012 = vmatprep.mubr.f32.mxu1 %v212_v29 }
  0x39   : > { %965 = vmatmul.mubr.f32.gmra.mxu0 %v181_v30  ;;  %1013 = vmatmul.mubr.f32.gmra.mxu1 %v213_v31 }
  0x3a   : > { %967 = vmatprep.mubr.f32.mxu0 %v182_v32  ;;  %1015 = vmatprep.mubr.f32.mxu1 %v214_v33 }
  0x3d   : > { %968 = vmatmul.mubr.f32.gmra.mxu0 %v183_v34  ;;  %1016 = vmatmul.mubr.f32.gmra.mxu1 %v215_v35 }
  0x3e   : > { %970 = vmatprep.mubr.f32.mxu0 %v184_v36  ;;  %1018 = vmatprep.mubr.f32.mxu1 %v216_v37 }
  0x41   : > { %971 = vmatmul.mubr.f32.gmra.mxu0 %v185_v38  ;;  %1019 = vmatmul.mubr.f32.gmra.mxu1 %v217_v39 }
  0x42   : > { %973 = vmatprep.mubr.f32.mxu0 %v186_v40  ;;  %1021 = vmatprep.mubr.f32.mxu1 %v218_v41 }
  0x45   : > { %974 = vmatmul.mubr.f32.gmra.mxu0 %v187_v42  ;;  %1022 = vmatmul.mubr.f32.gmra.mxu1 %v219_v43 }
  0x46   : > { %976 = vmatprep.mubr.f32.mxu0 %v188_v44  ;;  %1024 = vmatprep.mubr.f32.mxu1 %v220_v45 }
  0x49   : > { %977 = vmatmul.mubr.f32.gmra.mxu0 %v189_v46  ;;  %1025 = vmatmul.mubr.f32.gmra.mxu1 %v221_v47 }
  0x4a   : > { %979 = vmatprep.mubr.f32.mxu0 %v190_v48  ;;  %1027 = vmatprep.mubr.f32.mxu1 %v222_v49 }
  0x4d   : > { %980 = vmatmul.mubr.f32.gmra.mxu0 %v191_v50  ;;  %1028 = vmatmul.mubr.f32.gmra.mxu1 %v223_v51 }
  0x4e   : > { %982 = vmatprep.mubr.f32.mxu0 %v192_v52  ;;  %1030 = vmatprep.mubr.f32.mxu1 %v224_v53 }
  0x51   : > { %983 = vmatmul.mubr.f32.gmra.mxu0 %v193_v54  ;;  %1031 = vmatmul.mubr.f32.gmra.mxu1 %v225_v55 }
  0x52   : > { %985 = vmatprep.mubr.f32.mxu0 %v194_v56  ;;  %1033 = vmatprep.mubr.f32.mxu1 %v226_v57 }
  0x55   : > { %986 = vmatmul.mubr.f32.gmra.mxu0 %v195_v58  ;;  %1034 = vmatmul.mubr.f32.gmra.mxu1 %v227_v59 }
  0x56   : > { %988 = vmatprep.mubr.f32.mxu0 %v196_v60  ;;  %1036 = vmatprep.mubr.f32.mxu1 %v228_v61 }
  0x59   : > { %989 = vmatmul.mubr.f32.gmra.mxu0 %v197_v62  ;;  %1037 = vmatmul.mubr.f32.gmra.mxu1 %v229_v63 }
  0x5a   : > { %991 = vmatprep.mubr.f32.mxu0 %v198_v0  ;;  %1039 = vmatprep.mubr.f32.mxu1 %v230_v1 }
  0x5d   : > { %992 = vmatmul.mubr.f32.gmra.mxu0 %v199_v2  ;;  %1040 = vmatmul.mubr.f32.gmra.mxu1 %v231_v3 }
  0x5e   : > { %994 = vmatprep.mubr.f32.mxu0 %v200_v4  ;;  %1042 = vmatprep.mubr.f32.mxu1 %v232_v5 }
  0x61   : > { %995 = vmatmul.mubr.f32.gmra.mxu0 %v201_v6  ;;  %1043 = vmatmul.mubr.f32.gmra.mxu1 %v233_v7 }
  0x62   : > { %997 = vmatprep.mubr.f32.mxu0 %v202_v8  ;;  %1045 = vmatprep.mubr.f32.mxu1 %v234_v9 }
  0x65   : > { %998 = vmatmul.mubr.f32.gmra.mxu0 %v203_v10  ;;  %1046 = vmatmul.mubr.f32.gmra.mxu1 %v235_v11 }
  0x66   : > { %1000 = vmatprep.mubr.f32.mxu0 %v204_v12  ;;  %1048 = vmatprep.mubr.f32.mxu1 %v236_v13 }
  0x69   : > { %1001 = vmatmul.mubr.f32.gmra.mxu0 %v205_v14  ;;  %1049 = vmatmul.mubr.f32.gmra.mxu1 %v237_v15 }
  0xed   : > { %v957_v17 = vpop.f32.mrf.mxu0  ;;  %v1005_v18 = vpop.f32.mrf.mxu1 }
  0xee   : > { %v333_v19 = vadd.f32 %v957_v17, %v1254_v16  ;;  %v493_v20 = vadd.f32 %v1005_v18, %v1254_v16 }
  0xef   : > { %v327_v21 = vpop.f32.mrf.mxu0  ;;  %v487_v22 = vpop.f32.mrf.mxu1 }
  0xf0   : > { %v647_v23 = vmax.f32 %v333_v19, 0.0  ;;  %v679_v24 = vmax.f32 %v493_v20, 0.0  ;;  %v328_v25 = vadd.f32 %v1254_v16, %v327_v21  ;;  %v488_v26 = vadd.f32 %v1254_v16, %v487_v22 }
  0xf1   : > { %v960_v27 = vpop.f32.mrf.mxu0  ;;  %v1008_v28 = vpop.f32.mrf.mxu1 }
  0xf2   : > { %712 = vst.msk [vmem:[%s1263_s29 + $0x8] sm:$0xff] %vm710_vm0, %v647_v23  ;;  %744 = vst.msk [vmem:[%s1263_s29 + $0x108] sm:$0xff] %vm710_vm0, %v679_v24  ;;  %v646_v29 = vmax.f32 %v328_v25, 0.0  ;;  %v678_v30 = vmax.f32 %v488_v26, 0.0  ;;  %v343_v31 = vadd.f32 %v960_v27, %v1254_v16  ;;  %v503_v32 = vadd.f32 %v1008_v28, %v1254_v16 }
  0xf3   : > { %v337_v33 = vpop.f32.mrf.mxu0  ;;  %v497_v34 = vpop.f32.mrf.mxu1 }
  0xf4   : > { %711 = vst.msk [vmem:[%s1263_s29] sm:$0xff] %vm710_vm0, %v646_v29  ;;  %743 = vst.msk [vmem:[%s1263_s29 + $0x100] sm:$0xff] %vm710_vm0, %v678_v30  ;;  %v649_v35 = vmax.f32 %v343_v31, 0.0  ;;  %v681_v36 = vmax.f32 %v503_v32, 0.0  ;;  %v338_v37 = vadd.f32 %v1254_v16, %v337_v33  ;;  %v498_v38 = vadd.f32 %v1254_v16, %v497_v34 }
  0xf5   : > { %v963_v39 = vpop.f32.mrf.mxu0  ;;  %v1011_v40 = vpop.f32.mrf.mxu1 }
  0xf6   : > { %714 = vst.msk [vmem:[%s1263_s29 + $0x18] sm:$0xff] %vm710_vm0, %v649_v35  ;;  %746 = vst.msk [vmem:[%s1263_s29 + $0x118] sm:$0xff] %vm710_vm0, %v681_v36  ;;  %v648_v41 = vmax.f32 %v338_v37, 0.0  ;;  %v680_v42 = vmax.f32 %v498_v38, 0.0  ;;  %v353_v43 = vadd.f32 %v963_v39, %v1254_v16  ;;  %v513_v44 = vadd.f32 %v1011_v40, %v1254_v16 }
  0xf7   : > { %v347_v45 = vpop.f32.mrf.mxu0  ;;  %v507_v46 = vpop.f32.mrf.mxu1 }
  0xf8   : > { %713 = vst.msk [vmem:[%s1263_s29 + $0x10] sm:$0xff] %vm710_vm0, %v648_v41  ;;  %745 = vst.msk [vmem:[%s1263_s29 + $0x110] sm:$0xff] %vm710_vm0, %v680_v42  ;;  %v651_v47 = vmax.f32 %v353_v43, 0.0  ;;  %v683_v48 = vmax.f32 %v513_v44, 0.0  ;;  %v348_v49 = vadd.f32 %v1254_v16, %v347_v45  ;;  %v508_v50 = vadd.f32 %v1254_v16, %v507_v46 }
  0xf9   : > { %v966_v51 = vpop.f32.mrf.mxu0  ;;  %v1014_v52 = vpop.f32.mrf.mxu1 }
  0xfa   : > { %716 = vst.msk [vmem:[%s1263_s29 + $0x28] sm:$0xff] %vm710_vm0, %v651_v47  ;;  %748 = vst.msk [vmem:[%s1263_s29 + $0x128] sm:$0xff] %vm710_vm0, %v683_v48  ;;  %v650_v53 = vmax.f32 %v348_v49, 0.0  ;;  %v682_v54 = vmax.f32 %v508_v50, 0.0  ;;  %v363_v55 = vadd.f32 %v966_v51, %v1254_v16  ;;  %v523_v56 = vadd.f32 %v1014_v52, %v1254_v16 }
  0xfb   : > { %v357_v57 = vpop.f32.mrf.mxu0  ;;  %v517_v58 = vpop.f32.mrf.mxu1 }
  0xfc   : > { %715 = vst.msk [vmem:[%s1263_s29 + $0x20] sm:$0xff] %vm710_vm0, %v650_v53  ;;  %747 = vst.msk [vmem:[%s1263_s29 + $0x120] sm:$0xff] %vm710_vm0, %v682_v54  ;;  %v653_v59 = vmax.f32 %v363_v55, 0.0  ;;  %v685_v60 = vmax.f32 %v523_v56, 0.0  ;;  %v358_v61 = vadd.f32 %v1254_v16, %v357_v57  ;;  %v518_v62 = vadd.f32 %v1254_v16, %v517_v58 }
  0xfd   : > { %v969_v63 = vpop.f32.mrf.mxu0  ;;  %v1017_v0 = vpop.f32.mrf.mxu1 }
  0xfe   : > { %718 = vst.msk [vmem:[%s1263_s29 + $0x38] sm:$0xff] %vm710_vm0, %v653_v59  ;;  %750 = vst.msk [vmem:[%s1263_s29 + $0x138] sm:$0xff] %vm710_vm0, %v685_v60  ;;  %v652_v1 = vmax.f32 %v358_v61, 0.0  ;;  %v684_v2 = vmax.f32 %v518_v62, 0.0  ;;  %v373_v3 = vadd.f32 %v969_v63, %v1254_v16  ;;  %v533_v4 = vadd.f32 %v1017_v0, %v1254_v16 }
  0xff   : > { %v367_v5 = vpop.f32.mrf.mxu0  ;;  %v527_v6 = vpop.f32.mrf.mxu1 }
 0x100   : > { %717 = vst.msk [vmem:[%s1263_s29 + $0x30] sm:$0xff] %vm710_vm0, %v652_v1  ;;  %749 = vst.msk [vmem:[%s1263_s29 + $0x130] sm:$0xff] %vm710_vm0, %v684_v2  ;;  %v655_v7 = vmax.f32 %v373_v3, 0.0  ;;  %v687_v8 = vmax.f32 %v533_v4, 0.0  ;;  %v368_v9 = vadd.f32 %v1254_v16, %v367_v5  ;;  %v528_v10 = vadd.f32 %v1254_v16, %v527_v6 }
 0x101   : > { %v972_v11 = vpop.f32.mrf.mxu0  ;;  %v1020_v12 = vpop.f32.mrf.mxu1 }
 0x102   : > { %720 = vst.msk [vmem:[%s1263_s29 + $0x48] sm:$0xff] %vm710_vm0, %v655_v7  ;;  %752 = vst.msk [vmem:[%s1263_s29 + $0x148] sm:$0xff] %vm710_vm0, %v687_v8  ;;  %v654_v13 = vmax.f32 %v368_v9, 0.0  ;;  %v686_v14 = vmax.f32 %v528_v10, 0.0  ;;  %v383_v15 = vadd.f32 %v972_v11, %v1254_v16  ;;  %v543_v17 = vadd.f32 %v1020_v12, %v1254_v16 }
 0x103   : > { %v377_v18 = vpop.f32.mrf.mxu0  ;;  %v537_v19 = vpop.f32.mrf.mxu1 }
 0x104   : > { %719 = vst.msk [vmem:[%s1263_s29 + $0x40] sm:$0xff] %vm710_vm0, %v654_v13  ;;  %751 = vst.msk [vmem:[%s1263_s29 + $0x140] sm:$0xff] %vm710_vm0, %v686_v14  ;;  %v657_v20 = vmax.f32 %v383_v15, 0.0  ;;  %v689_v21 = vmax.f32 %v543_v17, 0.0  ;;  %v378_v22 = vadd.f32 %v1254_v16, %v377_v18  ;;  %v538_v23 = vadd.f32 %v1254_v16, %v537_v19 }
 0x105   : > { %v975_v24 = vpop.f32.mrf.mxu0  ;;  %v1023_v25 = vpop.f32.mrf.mxu1 }
 0x106   : > { %722 = vst.msk [vmem:[%s1263_s29 + $0x58] sm:$0xff] %vm710_vm0, %v657_v20  ;;  %754 = vst.msk [vmem:[%s1263_s29 + $0x158] sm:$0xff] %vm710_vm0, %v689_v21  ;;  %v656_v26 = vmax.f32 %v378_v22, 0.0  ;;  %v688_v27 = vmax.f32 %v538_v23, 0.0  ;;  %v393_v28 = vadd.f32 %v975_v24, %v1254_v16  ;;  %v553_v29 = vadd.f32 %v1023_v25, %v1254_v16 }
 0x107   : > { %v387_v30 = vpop.f32.mrf.mxu0  ;;  %v547_v31 = vpop.f32.mrf.mxu1 }
 0x108   : > { %721 = vst.msk [vmem:[%s1263_s29 + $0x50] sm:$0xff] %vm710_vm0, %v656_v26  ;;  %753 = vst.msk [vmem:[%s1263_s29 + $0x150] sm:$0xff] %vm710_vm0, %v688_v27  ;;  %v659_v32 = vmax.f32 %v393_v28, 0.0  ;;  %v691_v33 = vmax.f32 %v553_v29, 0.0  ;;  %v388_v34 = vadd.f32 %v1254_v16, %v387_v30  ;;  %v548_v35 = vadd.f32 %v1254_v16, %v547_v31 }
 0x109   : > { %v978_v36 = vpop.f32.mrf.mxu0  ;;  %v1026_v37 = vpop.f32.mrf.mxu1 }
 0x10a   : > { %724 = vst.msk [vmem:[%s1263_s29 + $0x68] sm:$0xff] %vm710_vm0, %v659_v32  ;;  %756 = vst.msk [vmem:[%s1263_s29 + $0x168] sm:$0xff] %vm710_vm0, %v691_v33  ;;  %v658_v38 = vmax.f32 %v388_v34, 0.0  ;;  %v690_v39 = vmax.f32 %v548_v35, 0.0  ;;  %v403_v40 = vadd.f32 %v978_v36, %v1254_v16  ;;  %v563_v41 = vadd.f32 %v1026_v37, %v1254_v16 }
 0x10b   : > { %v397_v42 = vpop.f32.mrf.mxu0  ;;  %v557_v43 = vpop.f32.mrf.mxu1 }
 0x10c   : > { %723 = vst.msk [vmem:[%s1263_s29 + $0x60] sm:$0xff] %vm710_vm0, %v658_v38  ;;  %755 = vst.msk [vmem:[%s1263_s29 + $0x160] sm:$0xff] %vm710_vm0, %v690_v39  ;;  %v661_v44 = vmax.f32 %v403_v40, 0.0  ;;  %v693_v45 = vmax.f32 %v563_v41, 0.0  ;;  %v398_v46 = vadd.f32 %v1254_v16, %v397_v42  ;;  %v558_v47 = vadd.f32 %v1254_v16, %v557_v43 }
 0x10d   : > { %v981_v48 = vpop.f32.mrf.mxu0  ;;  %v1029_v49 = vpop.f32.mrf.mxu1 }
 0x10e   : > { %726 = vst.msk [vmem:[%s1263_s29 + $0x78] sm:$0xff] %vm710_vm0, %v661_v44  ;;  %758 = vst.msk [vmem:[%s1263_s29 + $0x178] sm:$0xff] %vm710_vm0, %v693_v45  ;;  %v660_v50 = vmax.f32 %v398_v46, 0.0  ;;  %v692_v51 = vmax.f32 %v558_v47, 0.0  ;;  %v413_v52 = vadd.f32 %v981_v48, %v1254_v16  ;;  %v573_v53 = vadd.f32 %v1029_v49, %v1254_v16 }
 0x10f   : > { %v407_v54 = vpop.f32.mrf.mxu0  ;;  %v567_v55 = vpop.f32.mrf.mxu1 }
 0x110   : > { %725 = vst.msk [vmem:[%s1263_s29 + $0x70] sm:$0xff] %vm710_vm0, %v660_v50  ;;  %757 = vst.msk [vmem:[%s1263_s29 + $0x170] sm:$0xff] %vm710_vm0, %v692_v51  ;;  %v663_v56 = vmax.f32 %v413_v52, 0.0  ;;  %v695_v57 = vmax.f32 %v573_v53, 0.0  ;;  %v408_v58 = vadd.f32 %v1254_v16, %v407_v54  ;;  %v568_v59 = vadd.f32 %v1254_v16, %v567_v55 }
 0x111   : > { %v984_v60 = vpop.f32.mrf.mxu0  ;;  %v1032_v61 = vpop.f32.mrf.mxu1 }
 0x112   : > { %728 = vst.msk [vmem:[%s1263_s29 + $0x88] sm:$0xff] %vm710_vm0, %v663_v56  ;;  %760 = vst.msk [vmem:[%s1263_s29 + $0x188] sm:$0xff] %vm710_vm0, %v695_v57  ;;  %v662_v62 = vmax.f32 %v408_v58, 0.0  ;;  %v694_v63 = vmax.f32 %v568_v59, 0.0  ;;  %v423_v0 = vadd.f32 %v984_v60, %v1254_v16  ;;  %v583_v1 = vadd.f32 %v1032_v61, %v1254_v16 }
 0x113   : > { %v417_v2 = vpop.f32.mrf.mxu0  ;;  %v577_v3 = vpop.f32.mrf.mxu1 }
 0x114   : > { %727 = vst.msk [vmem:[%s1263_s29 + $0x80] sm:$0xff] %vm710_vm0, %v662_v62  ;;  %759 = vst.msk [vmem:[%s1263_s29 + $0x180] sm:$0xff] %vm710_vm0, %v694_v63  ;;  %v665_v4 = vmax.f32 %v423_v0, 0.0  ;;  %v697_v5 = vmax.f32 %v583_v1, 0.0  ;;  %v418_v6 = vadd.f32 %v1254_v16, %v417_v2  ;;  %v578_v7 = vadd.f32 %v1254_v16, %v577_v3 }
 0x115   : > { %v987_v8 = vpop.f32.mrf.mxu0  ;;  %v1035_v9 = vpop.f32.mrf.mxu1 }
 0x116   : > { %730 = vst.msk [vmem:[%s1263_s29 + $0x98] sm:$0xff] %vm710_vm0, %v665_v4  ;;  %762 = vst.msk [vmem:[%s1263_s29 + $0x198] sm:$0xff] %vm710_vm0, %v697_v5  ;;  %v664_v10 = vmax.f32 %v418_v6, 0.0  ;;  %v696_v11 = vmax.f32 %v578_v7, 0.0  ;;  %v433_v12 = vadd.f32 %v987_v8, %v1254_v16  ;;  %v593_v13 = vadd.f32 %v1035_v9, %v1254_v16 }
 0x117   : > { %v427_v14 = vpop.f32.mrf.mxu0  ;;  %v587_v15 = vpop.f32.mrf.mxu1 }
 0x118   : > { %729 = vst.msk [vmem:[%s1263_s29 + $0x90] sm:$0xff] %vm710_vm0, %v664_v10  ;;  %761 = vst.msk [vmem:[%s1263_s29 + $0x190] sm:$0xff] %vm710_vm0, %v696_v11  ;;  %v667_v17 = vmax.f32 %v433_v12, 0.0  ;;  %v699_v18 = vmax.f32 %v593_v13, 0.0  ;;  %v428_v19 = vadd.f32 %v1254_v16, %v427_v14  ;;  %v588_v20 = vadd.f32 %v1254_v16, %v587_v15 }
 0x119   : > { %v990_v21 = vpop.f32.mrf.mxu0  ;;  %v1038_v22 = vpop.f32.mrf.mxu1 }
 0x11a   : > { %732 = vst.msk [vmem:[%s1263_s29 + $0xa8] sm:$0xff] %vm710_vm0, %v667_v17  ;;  %764 = vst.msk [vmem:[%s1263_s29 + $0x1a8] sm:$0xff] %vm710_vm0, %v699_v18  ;;  %v666_v23 = vmax.f32 %v428_v19, 0.0  ;;  %v698_v24 = vmax.f32 %v588_v20, 0.0  ;;  %v443_v25 = vadd.f32 %v990_v21, %v1254_v16  ;;  %v603_v26 = vadd.f32 %v1038_v22, %v1254_v16 }
 0x11b   : > { %v437_v27 = vpop.f32.mrf.mxu0  ;;  %v597_v28 = vpop.f32.mrf.mxu1 }
 0x11c   : > { %731 = vst.msk [vmem:[%s1263_s29 + $0xa0] sm:$0xff] %vm710_vm0, %v666_v23  ;;  %763 = vst.msk [vmem:[%s1263_s29 + $0x1a0] sm:$0xff] %vm710_vm0, %v698_v24  ;;  %v669_v29 = vmax.f32 %v443_v25, 0.0  ;;  %v701_v30 = vmax.f32 %v603_v26, 0.0  ;;  %v438_v31 = vadd.f32 %v1254_v16, %v437_v27  ;;  %v598_v32 = vadd.f32 %v1254_v16, %v597_v28 }
 0x11d   : > { %v993_v33 = vpop.f32.mrf.mxu0  ;;  %v1041_v34 = vpop.f32.mrf.mxu1 }
 0x11e   : > { %734 = vst.msk [vmem:[%s1263_s29 + $0xb8] sm:$0xff] %vm710_vm0, %v669_v29  ;;  %766 = vst.msk [vmem:[%s1263_s29 + $0x1b8] sm:$0xff] %vm710_vm0, %v701_v30  ;;  %v668_v35 = vmax.f32 %v438_v31, 0.0  ;;  %v700_v36 = vmax.f32 %v598_v32, 0.0  ;;  %v453_v37 = vadd.f32 %v993_v33, %v1254_v16  ;;  %v613_v38 = vadd.f32 %v1041_v34, %v1254_v16 }
 0x11f   : > { %v447_v39 = vpop.f32.mrf.mxu0  ;;  %v607_v40 = vpop.f32.mrf.mxu1 }
 0x120   : > { %733 = vst.msk [vmem:[%s1263_s29 + $0xb0] sm:$0xff] %vm710_vm0, %v668_v35  ;;  %765 = vst.msk [vmem:[%s1263_s29 + $0x1b0] sm:$0xff] %vm710_vm0, %v700_v36  ;;  %v671_v41 = vmax.f32 %v453_v37, 0.0  ;;  %v703_v42 = vmax.f32 %v613_v38, 0.0  ;;  %v448_v43 = vadd.f32 %v1254_v16, %v447_v39  ;;  %v608_v44 = vadd.f32 %v1254_v16, %v607_v40 }
 0x121   : > { %v996_v45 = vpop.f32.mrf.mxu0  ;;  %v1044_v46 = vpop.f32.mrf.mxu1 }
 0x122   : > { %736 = vst.msk [vmem:[%s1263_s29 + $0xc8] sm:$0xff] %vm710_vm0, %v671_v41  ;;  %768 = vst.msk [vmem:[%s1263_s29 + $0x1c8] sm:$0xff] %vm710_vm0, %v703_v42  ;;  %v670_v47 = vmax.f32 %v448_v43, 0.0  ;;  %v702_v48 = vmax.f32 %v608_v44, 0.0  ;;  %v463_v49 = vadd.f32 %v996_v45, %v1254_v16  ;;  %v623_v50 = vadd.f32 %v1044_v46, %v1254_v16 }
 0x123   : > { %v457_v51 = vpop.f32.mrf.mxu0  ;;  %v617_v52 = vpop.f32.mrf.mxu1 }
 0x124   : > { %735 = vst.msk [vmem:[%s1263_s29 + $0xc0] sm:$0xff] %vm710_vm0, %v670_v47  ;;  %767 = vst.msk [vmem:[%s1263_s29 + $0x1c0] sm:$0xff] %vm710_vm0, %v702_v48  ;;  %v673_v53 = vmax.f32 %v463_v49, 0.0  ;;  %v705_v54 = vmax.f32 %v623_v50, 0.0  ;;  %v458_v55 = vadd.f32 %v1254_v16, %v457_v51  ;;  %v618_v56 = vadd.f32 %v1254_v16, %v617_v52 }
 0x125   : > { %v999_v57 = vpop.f32.mrf.mxu0  ;;  %v1047_v58 = vpop.f32.mrf.mxu1 }
 0x126   : > { %738 = vst.msk [vmem:[%s1263_s29 + $0xd8] sm:$0xff] %vm710_vm0, %v673_v53  ;;  %770 = vst.msk [vmem:[%s1263_s29 + $0x1d8] sm:$0xff] %vm710_vm0, %v705_v54  ;;  %v672_v59 = vmax.f32 %v458_v55, 0.0  ;;  %v704_v60 = vmax.f32 %v618_v56, 0.0  ;;  %v473_v61 = vadd.f32 %v999_v57, %v1254_v16  ;;  %v633_v62 = vadd.f32 %v1047_v58, %v1254_v16 }
 0x127   : > { %v467_v63 = vpop.f32.mrf.mxu0  ;;  %v627_v0 = vpop.f32.mrf.mxu1 }
 0x128   : > { %737 = vst.msk [vmem:[%s1263_s29 + $0xd0] sm:$0xff] %vm710_vm0, %v672_v59  ;;  %769 = vst.msk [vmem:[%s1263_s29 + $0x1d0] sm:$0xff] %vm710_vm0, %v704_v60  ;;  %v675_v1 = vmax.f32 %v473_v61, 0.0  ;;  %v707_v2 = vmax.f32 %v633_v62, 0.0  ;;  %v468_v3 = vadd.f32 %v1254_v16, %v467_v63  ;;  %v628_v4 = vadd.f32 %v1254_v16, %v627_v0 }
 0x129   : > { %v1002_v5 = vpop.f32.mrf.mxu0  ;;  %v1050_v6 = vpop.f32.mrf.mxu1 }
 0x12a   : > { %740 = vst.msk [vmem:[%s1263_s29 + $0xe8] sm:$0xff] %vm710_vm0, %v675_v1  ;;  %772 = vst.msk [vmem:[%s1263_s29 + $0x1e8] sm:$0xff] %vm710_vm0, %v707_v2  ;;  %v674_v7 = vmax.f32 %v468_v3, 0.0  ;;  %v706_v8 = vmax.f32 %v628_v4, 0.0  ;;  %v483_v9 = vadd.f32 %v1002_v5, %v1254_v16  ;;  %v643_v10 = vadd.f32 %v1050_v6, %v1254_v16 }
 0x12b   : > { %v477_v11 = vpop.f32.mrf.mxu0  ;;  %v637_v12 = vpop.f32.mrf.mxu1 }
 0x12c   : > { %739 = vst.msk [vmem:[%s1263_s29 + $0xe0] sm:$0xff] %vm710_vm0, %v674_v7  ;;  %771 = vst.msk [vmem:[%s1263_s29 + $0x1e0] sm:$0xff] %vm710_vm0, %v706_v8  ;;  %v677_v13 = vmax.f32 %v483_v9, 0.0  ;;  %v709_v14 = vmax.f32 %v643_v10, 0.0  ;;  %v478_v15 = vadd.f32 %v1254_v16, %v477_v11  ;;  %v638_v17 = vadd.f32 %v1254_v16, %v637_v12 }
 0x12e   : > { %742 = vst.msk [vmem:[%s1263_s29 + $0xf8] sm:$0xff] %vm710_vm0, %v677_v13  ;;  %774 = vst.msk [vmem:[%s1263_s29 + $0x1f8] sm:$0xff] %vm710_vm0, %v709_v14  ;;  %v676_v18 = vmax.f32 %v478_v15, 0.0  ;;  %v708_v19 = vmax.f32 %v638_v17, 0.0 }
 0x130   : > { %741 = vst.msk [vmem:[%s1263_s29 + $0xf0] sm:$0xff] %vm710_vm0, %v676_v18  ;;  %773 = vst.msk [vmem:[%s1263_s29 + $0x1f0] sm:$0xff] %vm710_vm0, %v708_v19 }
 0x131 PF: > { %s13_s12 = sadd.s32 1, %s1097_s12  }
 0x132   : > { %p10_p4 = scmp.ge.s32.totalorder %s13_s12, 12  }
 0x134   :  { %12 = sbr.rel (!%p10_p4) target bundleno = 1 (0x1), region = 62 }

// kernel: reference_encoder_forward.9
= control target key start
LH: loop header
LB: loop body
LE: loop exit
PB: predicated region body
PF: predicated region fallthrough
CT: control target
= control target key end

     0   :  { %s1702_s12 = smov 0   ;;  %s2449_s0 = inlined_call_operand.vmem [shape: f32[1536,384], index: 0, kind: input, shape index: {}]   ;;  %s2450_s1 = inlined_call_operand.vmem [shape: f32[384,32], index: 1, kind: input, shape index: {}]   ;;  %s2451_s2 = inlined_call_operand.vmem [shape: f32[1,32], index: 2, kind: input, shape index: {}]   ;;  %s2452_s3 = inlined_call_operand.vmem [shape: f32[1536,32], index: 3, kind: output, shape index: {}]  }
   0x1 LB: > { %s1379_s13 = sadd.s32 4294967295, %s1679_s12   ;;  %p1383_p0 = scmp.ge.s32.totalorder %s1679_s12, 1  ;;  %s1679_s12 = sphi %s1702_s12, %s13_s12  }
   0x2   : > { %p139_p1 = scmp.lt.s32.totalorder %s1679_s12, 4 }
   0x4   : > { %p140_p2 = pnand %p1383_p0, %p139_p1 }
   0x5   : > { %s1384_s8 = sshll.u32 (!%p140_p2), %s1379_s13, 6 }
   0x6   : > { %143 = sbr.rel (%p140_p2) target bundleno = 465 (0x1d1), region = 32  ;;  %p165_p3 = scmp.lt.s32.totalorder (!%p140_p2), %s1384_s8, 191 }
   0xb   : > { %v384_v0 = vld [vmem:[%s2450_s1 + $0x78] sm:$0xff]  ;;  %v1681_v1 = vmov 0.0   ;;  %v383_v2 = vld [vmem:[%s2450_s1 + $0x70] sm:$0xff]  ;;  %v382_v3 = vld [vmem:[%s2450_s1 + $0x68] sm:$0xff]  ;;  %s2454_s8 = smov (!%p165_p3, %s1384_s8), 191  ;;  %vm1258_vm0 = vcmask 261120  }
   0xc   : > { %424 = vmatprep.subr.mxu0 %v1681_v1  ;;  %1599 = vmatprep.subr.mxu1 %v1681_v1  ;;  %v381_v4 = vld [vmem:[%s2450_s1 + $0x60] sm:$0xff]  ;;  %v380_v5 = vld [vmem:[%s2450_s1 + $0x58] sm:$0xff]  ;;  %v379_v6 = vld [vmem:[%s2450_s1 + $0x50] sm:$0xff]  ;;  %s1663_s22 = smul.u32 24, %s2454_s8  ;;  %s1387_s16 = sshll.u32 %s2454_s8, 3 }
   0xd   : > { %425 = vmatpush1.msra.mxu0 %v384_v0  ;;  %1631 = vmatpush1.msra.mxu1 %v384_v0  ;;  %v378_v7 = vld [vmem:[%s2450_s1 + $0x48] sm:$0xff]  ;;  %v377_v8 = vld [vmem:[%s2450_s1 + $0x40] sm:$0xff]  ;;  %v376_v9 = vld [vmem:[%s2450_s1 + $0x38] sm:$0xff]  ;;  %s2196_s19 = scalar_lea.vmem %s2452_s3, %s1387_s16 }
   0xe   : > { %426 = vmatprep.subr.mxu0 %v1681_v1  ;;  %1600 = vmatprep.subr.mxu1 %v1681_v1  ;;  %v375_v10 = vld [vmem:[%s2450_s1 + $0x30] sm:$0xff]  ;;  %v374_v11 = vld [vmem:[%s2450_s1 + $0x28] sm:$0xff]  ;;  %v373_v12 = vld [vmem:[%s2450_s1 + $0x20] sm:$0xff]  ;;  %s1871_s29 = scalar_lea.vmem %s2449_s0, %s1663_s22 }
   0xf   : > { %427 = vmatpush1.msra.mxu0 %v383_v2  ;;  %1632 = vmatpush1.msra.mxu1 %v383_v2  ;;  %v372_v13 = vld [vmem:[%s2450_s1 + $0x18] sm:$0xff]  ;;  %v371_v14 = vld [vmem:[%s2450_s1 + $0x10] sm:$0xff]  ;;  %v370_v15 = vld [vmem:[%s2450_s1 + $0x8] sm:$0xff] }
  0x10   : > { %428 = vmatprep.subr.mxu0 %v1681_v1  ;;  %1601 = vmatprep.subr.mxu1 %v1681_v1  ;;  %v369_v16 = vld [vmem:[%s2450_s1] sm:$0xff]  ;;  %v400_v17 = vld [vmem:[%s2450_s1 + $0xf8] sm:$0xff]  ;;  %v399_v18 = vld [vmem:[%s2450_s1 + $0xf0] sm:$0xff] }
  0x11   : > { %429 = vmatpush1.msra.mxu0 %v382_v3  ;;  %1633 = vmatpush1.msra.mxu1 %v382_v3  ;;  %v398_v19 = vld [vmem:[%s2450_s1 + $0xe8] sm:$0xff]  ;;  %v397_v20 = vld [vmem:[%s2450_s1 + $0xe0] sm:$0xff]  ;;  %v396_v21 = vld [vmem:[%s2450_s1 + $0xd8] sm:$0xff] }
  0x12   : > { %430 = vmatprep.subr.mxu0 %v1681_v1  ;;  %1602 = vmatprep.subr.mxu1 %v1681_v1  ;;  %v395_v22 = vld [vmem:[%s2450_s1 + $0xd0] sm:$0xff]  ;;  %v394_v23 = vld [vmem:[%s2450_s1 + $0xc8] sm:$0xff]  ;;  %v393_v24 = vld [vmem:[%s2450_s1 + $0xc0] sm:$0xff] }
  0x13   : > { %431 = vmatpush1.msra.mxu0 %v381_v4  ;;  %1634 = vmatpush1.msra.mxu1 %v381_v4  ;;  %v392_v25 = vld [vmem:[%s2450_s1 + $0xb8] sm:$0xff]  ;;  %v391_v26 = vld [vmem:[%s2450_s1 + $0xb0] sm:$0xff]  ;;  %v390_v27 = vld [vmem:[%s2450_s1 + $0xa8] sm:$0xff] }
  0x14   : > { %432 = vmatprep.subr.mxu0 %v1681_v1  ;;  %1603 = vmatprep.subr.mxu1 %v1681_v1  ;;  %v389_v28 = vld [vmem:[%s2450_s1 + $0xa0] sm:$0xff]  ;;  %v388_v29 = vld [vmem:[%s2450_s1 + $0x98] sm:$0xff]  ;;  %v387_v30 = vld [vmem:[%s2450_s1 + $0x90] sm:$0xff] }
  0x15   : > { %433 = vmatpush1.msra.mxu0 %v380_v5  ;;  %1635 = vmatpush1.msra.mxu1 %v380_v5  ;;  %v386_v31 = vld [vmem:[%s2450_s1 + $0x88] sm:$0xff]  ;;  %v385_v32 = vld [vmem:[%s2450_s1 + $0x80] sm:$0xff]  ;;  %v416_v37 = vld [vmem:[%s2450_s1 + $0x178] sm:$0xff] }
  0x16   : > { %434 = vmatprep.subr.mxu0 %v1681_v1  ;;  %1604 = vmatprep.subr.mxu1 %v1681_v1  ;;  %v178_v33 = vld [vmem:[%s1871_s29 + $0x8] sm:$0xff]  ;;  %v177_v35 = vld [vmem:[%s1871_s29] sm:$0xff]  ;;  %v415_v40 = vld [vmem:[%s2450_s1 + $0x170] sm:$0xff] }
  0x17   : > { %435 = vmatpush1.msra.mxu0 %v379_v6  ;;  %1636 = vmatpush1.msra.mxu1 %v379_v6  ;;  %v322_v34 = vld [vmem:[%s1871_s29 + $0x488] sm:$0xff]  ;;  %v321_v36 = vld [vmem:[%s1871_s29 + $0x480] sm:$0xff]  ;;  %v180_v41 = vld [vmem:[%s1871_s29 + $0x18] sm:$0xff] }
  0x18   : > { %436 = vmatprep.subr.mxu0 %v1681_v1  ;;  %1605 = vmatprep.subr.mxu1 %v1681_v1  ;;  %v181_v38 = vld [vmem:[%s1871_s29 + $0x20] sm:$0xff]  ;;  %v324_v42 = vld [vmem:[%s1871_s29 + $0x498] sm:$0xff]  ;;  %v414_v45 = vld [vmem:[%s2450_s1 + $0x168] sm:$0xff] }
  0x19   : > { %437 = vmatpush1.msra.mxu0 %v378_v7  ;;  %1637 = vmatpush1.msra.mxu1 %v378_v7  ;;  %v325_v39 = vld [vmem:[%s1871_s29 + $0x4a0] sm:$0xff]  ;;  %v184_v43 = vld [vmem:[%s1871_s29 + $0x38] sm:$0xff]  ;;  %v183_v46 = vld [vmem:[%s1871_s29 + $0x30] sm:$0xff] }
  0x1a   : > { %438 = vmatprep.subr.mxu0 %v1681_v1  ;;  %1606 = vmatprep.subr.mxu1 %v1681_v1  ;;  %v328_v44 = vld [vmem:[%s1871_s29 + $0x4b8] sm:$0xff]  ;;  %v327_v47 = vld [vmem:[%s1871_s29 + $0x4b0] sm:$0xff]  ;;  %v413_v50 = vld [vmem:[%s2450_s1 + $0x160] sm:$0xff] }
  0x1b   : > { %439 = vmatpush1.msra.mxu0 %v377_v8  ;;  %1638 = vmatpush1.msra.mxu1 %v377_v8  ;;  %v187_v48 = vld [vmem:[%s1871_s29 + $0x50] sm:$0xff]  ;;  %v186_v51 = vld [vmem:[%s1871_s29 + $0x48] sm:$0xff]  ;;  %v412_v55 = vld [vmem:[%s2450_s1 + $0x158] sm:$0xff] }
  0x1c   : > { %440 = vmatprep.subr.mxu0 %v1681_v1  ;;  %1607 = vmatprep.subr.mxu1 %v1681_v1  ;;  %v331_v49 = vld [vmem:[%s1871_s29 + $0x4d0] sm:$0xff]  ;;  %v330_v52 = vld [vmem:[%s1871_s29 + $0x4c8] sm:$0xff]  ;;  %v189_v56 = vld [vmem:[%s1871_s29 + $0x60] sm:$0xff] }
  0x1d   : > { %441 = vmatpush1.msra.mxu0 %v376_v9  ;;  %1639 = vmatpush1.msra.mxu1 %v376_v9  ;;  %v190_v53 = vld [vmem:[%s1871_s29 + $0x68] sm:$0xff]  ;;  %v333_v57 = vld [vmem:[%s1871_s29 + $0x4e0] sm:$0xff]  ;;  %v411_v60 = vld [vmem:[%s2450_s1 + $0x150] sm:$0xff] }
  0x1e   : > { %442 = vmatprep.subr.mxu0 %v1681_v1  ;;  %1608 = vmatprep.subr.mxu1 %v1681_v1  ;;  %v334_v54 = vld [vmem:[%s1871_s29 + $0x4e8] sm:$0xff]  ;;  %v193_v58 = vld [vmem:[%s1871_s29 + $0x80] sm:$0xff]  ;;  %v192_v61 = vld [vmem:[%s1871_s29 + $0x78] sm:$0xff] }
  0x1f   : > { %443 = vmatpush1.msra.mxu0 %v375_v10  ;;  %1640 = vmatpush1.msra.mxu1 %v375_v10  ;;  %v337_v59 = vld [vmem:[%s1871_s29 + $0x500] sm:$0xff]  ;;  %v336_v62 = vld [vmem:[%s1871_s29 + $0x4f8] sm:$0xff]  ;;  %v195_v2 = vld [vmem:[%s1871_s29 + $0x90] sm:$0xff] }
  0x20   : > { %444 = vmatprep.subr.mxu0 %v1681_v1  ;;  %1609 = vmatprep.subr.mxu1 %v1681_v1  ;;  %v196_v63 = vld [vmem:[%s1871_s29 + $0x98] sm:$0xff]  ;;  %v339_v3 = vld [vmem:[%s1871_s29 + $0x510] sm:$0xff]  ;;  %v409_v6 = vld [vmem:[%s2450_s1 + $0x140] sm:$0xff] }
  0x21   : > { %445 = vmatpush1.msra.mxu0 %v374_v11  ;;  %1641 = vmatpush1.msra.mxu1 %v374_v11  ;;  %v340_v0 = vld [vmem:[%s1871_s29 + $0x518] sm:$0xff]  ;;  %v199_v4 = vld [vmem:[%s1871_s29 + $0xb0] sm:$0xff]  ;;  %v198_v7 = vld [vmem:[%s1871_s29 + $0xa8] sm:$0xff] }
  0x22   : > { %446 = vmatprep.subr.mxu0 %v1681_v1  ;;  %1610 = vmatprep.subr.mxu1 %v1681_v1  ;;  %v343_v5 = vld [vmem:[%s1871_s29 + $0x530] sm:$0xff]  ;;  %v342_v8 = vld [vmem:[%s1871_s29 + $0x528] sm:$0xff]  ;;  %v408_v11 = vld [vmem:[%s2450_s1 + $0x138] sm:$0xff] }
  0x23   : > { %447 = vmatpush1.msra.mxu0 %v373_v12  ;;  %1642 = vmatpush1.msra.mxu1 %v373_v12  ;;  %v202_v9 = vld [vmem:[%s1871_s29 + $0xc8] sm:$0xff]  ;;  %v201_v12 = vld [vmem:[%s1871_s29 + $0xc0] sm:$0xff] }
  0x24   : > { %448 = vmatprep.subr.mxu0 %v1681_v1  ;;  %1611 = vmatprep.subr.mxu1 %v1681_v1  ;;  %v346_v10 = vld [vmem:[%s1871_s29 + $0x548] sm:$0xff] }
  0x25   : > { %449 = vmatpush1.msra.mxu0 %v372_v13  ;;  %1643 = vmatpush1.msra.mxu1 %v372_v13  ;;  %v345_v13 = vld [vmem:[%s1871_s29 + $0x540] sm:$0xff] }
  0x26   : > { %450 = vmatprep.subr.mxu0 %v1681_v1  ;;  %1612 = vmatprep.subr.mxu1 %v1681_v1 }
  0x27   : > { %451 = vmatpush1.msra.mxu0 %v371_v14  ;;  %1644 = vmatpush1.msra.mxu1 %v371_v14  ;;  %v205_v14 = vld [vmem:[%s1871_s29 + $0xe0] sm:$0xff] }
  0x28   : > { %452 = vmatprep.subr.mxu0 %v1681_v1  ;;  %1613 = vmatprep.subr.mxu1 %v1681_v1 }
  0x29   : > { %453 = vmatpush1.msra.mxu0 %v370_v15  ;;  %1645 = vmatpush1.msra.mxu1 %v370_v15  ;;  %v349_v15 = vld [vmem:[%s1871_s29 + $0x560] sm:$0xff] }
  0x2a   : > { %454 = vmatprep.subr.mxu0 %v1681_v1  ;;  %1614 = vmatprep.subr.mxu1 %v1681_v1 }
  0x2b   : > { %455 = vmatpush1.msra.mxu0 %v369_v16  ;;  %1646 = vmatpush1.msra.mxu1 %v369_v16  ;;  %v407_v16 = vld [vmem:[%s2450_s1 + $0x130] sm:$0xff] }
  0x2c   : > { %456 = vmatprep.subr.mxu0 %v1681_v1  ;;  %1615 = vmatprep.subr.mxu1 %v1681_v1 }
  0x2d   : > { %457 = vmatpush2.msra.mxu0 %v400_v17  ;;  %1647 = vmatpush2.msra.mxu1 %v400_v17  ;;  %v204_v17 = vld [vmem:[%s1871_s29 + $0xd8] sm:$0xff] }
  0x2e   : > { %458 = vmatprep.subr.mxu0 %v1681_v1  ;;  %1616 = vmatprep.subr.mxu1 %v1681_v1 }
  0x2f   : > { %459 = vmatpush2.msra.mxu0 %v399_v18  ;;  %1648 = vmatpush2.msra.mxu1 %v399_v18  ;;  %v348_v18 = vld [vmem:[%s1871_s29 + $0x558] sm:$0xff] }
  0x30   : > { %460 = vmatprep.subr.mxu0 %v1681_v1  ;;  %1617 = vmatprep.subr.mxu1 %v1681_v1 }
  0x31   : > { %461 = vmatpush2.msra.mxu0 %v398_v19  ;;  %1649 = vmatpush2.msra.mxu1 %v398_v19  ;;  %v208_v19 = vld [vmem:[%s1871_s29 + $0xf8] sm:$0xff] }
  0x32   : > { %462 = vmatprep.subr.mxu0 %v1681_v1  ;;  %1618 = vmatprep.subr.mxu1 %v1681_v1 }
  0x33   : > { %463 = vmatpush2.msra.mxu0 %v397_v20  ;;  %1650 = vmatpush2.msra.mxu1 %v397_v20  ;;  %v352_v20 = vld [vmem:[%s1871_s29 + $0x578] sm:$0xff] }
  0x34   : > { %464 = vmatprep.subr.mxu0 %v1681_v1  ;;  %1619 = vmatprep.subr.mxu1 %v1681_v1 }
  0x35   : > { %465 = vmatpush2.msra.mxu0 %v396_v21  ;;  %1651 = vmatpush2.msra.mxu1 %v396_v21  ;;  %v406_v21 = vld [vmem:[%s2450_s1 + $0x128] sm:$0xff] }
  0x36   : > { %466 = vmatprep.subr.mxu0 %v1681_v1  ;;  %1620 = vmatprep.subr.mxu1 %v1681_v1 }
  0x37   : > { %467 = vmatpush2.msra.mxu0 %v395_v22  ;;  %1652 = vmatpush2.msra.mxu1 %v395_v22  ;;  %v207_v22 = vld [vmem:[%s1871_s29 + $0xf0] sm:$0xff] }
  0x38   : > { %468 = vmatprep.subr.mxu0 %v1681_v1  ;;  %1621 = vmatprep.subr.mxu1 %v1681_v1 }
  0x39   : > { %469 = vmatpush2.msra.mxu0 %v394_v23  ;;  %1653 = vmatpush2.msra.mxu1 %v394_v23  ;;  %v351_v23 = vld [vmem:[%s1871_s29 + $0x570] sm:$0xff] }
  0x3a   : > { %470 = vmatprep.subr.mxu0 %v1681_v1  ;;  %1622 = vmatprep.subr.mxu1 %v1681_v1 }
  0x3b   : > { %471 = vmatpush2.msra.mxu0 %v393_v24  ;;  %1654 = vmatpush2.msra.mxu1 %v393_v24  ;;  %v211_v24 = vld [vmem:[%s1871_s29 + $0x110] sm:$0xff] }
  0x3c   : > { %472 = vmatprep.subr.mxu0 %v1681_v1  ;;  %1623 = vmatprep.subr.mxu1 %v1681_v1 }
  0x3d   : > { %473 = vmatpush2.msra.mxu0 %v392_v25  ;;  %1655 = vmatpush2.msra.mxu1 %v392_v25  ;;  %v355_v25 = vld [vmem:[%s1871_s29 + $0x590] sm:$0xff] }
  0x3e   : > { %474 = vmatprep.subr.mxu0 %v1681_v1  ;;  %1624 = vmatprep.subr.mxu1 %v1681_v1 }
  0x3f   : > { %475 = vmatpush2.msra.mxu0 %v391_v26  ;;  %1656 = vmatpush2.msra.mxu1 %v391_v26  ;;  %v405_v26 = vld [vmem:[%s2450_s1 + $0x120] sm:$0xff] }
  0x40   : > { %476 = vmatprep.subr.mxu0 %v1681_v1  ;;  %1625 = vmatprep.subr.mxu1 %v1681_v1 }
  0x41   : > { %477 = vmatpush2.msra.mxu0 %v390_v27  ;;  %1657 = vmatpush2.msra.mxu1 %v390_v27  ;;  %v210_v27 = vld [vmem:[%s1871_s29 + $0x108] sm:$0xff] }
  0x42   : > { %478 = vmatprep.subr.mxu0 %v1681_v1  ;;  %1626 = vmatprep.subr.mxu1 %v1681_v1 }
  0x43   : > { %479 = vmatpush2.msra.mxu0 %v389_v28  ;;  %1658 = vmatpush2.msra.mxu1 %v389_v28  ;;  %v354_v28 = vld [vmem:[%s1871_s29 + $0x588] sm:$0xff] }
  0x44   : > { %480 = vmatprep.subr.mxu0 %v1681_v1  ;;  %1627 = vmatprep.subr.mxu1 %v1681_v1 }
  0x45   : > { %481 = vmatpush2.msra.mxu0 %v388_v29  ;;  %1659 = vmatpush2.msra.mxu1 %v388_v29  ;;  %v214_v29 = vld [vmem:[%s1871_s29 + $0x128] sm:$0xff] }
  0x46   : > { %482 = vmatprep.subr.mxu0 %v1681_v1  ;;  %1628 = vmatprep.subr.mxu1 %v1681_v1 }
  0x47   : > { %483 = vmatpush2.msra.mxu0 %v387_v30  ;;  %1660 = vmatpush2.msra.mxu1 %v387_v30  ;;  %v358_v30 = vld [vmem:[%s1871_s29 + $0x5a8] sm:$0xff] }
  0x48   : > { %484 = vmatprep.subr.mxu0 %v1681_v1  ;;  %1629 = vmatprep.subr.mxu1 %v1681_v1 }
  0x49   : > { %485 = vmatpush2.msra.mxu0 %v386_v31  ;;  %1661 = vmatpush2.msra.mxu1 %v386_v31  ;;  %v404_v31 = vld [vmem:[%s2450_s1 + $0x118] sm:$0xff] }
  0x4a   : > { %486 = vmatprep.subr.mxu0 %v1681_v1  ;;  %1630 = vmatprep.subr.mxu1 %v1681_v1  ;;  %v410_v1 = vld [vmem:[%s2450_s1 + $0x148] sm:$0xff] }
  0x4b   : > { %487 = vmatpush2.msra.mxu0 %v385_v32  ;;  %1662 = vmatpush2.msra.mxu1 %v385_v32  ;;  %v213_v32 = vld [vmem:[%s1871_s29 + $0x120] sm:$0xff] }
  0x4c   : > { %488 = vmatprep.mubr.f32.mxu0 %v178_v33  ;;  %728 = vmatprep.mubr.f32.mxu1 %v322_v34  ;;  %v357_v33 = vld [vmem:[%s1871_s29 + $0x5a0] sm:$0xff] }
  0x4d   : > { %489 = vmatmul.mubr.f32.vlgmr.msra.gmra.mxu0 %v177_v35  ;;  %729 = vmatmul.mubr.f32.vlgmr.msra.gmra.mxu1 %v321_v36  ;;  %v217_v34 = vld [vmem:[%s1871_s29 + $0x140] sm:$0xff]  ;;  %v403_v36 = vld [vmem:[%s2450_s1 + $0x110] sm:$0xff] }
  0x4e   : > { %1471 = vmatprep.subr.mxu1 %v416_v37  ;;  %493 = vmatprep.mubr.f32.mxu0 %v181_v38  ;;  %v361_v35 = vld [vmem:[%s1871_s29 + $0x5c0] sm:$0xff]  ;;  %v360_v38 = vld [vmem:[%s1871_s29 + $0x5b8] sm:$0xff] }
  0x4f   : > { %1472 = vmatpush3.msra.mxu1 %v416_v37  ;;  %733 = vmatprep.mubr.f32.mxu1 %v325_v39  ;;  %v216_v37 = vld [vmem:[%s1871_s29 + $0x138] sm:$0xff] }
  0x50   : > { %1473 = vmatprep.subr.mxu1 %v415_v40  ;;  %v220_v39 = vld [vmem:[%s1871_s29 + $0x158] sm:$0xff] }
  0x51   : > { %494 = vmatmul.mubr.f32.gmra.mxu0 %v180_v41  ;;  %734 = vmatmul.mubr.f32.gmra.mxu1 %v324_v42  ;;  %v402_v41 = vld [vmem:[%s2450_s1 + $0x108] sm:$0xff]  ;;  %v219_v42 = vld [vmem:[%s1871_s29 + $0x150] sm:$0xff] }
  0x52   : > { %1474 = vmatpush3.msra.mxu1 %v415_v40  ;;  %498 = vmatprep.mubr.f32.mxu0 %v184_v43  ;;  %v364_v40 = vld [vmem:[%s1871_s29 + $0x5d8] sm:$0xff]  ;;  %v363_v43 = vld [vmem:[%s1871_s29 + $0x5d0] sm:$0xff] }
  0x53   : > { %738 = vmatprep.mubr.f32.mxu1 %v328_v44  ;;  %1475 = vmatprep.subr.mxu1 %v414_v45  ;;  %v223_v44 = vld [vmem:[%s1871_s29 + $0x170] sm:$0xff] }
  0x54   : > { %1476 = vmatpush3.msra.mxu1 %v414_v45  ;;  %v367_v45 = vld [vmem:[%s1871_s29 + $0x5f0] sm:$0xff] }
  0x55   : > { %499 = vmatmul.mubr.f32.gmra.mxu0 %v183_v46  ;;  %739 = vmatmul.mubr.f32.gmra.mxu1 %v327_v47  ;;  %v401_v46 = vld [vmem:[%s2450_s1 + $0x100] sm:$0xff]  ;;  %v222_v47 = vld [vmem:[%s1871_s29 + $0x168] sm:$0xff] }
  0x56   : > { %503 = vmatprep.mubr.f32.mxu0 %v187_v48  ;;  %743 = vmatprep.mubr.f32.mxu1 %v331_v49  ;;  %v366_v48 = vld [vmem:[%s1871_s29 + $0x5e8] sm:$0xff] }
  0x57   : > { %1477 = vmatprep.subr.mxu1 %v413_v50  ;;  %v226_v49 = vld [vmem:[%s1871_s29 + $0x188] sm:$0xff] }
  0x58   : > { %1478 = vmatpush3.msra.mxu1 %v413_v50  ;;  %v179_v50 = vld [vmem:[%s1871_s29 + $0x10] sm:$0xff] }
  0x59   : > { %504 = vmatmul.mubr.f32.gmra.mxu0 %v186_v51  ;;  %744 = vmatmul.mubr.f32.gmra.mxu1 %v330_v52  ;;  %v225_v51 = vld [vmem:[%s1871_s29 + $0x180] sm:$0xff]  ;;  %v182_v52 = vld [vmem:[%s1871_s29 + $0x28] sm:$0xff] }
  0x5a   : > { %508 = vmatprep.mubr.f32.mxu0 %v190_v53  ;;  %748 = vmatprep.mubr.f32.mxu1 %v334_v54  ;;  %v229_v53 = vld [vmem:[%s1871_s29 + $0x1a0] sm:$0xff] }
  0x5b   : > { %1479 = vmatprep.subr.mxu1 %v412_v55  ;;  %v185_v54 = vld [vmem:[%s1871_s29 + $0x40] sm:$0xff] }
  0x5c   : > { %1480 = vmatpush3.msra.mxu1 %v412_v55  ;;  %v228_v55 = vld [vmem:[%s1871_s29 + $0x198] sm:$0xff] }
  0x5d   : > { %509 = vmatmul.mubr.f32.gmra.mxu0 %v189_v56  ;;  %749 = vmatmul.mubr.f32.gmra.mxu1 %v333_v57  ;;  %v188_v56 = vld [vmem:[%s1871_s29 + $0x58] sm:$0xff] }
  0x5e   : > { %513 = vmatprep.mubr.f32.mxu0 %v193_v58  ;;  %753 = vmatprep.mubr.f32.mxu1 %v337_v59  ;;  %v232_v57 = vld [vmem:[%s1871_s29 + $0x1b8] sm:$0xff]  ;;  %v191_v58 = vld [vmem:[%s1871_s29 + $0x70] sm:$0xff] }
  0x5f   : > { %1481 = vmatprep.subr.mxu1 %v411_v60  ;;  %v231_v59 = vld [vmem:[%s1871_s29 + $0x1b0] sm:$0xff] }
  0x60   : > { %1482 = vmatpush3.msra.mxu1 %v411_v60  ;;  %v194_v60 = vld [vmem:[%s1871_s29 + $0x88] sm:$0xff] }
  0x61   : > { %514 = vmatmul.mubr.f32.gmra.mxu0 %v192_v61  ;;  %754 = vmatmul.mubr.f32.gmra.mxu1 %v336_v62  ;;  %v235_v61 = vld [vmem:[%s1871_s29 + $0x1d0] sm:$0xff]  ;;  %v197_v62 = vld [vmem:[%s1871_s29 + $0xa0] sm:$0xff] }
  0x62   : > { %518 = vmatprep.mubr.f32.mxu0 %v196_v63  ;;  %758 = vmatprep.mubr.f32.mxu1 %v340_v0  ;;  %v234_v63 = vld [vmem:[%s1871_s29 + $0x1c8] sm:$0xff]  ;;  %v200_v0 = vld [vmem:[%s1871_s29 + $0xb8] sm:$0xff] }
  0x63   : > { %1483 = vmatprep.subr.mxu1 %v410_v1 }
  0x64   : > { %1484 = vmatpush3.msra.mxu1 %v410_v1  ;;  %v238_v1 = vld [vmem:[%s1871_s29 + $0x1e8] sm:$0xff] }
  0x65   : > { %519 = vmatmul.mubr.f32.gmra.mxu0 %v195_v2  ;;  %759 = vmatmul.mubr.f32.gmra.mxu1 %v339_v3  ;;  %v203_v2 = vld [vmem:[%s1871_s29 + $0xd0] sm:$0xff]  ;;  %v237_v3 = vld [vmem:[%s1871_s29 + $0x1e0] sm:$0xff] }
  0x66   : > { %523 = vmatprep.mubr.f32.mxu0 %v199_v4  ;;  %763 = vmatprep.mubr.f32.mxu1 %v343_v5  ;;  %v206_v4 = vld [vmem:[%s1871_s29 + $0xe8] sm:$0xff]  ;;  %v241_v5 = vld [vmem:[%s1871_s29 + $0x200] sm:$0xff] }
  0x67   : > { %1485 = vmatprep.subr.mxu1 %v409_v6 }
  0x68   : > { %1486 = vmatpush3.msra.mxu1 %v409_v6  ;;  %v209_v6 = vld [vmem:[%s1871_s29 + $0x100] sm:$0xff] }
  0x69   : > { %524 = vmatmul.mubr.f32.gmra.mxu0 %v198_v7  ;;  %764 = vmatmul.mubr.f32.gmra.mxu1 %v342_v8  ;;  %v240_v7 = vld [vmem:[%s1871_s29 + $0x1f8] sm:$0xff] }
  0x6a   : > { %528 = vmatprep.mubr.f32.mxu0 %v202_v9  ;;  %768 = vmatprep.mubr.f32.mxu1 %v346_v10  ;;  %v212_v8 = vld [vmem:[%s1871_s29 + $0x118] sm:$0xff]  ;;  %v215_v10 = vld [vmem:[%s1871_s29 + $0x130] sm:$0xff] }
  0x6b   : > { %1487 = vmatprep.subr.mxu1 %v408_v11  ;;  %v244_v9 = vld [vmem:[%s1871_s29 + $0x218] sm:$0xff] }
  0x6c   : > { %1488 = vmatpush3.msra.mxu1 %v408_v11  ;;  %v243_v11 = vld [vmem:[%s1871_s29 + $0x210] sm:$0xff] }
  0x6d   : > { %529 = vmatmul.mubr.f32.gmra.mxu0 %v201_v12  ;;  %769 = vmatmul.mubr.f32.gmra.mxu1 %v345_v13  ;;  %v218_v12 = vld [vmem:[%s1871_s29 + $0x148] sm:$0xff]  ;;  %v247_v13 = vld [vmem:[%s1871_s29 + $0x230] sm:$0xff] }
  0x6e   : > { %533 = vmatprep.mubr.f32.mxu0 %v205_v14  ;;  %773 = vmatprep.mubr.f32.mxu1 %v349_v15  ;;  %v221_v14 = vld [vmem:[%s1871_s29 + $0x160] sm:$0xff]  ;;  %v246_v15 = vld [vmem:[%s1871_s29 + $0x228] sm:$0xff] }
  0x6f   : > { %1489 = vmatprep.subr.mxu1 %v407_v16 }
  0x70   : > { %1490 = vmatpush3.msra.mxu1 %v407_v16  ;;  %v224_v16 = vld [vmem:[%s1871_s29 + $0x178] sm:$0xff] }
  0x71   : > { %534 = vmatmul.mubr.f32.gmra.mxu0 %v204_v17  ;;  %774 = vmatmul.mubr.f32.gmra.mxu1 %v348_v18  ;;  %v250_v17 = vld [vmem:[%s1871_s29 + $0x248] sm:$0xff]  ;;  %v227_v18 = vld [vmem:[%s1871_s29 + $0x190] sm:$0xff] }
  0x72   : > { %538 = vmatprep.mubr.f32.mxu0 %v208_v19  ;;  %778 = vmatprep.mubr.f32.mxu1 %v352_v20  ;;  %v249_v19 = vld [vmem:[%s1871_s29 + $0x240] sm:$0xff]  ;;  %v230_v20 = vld [vmem:[%s1871_s29 + $0x1a8] sm:$0xff] }
  0x73   : > { %1491 = vmatprep.subr.mxu1 %v406_v21 }
  0x74   : > { %1492 = vmatpush3.msra.mxu1 %v406_v21  ;;  %v253_v21 = vld [vmem:[%s1871_s29 + $0x260] sm:$0xff] }
  0x75   : > { %539 = vmatmul.mubr.f32.gmra.mxu0 %v207_v22  ;;  %779 = vmatmul.mubr.f32.gmra.mxu1 %v351_v23  ;;  %v233_v22 = vld [vmem:[%s1871_s29 + $0x1c0] sm:$0xff]  ;;  %v252_v23 = vld [vmem:[%s1871_s29 + $0x258] sm:$0xff] }
  0x76   : > { %543 = vmatprep.mubr.f32.mxu0 %v211_v24  ;;  %783 = vmatprep.mubr.f32.mxu1 %v355_v25  ;;  %v236_v24 = vld [vmem:[%s1871_s29 + $0x1d8] sm:$0xff] }
  0x77   : > { %1493 = vmatprep.subr.mxu1 %v405_v26  ;;  %v256_v25 = vld [vmem:[%s1871_s29 + $0x278] sm:$0xff] }
  0x78   : > { %1494 = vmatpush3.msra.mxu1 %v405_v26  ;;  %v239_v26 = vld [vmem:[%s1871_s29 + $0x1f0] sm:$0xff] }
  0x79   : > { %544 = vmatmul.mubr.f32.gmra.mxu0 %v210_v27  ;;  %784 = vmatmul.mubr.f32.gmra.mxu1 %v354_v28  ;;  %v255_v27 = vld [vmem:[%s1871_s29 + $0x270] sm:$0xff]  ;;  %v242_v28 = vld [vmem:[%s1871_s29 + $0x208] sm:$0xff] }
  0x7a   : > { %548 = vmatprep.mubr.f32.mxu0 %v214_v29  ;;  %788 = vmatprep.mubr.f32.mxu1 %v358_v30  ;;  %v259_v29 = vld [vmem:[%s1871_s29 + $0x290] sm:$0xff]  ;;  %v245_v30 = vld [vmem:[%s1871_s29 + $0x220] sm:$0xff] }
  0x7b   : > { %1495 = vmatprep.subr.mxu1 %v404_v31 }
  0x7c   : > { %1496 = vmatpush3.msra.mxu1 %v404_v31  ;;  %v258_v31 = vld [vmem:[%s1871_s29 + $0x288] sm:$0xff] }
  0x7d   : > { %549 = vmatmul.mubr.f32.gmra.mxu0 %v213_v32  ;;  %789 = vmatmul.mubr.f32.gmra.mxu1 %v357_v33  ;;  %v248_v32 = vld [vmem:[%s1871_s29 + $0x238] sm:$0xff]  ;;  %v262_v33 = vld [vmem:[%s1871_s29 + $0x2a8] sm:$0xff] }
  0x7e   : > { %553 = vmatprep.mubr.f32.mxu0 %v217_v34  ;;  %793 = vmatprep.mubr.f32.mxu1 %v361_v35  ;;  %v251_v34 = vld [vmem:[%s1871_s29 + $0x250] sm:$0xff]  ;;  %v261_v35 = vld [vmem:[%s1871_s29 + $0x2a0] sm:$0xff] }
  0x7f   : > { %1497 = vmatprep.subr.mxu1 %v403_v36 }
  0x80   : > { %1498 = vmatpush3.msra.mxu1 %v403_v36  ;;  %v254_v36 = vld [vmem:[%s1871_s29 + $0x268] sm:$0xff] }
  0x81   : > { %554 = vmatmul.mubr.f32.gmra.mxu0 %v216_v37  ;;  %794 = vmatmul.mubr.f32.gmra.mxu1 %v360_v38  ;;  %v265_v37 = vld [vmem:[%s1871_s29 + $0x2c0] sm:$0xff] }
  0x82   : > { %558 = vmatprep.mubr.f32.mxu0 %v220_v39  ;;  %798 = vmatprep.mubr.f32.mxu1 %v364_v40  ;;  %v257_v38 = vld [vmem:[%s1871_s29 + $0x280] sm:$0xff]  ;;  %v264_v39 = vld [vmem:[%s1871_s29 + $0x2b8] sm:$0xff] }
  0x83   : > { %1499 = vmatprep.subr.mxu1 %v402_v41  ;;  %v260_v40 = vld [vmem:[%s1871_s29 + $0x298] sm:$0xff] }
  0x84   : > { %1500 = vmatpush3.msra.mxu1 %v402_v41  ;;  %v268_v41 = vld [vmem:[%s1871_s29 + $0x2d8] sm:$0xff] }
  0x85   : > { %559 = vmatmul.mubr.f32.gmra.mxu0 %v219_v42  ;;  %799 = vmatmul.mubr.f32.gmra.mxu1 %v363_v43  ;;  %v263_v42 = vld [vmem:[%s1871_s29 + $0x2b0] sm:$0xff] }
  0x86   : > { %563 = vmatprep.mubr.f32.mxu0 %v223_v44  ;;  %803 = vmatprep.mubr.f32.mxu1 %v367_v45  ;;  %v267_v43 = vld [vmem:[%s1871_s29 + $0x2d0] sm:$0xff]  ;;  %v266_v44 = vld [vmem:[%s1871_s29 + $0x2c8] sm:$0xff] }
  0x87   : > { %1501 = vmatprep.subr.mxu1 %v401_v46  ;;  %v271_v45 = vld [vmem:[%s1871_s29 + $0x2f0] sm:$0xff] }
  0x88   : > { %1502 = vmatpush3.msra.mxu1 %v401_v46  ;;  %v269_v46 = vld [vmem:[%s1871_s29 + $0x2e0] sm:$0xff] }
  0x89   : > { %564 = vmatmul.mubr.f32.gmra.mxu0 %v222_v47  ;;  %804 = vmatmul.mubr.f32.gmra.mxu1 %v366_v48  ;;  %v270_v47 = vld [vmem:[%s1871_s29 + $0x2e8] sm:$0xff]  ;;  %v272_v48 = vld [vmem:[%s1871_s29 + $0x2f8] sm:$0xff] }
  0x8a   : > { %568 = vmatprep.mubr.f32.mxu0 %v226_v49  ;;  %1503 = vmatprep.mubr.f32.mxu1 %v179_v50  ;;  %v274_v49 = vld [vmem:[%s1871_s29 + $0x308] sm:$0xff]  ;;  %v275_v50 = vld [vmem:[%s1871_s29 + $0x310] sm:$0xff] }
  0x8d   : > { %569 = vmatmul.mubr.f32.gmra.mxu0 %v225_v51  ;;  %1504 = vmatmul.mubr.f32.vlgmr.msra.gmra.mxu1 %v182_v52  ;;  %v273_v51 = vld [vmem:[%s1871_s29 + $0x300] sm:$0xff]  ;;  %v278_v52 = vld [vmem:[%s1871_s29 + $0x328] sm:$0xff] }
  0x8e   : > { %573 = vmatprep.mubr.f32.mxu0 %v229_v53  ;;  %1506 = vmatprep.mubr.f32.mxu1 %v185_v54  ;;  %v277_v53 = vld [vmem:[%s1871_s29 + $0x320] sm:$0xff] }
  0x8f   : > { %v281_v54 = vld [vmem:[%s1871_s29 + $0x340] sm:$0xff] }
  0x91   : > { %574 = vmatmul.mubr.f32.gmra.mxu0 %v228_v55  ;;  %1507 = vmatmul.mubr.f32.gmra.mxu1 %v188_v56  ;;  %v276_v55 = vld [vmem:[%s1871_s29 + $0x318] sm:$0xff] }
  0x92   : > { %578 = vmatprep.mubr.f32.mxu0 %v232_v57  ;;  %1509 = vmatprep.mubr.f32.mxu1 %v191_v58  ;;  %v284_v56 = vld [vmem:[%s1871_s29 + $0x358] sm:$0xff]  ;;  %v287_v58 = vld [vmem:[%s1871_s29 + $0x370] sm:$0xff] }
  0x93   : > { %v280_v57 = vld [vmem:[%s1871_s29 + $0x338] sm:$0xff] }
  0x95   : > { %579 = vmatmul.mubr.f32.gmra.mxu0 %v231_v59  ;;  %1510 = vmatmul.mubr.f32.gmra.mxu1 %v194_v60  ;;  %v279_v59 = vld [vmem:[%s1871_s29 + $0x330] sm:$0xff]  ;;  %v290_v60 = vld [vmem:[%s1871_s29 + $0x388] sm:$0xff] }
  0x96   : > { %583 = vmatprep.mubr.f32.mxu0 %v235_v61  ;;  %1512 = vmatprep.mubr.f32.mxu1 %v197_v62  ;;  %v283_v61 = vld [vmem:[%s1871_s29 + $0x350] sm:$0xff]  ;;  %v293_v62 = vld [vmem:[%s1871_s29 + $0x3a0] sm:$0xff] }
  0x99   : > { %584 = vmatmul.mubr.f32.gmra.mxu0 %v234_v63  ;;  %1513 = vmatmul.mubr.f32.gmra.mxu1 %v200_v0  ;;  %v282_v63 = vld [vmem:[%s1871_s29 + $0x348] sm:$0xff]  ;;  %v296_v0 = vld [vmem:[%s1871_s29 + $0x3b8] sm:$0xff] }
  0x9a   : > { %588 = vmatprep.mubr.f32.mxu0 %v238_v1  ;;  %1515 = vmatprep.mubr.f32.mxu1 %v203_v2  ;;  %v286_v1 = vld [vmem:[%s1871_s29 + $0x368] sm:$0xff]  ;;  %v299_v2 = vld [vmem:[%s1871_s29 + $0x3d0] sm:$0xff] }
  0x9d   : > { %589 = vmatmul.mubr.f32.gmra.mxu0 %v237_v3  ;;  %1516 = vmatmul.mubr.f32.gmra.mxu1 %v206_v4  ;;  %v285_v3 = vld [vmem:[%s1871_s29 + $0x360] sm:$0xff]  ;;  %v302_v4 = vld [vmem:[%s1871_s29 + $0x3e8] sm:$0xff] }
  0x9e   : > { %593 = vmatprep.mubr.f32.mxu0 %v241_v5  ;;  %1518 = vmatprep.mubr.f32.mxu1 %v209_v6  ;;  %v289_v5 = vld [vmem:[%s1871_s29 + $0x380] sm:$0xff] }
  0x9f   : > { %v305_v6 = vld [vmem:[%s1871_s29 + $0x400] sm:$0xff] }
  0xa1   : > { %594 = vmatmul.mubr.f32.gmra.mxu0 %v240_v7  ;;  %1519 = vmatmul.mubr.f32.gmra.mxu1 %v212_v8  ;;  %v288_v7 = vld [vmem:[%s1871_s29 + $0x378] sm:$0xff] }
  0xa2   : > { %598 = vmatprep.mubr.f32.mxu0 %v244_v9  ;;  %1521 = vmatprep.mubr.f32.mxu1 %v215_v10  ;;  %v308_v8 = vld [vmem:[%s1871_s29 + $0x418] sm:$0xff]  ;;  %v311_v10 = vld [vmem:[%s1871_s29 + $0x430] sm:$0xff] }
  0xa3   : > { %v292_v9 = vld [vmem:[%s1871_s29 + $0x398] sm:$0xff] }
  0xa5   : > { %599 = vmatmul.mubr.f32.gmra.mxu0 %v243_v11  ;;  %1522 = vmatmul.mubr.f32.gmra.mxu1 %v218_v12  ;;  %v291_v11 = vld [vmem:[%s1871_s29 + $0x390] sm:$0xff]  ;;  %v314_v12 = vld [vmem:[%s1871_s29 + $0x448] sm:$0xff] }
  0xa6   : > { %603 = vmatprep.mubr.f32.mxu0 %v247_v13  ;;  %1524 = vmatprep.mubr.f32.mxu1 %v221_v14  ;;  %v295_v13 = vld [vmem:[%s1871_s29 + $0x3b0] sm:$0xff]  ;;  %v317_v14 = vld [vmem:[%s1871_s29 + $0x460] sm:$0xff] }
  0xa9   : > { %604 = vmatmul.mubr.f32.gmra.mxu0 %v246_v15  ;;  %1525 = vmatmul.mubr.f32.gmra.mxu1 %v224_v16  ;;  %v294_v15 = vld [vmem:[%s1871_s29 + $0x3a8] sm:$0xff]  ;;  %v320_v16 = vld [vmem:[%s1871_s29 + $0x478] sm:$0xff] }
  0xaa   : > { %608 = vmatprep.mubr.f32.mxu0 %v250_v17  ;;  %1527 = vmatprep.mubr.f32.mxu1 %v227_v18  ;;  %v298_v17 = vld [vmem:[%s1871_s29 + $0x3c8] sm:$0xff]  ;;  %v323_v18 = vld [vmem:[%s1871_s29 + $0x490] sm:$0xff] }
  0xad   : > { %609 = vmatmul.mubr.f32.gmra.mxu0 %v249_v19  ;;  %1528 = vmatmul.mubr.f32.gmra.mxu1 %v230_v20  ;;  %v297_v19 = vld [vmem:[%s1871_s29 + $0x3c0] sm:$0xff]  ;;  %v326_v20 = vld [vmem:[%s1871_s29 + $0x4a8] sm:$0xff] }
  0xae   : > { %613 = vmatprep.mubr.f32.mxu0 %v253_v21  ;;  %1530 = vmatprep.mubr.f32.mxu1 %v233_v22  ;;  %v301_v21 = vld [vmem:[%s1871_s29 + $0x3e0] sm:$0xff] }
  0xaf   : > { %v329_v22 = vld [vmem:[%s1871_s29 + $0x4c0] sm:$0xff] }
  0xb1   : > { %614 = vmatmul.mubr.f32.gmra.mxu0 %v252_v23  ;;  %1531 = vmatmul.mubr.f32.gmra.mxu1 %v236_v24  ;;  %v300_v23 = vld [vmem:[%s1871_s29 + $0x3d8] sm:$0xff] }
  0xb2   : > { %618 = vmatprep.mubr.f32.mxu0 %v256_v25  ;;  %1533 = vmatprep.mubr.f32.mxu1 %v239_v26  ;;  %v332_v24 = vld [vmem:[%s1871_s29 + $0x4d8] sm:$0xff]  ;;  %v335_v26 = vld [vmem:[%s1871_s29 + $0x4f0] sm:$0xff] }
  0xb3   : > { %v304_v25 = vld [vmem:[%s1871_s29 + $0x3f8] sm:$0xff] }
  0xb5   : > { %619 = vmatmul.mubr.f32.gmra.mxu0 %v255_v27  ;;  %1534 = vmatmul.mubr.f32.gmra.mxu1 %v242_v28  ;;  %v303_v27 = vld [vmem:[%s1871_s29 + $0x3f0] sm:$0xff]  ;;  %v338_v28 = vld [vmem:[%s1871_s29 + $0x508] sm:$0xff] }
  0xb6   : > { %623 = vmatprep.mubr.f32.mxu0 %v259_v29  ;;  %1536 = vmatprep.mubr.f32.mxu1 %v245_v30  ;;  %v307_v29 = vld [vmem:[%s1871_s29 + $0x410] sm:$0xff]  ;;  %v341_v30 = vld [vmem:[%s1871_s29 + $0x520] sm:$0xff] }
  0xb9   : > { %624 = vmatmul.mubr.f32.gmra.mxu0 %v258_v31  ;;  %1537 = vmatmul.mubr.f32.gmra.mxu1 %v248_v32  ;;  %v306_v31 = vld [vmem:[%s1871_s29 + $0x408] sm:$0xff]  ;;  %v344_v32 = vld [vmem:[%s1871_s29 + $0x538] sm:$0xff] }
  0xba   : > { %628 = vmatprep.mubr.f32.mxu0 %v262_v33  ;;  %1539 = vmatprep.mubr.f32.mxu1 %v251_v34  ;;  %v310_v33 = vld [vmem:[%s1871_s29 + $0x428] sm:$0xff]  ;;  %v347_v34 = vld [vmem:[%s1871_s29 + $0x550] sm:$0xff] }
  0xbd   : > { %629 = vmatmul.mubr.f32.gmra.mxu0 %v261_v35  ;;  %1540 = vmatmul.mubr.f32.gmra.mxu1 %v254_v36  ;;  %v309_v35 = vld [vmem:[%s1871_s29 + $0x420] sm:$0xff]  ;;  %v350_v36 = vld [vmem:[%s1871_s29 + $0x568] sm:$0xff] }
  0xbe   : > { %633 = vmatprep.mubr.f32.mxu0 %v265_v37  ;;  %1542 = vmatprep.mubr.f32.mxu1 %v257_v38  ;;  %v313_v37 = vld [vmem:[%s1871_s29 + $0x440] sm:$0xff] }
  0xbf   : > { %v353_v38 = vld [vmem:[%s1871_s29 + $0x580] sm:$0xff] }
  0xc1   : > { %634 = vmatmul.mubr.f32.gmra.mxu0 %v264_v39  ;;  %1543 = vmatmul.mubr.f32.gmra.mxu1 %v260_v40  ;;  %v312_v39 = vld [vmem:[%s1871_s29 + $0x438] sm:$0xff] }
  0xc2   : > { %638 = vmatprep.mubr.f32.mxu0 %v268_v41  ;;  %1545 = vmatprep.mubr.f32.mxu1 %v263_v42  ;;  %v356_v40 = vld [vmem:[%s1871_s29 + $0x598] sm:$0xff]  ;;  %v359_v42 = vld [vmem:[%s1871_s29 + $0x5b0] sm:$0xff] }
  0xc3   : > { %v316_v41 = vld [vmem:[%s1871_s29 + $0x458] sm:$0xff] }
  0xc5   : > { %639 = vmatmul.mubr.f32.gmra.mxu0 %v267_v43  ;;  %1546 = vmatmul.mubr.f32.gmra.mxu1 %v266_v44  ;;  %v315_v43 = vld [vmem:[%s1871_s29 + $0x450] sm:$0xff]  ;;  %v362_v44 = vld [vmem:[%s1871_s29 + $0x5c8] sm:$0xff] }
  0xc6   : > { %643 = vmatprep.mubr.f32.mxu0 %v271_v45  ;;  %1548 = vmatprep.mubr.f32.mxu1 %v269_v46  ;;  %v319_v45 = vld [vmem:[%s1871_s29 + $0x470] sm:$0xff]  ;;  %v365_v46 = vld [vmem:[%s1871_s29 + $0x5e0] sm:$0xff] }
  0xc9   : > { %644 = vmatmul.mubr.f32.gmra.mxu0 %v270_v47  ;;  %1549 = vmatmul.mubr.f32.gmra.mxu1 %v272_v48  ;;  %v318_v47 = vld [vmem:[%s1871_s29 + $0x468] sm:$0xff]  ;;  %v368_v48 = vld [vmem:[%s1871_s29 + $0x5f8] sm:$0xff] }
  0xca   : > { %648 = vmatprep.mubr.f32.mxu0 %v274_v49  ;;  %1551 = vmatprep.mubr.f32.mxu1 %v275_v50 }
  0xcd   : > { %649 = vmatmul.mubr.f32.gmra.mxu0 %v273_v51  ;;  %1552 = vmatmul.mubr.f32.gmra.mxu1 %v278_v52 }
  0xce   : > { %653 = vmatprep.mubr.f32.mxu0 %v277_v53  ;;  %1554 = vmatprep.mubr.f32.mxu1 %v281_v54 }
  0xd1   : > { %654 = vmatmul.mubr.f32.gmra.mxu0 %v276_v55  ;;  %1555 = vmatmul.mubr.f32.gmra.mxu1 %v284_v56 }
  0xd2   : > { %658 = vmatprep.mubr.f32.mxu0 %v280_v57  ;;  %1557 = vmatprep.mubr.f32.mxu1 %v287_v58 }
  0xd5   : > { %659 = vmatmul.mubr.f32.gmra.mxu0 %v279_v59  ;;  %1558 = vmatmul.mubr.f32.gmra.mxu1 %v290_v60 }
  0xd6   : > { %663 = vmatprep.mubr.f32.mxu0 %v283_v61  ;;  %1560 = vmatprep.mubr.f32.mxu1 %v293_v62 }
  0xd9   : > { %664 = vmatmul.mubr.f32.gmra.mxu0 %v282_v63  ;;  %1561 = vmatmul.mubr.f32.gmra.mxu1 %v296_v0 }
  0xda   : > { %668 = vmatprep.mubr.f32.mxu0 %v286_v1  ;;  %1563 = vmatprep.mubr.f32.mxu1 %v299_v2 }
  0xdd   : > { %669 = vmatmul.mubr.f32.gmra.mxu0 %v285_v3  ;;  %1564 = vmatmul.mubr.f32.gmra.mxu1 %v302_v4 }
  0xde   : > { %673 = vmatprep.mubr.f32.mxu0 %v289_v5  ;;  %1566 = vmatprep.mubr.f32.mxu1 %v305_v6 }
  0xe1   : > { %674 = vmatmul.mubr.f32.gmra.mxu0 %v288_v7  ;;  %1567 = vmatmul.mubr.f32.gmra.mxu1 %v308_v8 }
  0xe2   : > { %678 = vmatprep.mubr.f32.mxu0 %v292_v9  ;;  %1569 = vmatprep.mubr.f32.mxu1 %v311_v10 }
  0xe5   : > { %679 = vmatmul.mubr.f32.gmra.mxu0 %v291_v11  ;;  %1570 = vmatmul.mubr.f32.gmra.mxu1 %v314_v12 }
  0xe6   : > { %683 = vmatprep.mubr.f32.mxu0 %v295_v13  ;;  %1572 = vmatprep.mubr.f32.mxu1 %v317_v14 }
  0xe9   : > { %684 = vmatmul.mubr.f32.gmra.mxu0 %v294_v15  ;;  %1573 = vmatmul.mubr.f32.gmra.mxu1 %v320_v16 }
  0xea   : > { %688 = vmatprep.mubr.f32.mxu0 %v298_v17  ;;  %1575 = vmatprep.mubr.f32.mxu1 %v323_v18 }
  0xed   : > { %689 = vmatmul.mubr.f32.gmra.mxu0 %v297_v19  ;;  %1576 = vmatmul.mubr.f32.gmra.mxu1 %v326_v20 }
  0xee   : > { %693 = vmatprep.mubr.f32.mxu0 %v301_v21  ;;  %1578 = vmatprep.mubr.f32.mxu1 %v329_v22 }
  0xf1   : > { %694 = vmatmul.mubr.f32.gmra.mxu0 %v300_v23  ;;  %1579 = vmatmul.mubr.f32.gmra.mxu1 %v332_v24 }
  0xf2   : > { %698 = vmatprep.mubr.f32.mxu0 %v304_v25  ;;  %1581 = vmatprep.mubr.f32.mxu1 %v335_v26 }
  0xf5   : > { %699 = vmatmul.mubr.f32.gmra.mxu0 %v303_v27  ;;  %1582 = vmatmul.mubr.f32.gmra.mxu1 %v338_v28 }
  0xf6   : > { %703 = vmatprep.mubr.f32.mxu0 %v307_v29  ;;  %1584 = vmatprep.mubr.f32.mxu1 %v341_v30 }
  0xf9   : > { %704 = vmatmul.mubr.f32.gmra.mxu0 %v306_v31  ;;  %1585 = vmatmul.mubr.f32.gmra.mxu1 %v344_v32 }
  0xfa   : > { %708 = vmatprep.mubr.f32.mxu0 %v310_v33  ;;  %1587 = vmatprep.mubr.f32.mxu1 %v347_v34 }
  0xfd   : > { %709 = vmatmul.mubr.f32.gmra.mxu0 %v309_v35  ;;  %1588 = vmatmul.mubr.f32.gmra.mxu1 %v350_v36 }
  0xfe   : > { %713 = vmatprep.mubr.f32.mxu0 %v313_v37  ;;  %1590 = vmatprep.mubr.f32.mxu1 %v353_v38 }
 0x101   : > { %714 = vmatmul.mubr.f32.gmra.mxu0 %v312_v39  ;;  %1591 = vmatmul.mubr.f32.gmra.mxu1 %v356_v40 }
 0x102   : > { %718 = vmatprep.mubr.f32.mxu0 %v316_v41  ;;  %1593 = vmatprep.mubr.f32.mxu1 %v359_v42 }
 0x105   : > { %719 = vmatmul.mubr.f32.gmra.mxu0 %v315_v43  ;;  %1594 = vmatmul.mubr.f32.gmra.mxu1 %v362_v44 }
 0x106   : > { %723 = vmatprep.mubr.f32.mxu0 %v319_v45  ;;  %1596 = vmatprep.mubr.f32.mxu1 %v365_v46 }
 0x109   : > { %724 = vmatmul.mubr.f32.gmra.mxu0 %v318_v47  ;;  %1597 = vmatmul.mubr.f32.gmra.mxu1 %v368_v48  ;;  %v2185_v47 = vld [vmem:[%s2451_s2] ss:$0 sm:$0xff] }
 0x10d   : > { %v2120_v49 = vpop.f32.mrf.mxu0  ;;  %v2122_v50 = vpop.f32.mrf.mxu1 }
 0x10f   : > { %v492_v51 = vpop.f32.mrf.mxu0  ;;  %v732_v52 = vpop.f32.mrf.mxu1 }
 0x111   : > { %v495_v53 = vpop.f32.mrf.mxu0  ;;  %v2124_v54 = vpop.f32.mrf.mxu1 }
 0x112   : > { %v496_v52 = vadd.f32 %v2185_v47, %v495_v53 }
 0x113   : > { %v497_v55 = vpop.f32.mrf.mxu0  ;;  %v737_v56 = vpop.f32.mrf.mxu1 }
 0x115   : > { %v2126_v57 = vpop.f32.mrf.mxu0  ;;  %v2128_v58 = vpop.f32.mrf.mxu1 }
 0x117   : > { %v502_v59 = vpop.f32.mrf.mxu0  ;;  %v742_v60 = vpop.f32.mrf.mxu1 }
 0x118   : > { %v491_v59 = vadd.f32 %v2185_v47, %v2120_v49 }
 0x119   : > { %v2130_v61 = vpop.f32.mrf.mxu0  ;;  %v2132_v62 = vpop.f32.mrf.mxu1 }
 0x11a   : > { %v506_v53 = vadd.f32 %v2185_v47, %v2130_v61 }
 0x11b   : > { %v507_v63 = vpop.f32.mrf.mxu0  ;;  %v747_v0 = vpop.f32.mrf.mxu1 }
 0x11d   : > { %v2134_v1 = vpop.f32.mrf.mxu0  ;;  %v2136_v2 = vpop.f32.mrf.mxu1 }
 0x11f   : > { %v512_v3 = vpop.f32.mrf.mxu0  ;;  %v752_v4 = vpop.f32.mrf.mxu1 }
 0x121   : > { %v2138_v5 = vpop.f32.mrf.mxu0  ;;  %v2140_v6 = vpop.f32.mrf.mxu1 }
 0x123   : > { %v517_v7 = vpop.f32.mrf.mxu0  ;;  %v757_v8 = vpop.f32.mrf.mxu1 }
 0x124   : > { %v501_v8 = vadd.f32 %v2185_v47, %v2126_v57  ;;  %v511_v57 = vadd.f32 %v2185_v47, %v2134_v1 }
 0x125   : > { %v2142_v9 = vpop.f32.mrf.mxu0  ;;  %v2144_v10 = vpop.f32.mrf.mxu1 }
 0x126   : > { %v521_v1 = vadd.f32 %v2185_v47, %v2142_v9 }
 0x127   : > { %v522_v11 = vpop.f32.mrf.mxu0  ;;  %v762_v12 = vpop.f32.mrf.mxu1 }
 0x129   : > { %v2146_v13 = vpop.f32.mrf.mxu0  ;;  %v2148_v14 = vpop.f32.mrf.mxu1 }
 0x12b   : > { %v527_v15 = vpop.f32.mrf.mxu0  ;;  %v767_v16 = vpop.f32.mrf.mxu1 }
 0x12d   : > { %v2150_v17 = vpop.f32.mrf.mxu0  ;;  %v2152_v18 = vpop.f32.mrf.mxu1 }
 0x12e   : > { %v531_v9 = vadd.f32 %v2185_v47, %v2150_v17 }
 0x12f   : > { %v532_v19 = vpop.f32.mrf.mxu0  ;;  %v772_v20 = vpop.f32.mrf.mxu1 }
 0x130   : > { %v516_v19 = vadd.f32 %v2185_v47, %v2138_v5  ;;  %v526_v5 = vadd.f32 %v2185_v47, %v2146_v13 }
 0x131   : > { %v2154_v21 = vpop.f32.mrf.mxu0  ;;  %v2156_v22 = vpop.f32.mrf.mxu1 }
 0x132   : > { %v536_v13 = vadd.f32 %v2185_v47, %v2154_v21 }
 0x133   : > { %v537_v23 = vpop.f32.mrf.mxu0  ;;  %v777_v24 = vpop.f32.mrf.mxu1 }
 0x135   : > { %v2158_v25 = vpop.f32.mrf.mxu0  ;;  %v2160_v26 = vpop.f32.mrf.mxu1 }
 0x136   : > { %v541_v17 = vadd.f32 %v2185_v47, %v2158_v25 }
 0x137   : > { %v542_v27 = vpop.f32.mrf.mxu0  ;;  %v782_v28 = vpop.f32.mrf.mxu1 }
 0x139   : > { %v2162_v29 = vpop.f32.mrf.mxu0  ;;  %v2164_v30 = vpop.f32.mrf.mxu1 }
 0x13a   : > { %v546_v21 = vadd.f32 %v2185_v47, %v2162_v29 }
 0x13b   : > { %v547_v31 = vpop.f32.mrf.mxu0  ;;  %v787_v32 = vpop.f32.mrf.mxu1 }
 0x13d   : > { %v2166_v33 = vpop.f32.mrf.mxu0  ;;  %v2168_v34 = vpop.f32.mrf.mxu1 }
 0x13e   : > { %v551_v25 = vadd.f32 %v2185_v47, %v2166_v33 }
 0x13f   : > { %v552_v35 = vpop.f32.mrf.mxu0  ;;  %v792_v36 = vpop.f32.mrf.mxu1 }
 0x141   : > { %v2170_v37 = vpop.f32.mrf.mxu0  ;;  %v2172_v38 = vpop.f32.mrf.mxu1 }
 0x142   : > { %v556_v29 = vadd.f32 %v2185_v47, %v2170_v37 }
 0x143   : > { %v557_v39 = vpop.f32.mrf.mxu0  ;;  %v797_v40 = vpop.f32.mrf.mxu1 }
 0x145   : > { %v2174_v41 = vpop.f32.mrf.mxu0  ;;  %v2176_v42 = vpop.f32.mrf.mxu1 }
 0x146   : > { %v561_v33 = vadd.f32 %v2185_v47, %v2174_v41 }
 0x147   : > { %v562_v43 = vpop.f32.mrf.mxu0  ;;  %v802_v44 = vpop.f32.mrf.mxu1 }
 0x149   : > { %v2178_v45 = vpop.f32.mrf.mxu0  ;;  %v2180_v46 = vpop.f32.mrf.mxu1 }
 0x14a   : > { %v566_v37 = vadd.f32 %v2185_v47, %v2178_v45 }
 0x14b   : > { %v567_v48 = vpop.f32.mrf.mxu0  ;;  %v807_v51 = vpop.f32.mrf.mxu1 }
 0x14d   : > { %v2189_v55 = vpop.f32.mrf.mxu0  ;;  %v1505_v56 = vpop.f32.mrf.mxu1 }
 0x14e   : > { %v881_v60 = vadd.f32 %v1505_v56, %v496_v52  ;;  %v571_v41 = vadd.f32 %v2185_v47, %v2189_v55 }
 0x14f   : > { %v572_v63 = vpop.f32.mrf.mxu0  ;;  %v875_v0 = vpop.f32.mrf.mxu1 }
 0x150   : > { %v1195_v3 = vmax.f32 %v881_v60, 0.0  ;;  %v876_v4 = vadd.f32 %v875_v0, %v491_v59 }
 0x151   : > { %v2200_v7 = vpop.f32.mrf.mxu0  ;;  %v1508_v49 = vpop.f32.mrf.mxu1 }
 0x152   : > { %1260 = vst.msk [vmem:[%s2196_s19 + $0x8] sm:$0xff] %vm1258_vm0, %v1195_v3  ;;  %v1194_v11 = vmax.f32 %v876_v4, 0.0  ;;  %v891_v12 = vadd.f32 %v1508_v49, %v506_v53  ;;  %v576_v45 = vadd.f32 %v2185_v47, %v2200_v7 }
 0x153   : > { %v577_v15 = vpop.f32.mrf.mxu0  ;;  %v885_v16 = vpop.f32.mrf.mxu1 }
 0x154   : > { %1259 = vst.msk [vmem:[%s2196_s19] sm:$0xff] %vm1258_vm0, %v1194_v11  ;;  %v1197_v61 = vmax.f32 %v891_v12, 0.0  ;;  %v886_v20 = vadd.f32 %v885_v16, %v501_v8 }
 0x155   : > { %v2210_v23 = vpop.f32.mrf.mxu0  ;;  %v1511_v24 = vpop.f32.mrf.mxu1 }
 0x156   : > { %1262 = vst.msk [vmem:[%s2196_s19 + $0x18] sm:$0xff] %vm1258_vm0, %v1197_v61  ;;  %v1196_v27 = vmax.f32 %v886_v20, 0.0  ;;  %v901_v28 = vadd.f32 %v1511_v24, %v516_v19  ;;  %v581_v55 = vadd.f32 %v2185_v47, %v2210_v23 }
 0x157   : > { %v582_v31 = vpop.f32.mrf.mxu0  ;;  %v895_v32 = vpop.f32.mrf.mxu1 }
 0x158   : > { %1261 = vst.msk [vmem:[%s2196_s19 + $0x10] sm:$0xff] %vm1258_vm0, %v1196_v27  ;;  %v1199_v35 = vmax.f32 %v901_v28, 0.0  ;;  %v896_v36 = vadd.f32 %v895_v32, %v511_v57 }
 0x159   : > { %v2220_v39 = vpop.f32.mrf.mxu0  ;;  %v1514_v40 = vpop.f32.mrf.mxu1 }
 0x15a   : > { %1264 = vst.msk [vmem:[%s2196_s19 + $0x28] sm:$0xff] %vm1258_vm0, %v1199_v35  ;;  %v1198_v43 = vmax.f32 %v896_v36, 0.0  ;;  %v911_v44 = vadd.f32 %v1514_v40, %v526_v5  ;;  %v586_v7 = vadd.f32 %v2185_v47, %v2220_v39 }
 0x15b   : > { %v587_v48 = vpop.f32.mrf.mxu0  ;;  %v905_v51 = vpop.f32.mrf.mxu1 }
 0x15c   : > { %1263 = vst.msk [vmem:[%s2196_s19 + $0x20] sm:$0xff] %vm1258_vm0, %v1198_v43  ;;  %v1201_v52 = vmax.f32 %v911_v44, 0.0  ;;  %v906_v56 = vadd.f32 %v905_v51, %v521_v1 }
 0x15d   : > { %v2230_v59 = vpop.f32.mrf.mxu0  ;;  %v1517_v60 = vpop.f32.mrf.mxu1 }
 0x15e   : > { %1266 = vst.msk [vmem:[%s2196_s19 + $0x38] sm:$0xff] %vm1258_vm0, %v1201_v52  ;;  %v1200_v63 = vmax.f32 %v906_v56, 0.0  ;;  %v921_v0 = vadd.f32 %v1517_v60, %v536_v13 }
 0x15f   : > { %v592_v53 = vpop.f32.mrf.mxu0  ;;  %v915_v3 = vpop.f32.mrf.mxu1 }
 0x160   : > { %1265 = vst.msk [vmem:[%s2196_s19 + $0x30] sm:$0xff] %vm1258_vm0, %v1200_v63  ;;  %v1203_v4 = vmax.f32 %v921_v0, 0.0  ;;  %v916_v49 = vadd.f32 %v915_v3, %v531_v9 }
 0x161   : > { %v595_v8 = vpop.f32.mrf.mxu0  ;;  %v1520_v11 = vpop.f32.mrf.mxu1 }
 0x162   : > { %1268 = vst.msk [vmem:[%s2196_s19 + $0x48] sm:$0xff] %vm1258_vm0, %v1203_v4  ;;  %v1202_v12 = vmax.f32 %v916_v49, 0.0  ;;  %v931_v15 = vadd.f32 %v1520_v11, %v546_v21 }
 0x163   : > { %v597_v16 = vpop.f32.mrf.mxu0  ;;  %v925_v19 = vpop.f32.mrf.mxu1 }
 0x164   : > { %1267 = vst.msk [vmem:[%s2196_s19 + $0x40] sm:$0xff] %vm1258_vm0, %v1202_v12  ;;  %v1205_v61 = vmax.f32 %v931_v15, 0.0  ;;  %v926_v20 = vadd.f32 %v925_v19, %v541_v17  ;;  %v596_v15 = vadd.f32 %v2185_v47, %v595_v8 }
 0x165   : > { %v600_v24 = vpop.f32.mrf.mxu0  ;;  %v1523_v57 = vpop.f32.mrf.mxu1 }
 0x166   : > { %1270 = vst.msk [vmem:[%s2196_s19 + $0x58] sm:$0xff] %vm1258_vm0, %v1205_v61  ;;  %v1204_v27 = vmax.f32 %v926_v20, 0.0  ;;  %v941_v28 = vadd.f32 %v1523_v57, %v556_v29  ;;  %v591_v61 = vadd.f32 %v2185_v47, %v2230_v59 }
 0x167   : > { %v602_v31 = vpop.f32.mrf.mxu0  ;;  %v935_v32 = vpop.f32.mrf.mxu1 }
 0x168   : > { %1269 = vst.msk [vmem:[%s2196_s19 + $0x50] sm:$0xff] %vm1258_vm0, %v1204_v27  ;;  %v1207_v5 = vmax.f32 %v941_v28, 0.0  ;;  %v936_v35 = vadd.f32 %v935_v32, %v551_v25 }
 0x169   : > { %v605_v36 = vpop.f32.mrf.mxu0  ;;  %v1526_v40 = vpop.f32.mrf.mxu1 }
 0x16a   : > { %1272 = vst.msk [vmem:[%s2196_s19 + $0x68] sm:$0xff] %vm1258_vm0, %v1207_v5  ;;  %v1206_v1 = vmax.f32 %v936_v35, 0.0  ;;  %v951_v43 = vadd.f32 %v1526_v40, %v566_v37  ;;  %v606_v27 = vadd.f32 %v2185_v47, %v605_v36  ;;  %v601_v37 = vadd.f32 %v2185_v47, %v600_v24 }
 0x16b   : > { %v607_v44 = vpop.f32.mrf.mxu0  ;;  %v945_v48 = vpop.f32.mrf.mxu1 }
 0x16c   : > { %1271 = vst.msk [vmem:[%s2196_s19 + $0x60] sm:$0xff] %vm1258_vm0, %v1206_v1  ;;  %v1209_v51 = vmax.f32 %v951_v43, 0.0  ;;  %v946_v13 = vadd.f32 %v945_v48, %v561_v33 }
 0x16d   : > { %v610_v52 = vpop.f32.mrf.mxu0  ;;  %v1529_v56 = vpop.f32.mrf.mxu1 }
 0x16e   : > { %1274 = vst.msk [vmem:[%s2196_s19 + $0x78] sm:$0xff] %vm1258_vm0, %v1209_v51  ;;  %v1208_v60 = vmax.f32 %v946_v13, 0.0  ;;  %v961_v9 = vadd.f32 %v1529_v56, %v576_v45  ;;  %v611_v48 = vadd.f32 %v2185_v47, %v610_v52 }
 0x16f   : > { %v612_v63 = vpop.f32.mrf.mxu0  ;;  %v955_v0 = vpop.f32.mrf.mxu1 }
 0x170   : > { %1273 = vst.msk [vmem:[%s2196_s19 + $0x70] sm:$0xff] %vm1258_vm0, %v1208_v60  ;;  %v1211_v53 = vmax.f32 %v961_v9, 0.0  ;;  %v956_v3 = vadd.f32 %v955_v0, %v571_v41 }
 0x171   : > { %v615_v21 = vpop.f32.mrf.mxu0  ;;  %v1532_v4 = vpop.f32.mrf.mxu1 }
 0x172   : > { %1276 = vst.msk [vmem:[%s2196_s19 + $0x88] sm:$0xff] %vm1258_vm0, %v1211_v53  ;;  %v1210_v49 = vmax.f32 %v956_v3, 0.0  ;;  %v971_v11 = vadd.f32 %v1532_v4, %v586_v7  ;;  %v616_v33 = vadd.f32 %v2185_v47, %v615_v21 }
 0x173   : > { %v617_v17 = vpop.f32.mrf.mxu0  ;;  %v965_v12 = vpop.f32.mrf.mxu1 }
 0x174   : > { %1275 = vst.msk [vmem:[%s2196_s19 + $0x80] sm:$0xff] %vm1258_vm0, %v1210_v49  ;;  %v1213_v39 = vmax.f32 %v971_v11, 0.0  ;;  %v966_v16 = vadd.f32 %v965_v12, %v581_v55 }
 0x175   : > { %v620_v19 = vpop.f32.mrf.mxu0  ;;  %v1535_v29 = vpop.f32.mrf.mxu1 }
 0x176   : > { %1278 = vst.msk [vmem:[%s2196_s19 + $0x98] sm:$0xff] %vm1258_vm0, %v1213_v39  ;;  %v1212_v23 = vmax.f32 %v966_v16, 0.0  ;;  %v981_v20 = vadd.f32 %v1535_v29, %v596_v15  ;;  %v621_v0 = vadd.f32 %v2185_v47, %v620_v19 }
 0x177   : > { %v622_v57 = vpop.f32.mrf.mxu0  ;;  %v975_v25 = vpop.f32.mrf.mxu1 }
 0x178   : > { %1277 = vst.msk [vmem:[%s2196_s19 + $0x90] sm:$0xff] %vm1258_vm0, %v1212_v23  ;;  %v1215_v8 = vmax.f32 %v981_v20, 0.0  ;;  %v976_v28 = vadd.f32 %v975_v25, %v591_v61 }
 0x179   : > { %v625_v31 = vpop.f32.mrf.mxu0  ;;  %v1538_v32 = vpop.f32.mrf.mxu1 }
 0x17a   : > { %1280 = vst.msk [vmem:[%s2196_s19 + $0xa8] sm:$0xff] %vm1258_vm0, %v1215_v8  ;;  %v1214_v59 = vmax.f32 %v976_v28, 0.0  ;;  %v991_v5 = vadd.f32 %v1538_v32, %v606_v27  ;;  %v626_v56 = vadd.f32 %v2185_v47, %v625_v31 }
 0x17b   : > { %v627_v35 = vpop.f32.mrf.mxu0  ;;  %v985_v40 = vpop.f32.mrf.mxu1 }
 0x17c   : > { %1279 = vst.msk [vmem:[%s2196_s19 + $0xa0] sm:$0xff] %vm1258_vm0, %v1214_v59  ;;  %v1217_v36 = vmax.f32 %v991_v5, 0.0  ;;  %v986_v1 = vadd.f32 %v985_v40, %v601_v37 }
 0x17d   : > { %v630_v43 = vpop.f32.mrf.mxu0  ;;  %v1541_v44 = vpop.f32.mrf.mxu1 }
 0x17e   : > { %1282 = vst.msk [vmem:[%s2196_s19 + $0xb8] sm:$0xff] %vm1258_vm0, %v1217_v36  ;;  %v1216_v24 = vmax.f32 %v986_v1, 0.0  ;;  %v1001_v45 = vadd.f32 %v1541_v44, %v616_v33  ;;  %v631_v17 = vadd.f32 %v2185_v47, %v630_v43 }
 0x17f   : > { %v632_v51 = vpop.f32.mrf.mxu0  ;;  %v995_v13 = vpop.f32.mrf.mxu1 }
 0x180   : > { %1281 = vst.msk [vmem:[%s2196_s19 + $0xb0] sm:$0xff] %vm1258_vm0, %v1216_v24  ;;  %v1219_v41 = vmax.f32 %v1001_v45, 0.0  ;;  %v996_v60 = vadd.f32 %v995_v13, %v611_v48 }
 0x181   : > { %v635_v9 = vpop.f32.mrf.mxu0  ;;  %v1544_v63 = vpop.f32.mrf.mxu1 }
 0x182   : > { %1284 = vst.msk [vmem:[%s2196_s19 + $0xc8] sm:$0xff] %vm1258_vm0, %v1219_v41  ;;  %v1218_v52 = vmax.f32 %v996_v60, 0.0  ;;  %v1011_v7 = vadd.f32 %v1544_v63, %v626_v56  ;;  %v636_v21 = vadd.f32 %v2185_v47, %v635_v9 }
 0x183   : > { %v637_v53 = vpop.f32.mrf.mxu0  ;;  %v1005_v3 = vpop.f32.mrf.mxu1 }
 0x184   : > { %1283 = vst.msk [vmem:[%s2196_s19 + $0xc0] sm:$0xff] %vm1258_vm0, %v1218_v52  ;;  %v1221_v4 = vmax.f32 %v1011_v7, 0.0  ;;  %v1006_v55 = vadd.f32 %v1005_v3, %v621_v0 }
 0x185   : > { %v640_v49 = vpop.f32.mrf.mxu0  ;;  %v1547_v11 = vpop.f32.mrf.mxu1 }
 0x186   : > { %1286 = vst.msk [vmem:[%s2196_s19 + $0xd8] sm:$0xff] %vm1258_vm0, %v1221_v4  ;;  %v1220_v12 = vmax.f32 %v1006_v55, 0.0  ;;  %v1021_v15 = vadd.f32 %v1547_v11, %v636_v21  ;;  %v641_v20 = vadd.f32 %v2185_v47, %v640_v49 }
 0x187   : > { %v642_v39 = vpop.f32.mrf.mxu0  ;;  %v1015_v16 = vpop.f32.mrf.mxu1 }
 0x188   : > { %1285 = vst.msk [vmem:[%s2196_s19 + $0xd0] sm:$0xff] %vm1258_vm0, %v1220_v12  ;;  %v1223_v19 = vmax.f32 %v1021_v15, 0.0  ;;  %v1016_v29 = vadd.f32 %v1015_v16, %v631_v17 }
 0x189   : > { %v645_v61 = vpop.f32.mrf.mxu0  ;;  %v1550_v23 = vpop.f32.mrf.mxu1 }
 0x18a   : > { %1288 = vst.msk [vmem:[%s2196_s19 + $0xe8] sm:$0xff] %vm1258_vm0, %v1223_v19  ;;  %v1222_v57 = vmax.f32 %v1016_v29, 0.0  ;;  %v646_v25 = vadd.f32 %v2185_v47, %v645_v61 }
 0x18b   : > { %v647_v27 = vpop.f32.mrf.mxu0  ;;  %v1025_v8 = vpop.f32.mrf.mxu1 }
 0x18c   : > { %1287 = vst.msk [vmem:[%s2196_s19 + $0xe0] sm:$0xff] %vm1258_vm0, %v1222_v57  ;;  %v1031_v28 = vadd.f32 %v1550_v23, %v646_v25  ;;  %v1026_v31 = vadd.f32 %v1025_v8, %v641_v20 }
 0x18d   : > { %v650_v32 = vpop.f32.mrf.mxu0  ;;  %v1553_v37 = vpop.f32.mrf.mxu1 }
 0x18e   : > { %v1225_v59 = vmax.f32 %v1031_v28, 0.0  ;;  %v1224_v5 = vmax.f32 %v1026_v31, 0.0  ;;  %v651_v35 = vadd.f32 %v2185_v47, %v650_v32 }
 0x18f   : > { %v652_v40 = vpop.f32.mrf.mxu0  ;;  %v1035_v33 = vpop.f32.mrf.mxu1 }
 0x190   : > { %1290 = vst.msk [vmem:[%s2196_s19 + $0xf8] sm:$0xff] %vm1258_vm0, %v1225_v59  ;;  %1289 = vst.msk [vmem:[%s2196_s19 + $0xf0] sm:$0xff] %vm1258_vm0, %v1224_v5  ;;  %v1036_v36 = vadd.f32 %v1035_v33, %v651_v35 }
 0x191   : > { %v655_v1 = vpop.f32.mrf.mxu0  ;;  %v1556_v43 = vpop.f32.mrf.mxu1 }
 0x192   : > { %v1226_v44 = vmax.f32 %v1036_v36, 0.0  ;;  %v656_v48 = vadd.f32 %v2185_v47, %v655_v1 }
 0x193   : > { %v657_v24 = vpop.f32.mrf.mxu0  ;;  %v1045_v45 = vpop.f32.mrf.mxu1 }
 0x194   : > { %1291 = vst.msk [vmem:[%s2196_s19 + $0x100] sm:$0xff] %vm1258_vm0, %v1226_v44  ;;  %v1041_v51 = vadd.f32 %v1553_v37, %v656_v48 }
 0x195   : > { %v660_v13 = vpop.f32.mrf.mxu0  ;;  %v1559_v56 = vpop.f32.mrf.mxu1 }
 0x196   : > { %v1227_v41 = vmax.f32 %v1041_v51, 0.0  ;;  %v661_v60 = vadd.f32 %v2185_v47, %v660_v13 }
 0x197   : > { %v662_v9 = vpop.f32.mrf.mxu0  ;;  %v1055_v63 = vpop.f32.mrf.mxu1 }
 0x198   : > { %1292 = vst.msk [vmem:[%s2196_s19 + $0x108] sm:$0xff] %vm1258_vm0, %v1227_v41  ;;  %v1046_v0 = vadd.f32 %v1045_v45, %v661_v60  ;;  %v731_v45 = vadd.f32 %v2185_v47, %v2122_v50  ;;  %v746_v9 = vadd.f32 %v2185_v47, %v2132_v62 }
 0x199   : > { %v665_v52 = vpop.f32.mrf.mxu0  ;;  %v1562_v7 = vpop.f32.mrf.mxu1 }
 0x19a   : > { %v1228_v53 = vmax.f32 %v1046_v0, 0.0  ;;  %v666_v3 = vadd.f32 %v2185_v47, %v665_v52  ;;  %v741_v52 = vadd.f32 %v2185_v47, %v2128_v58 }
 0x19b   : > { %v667_v21 = vpop.f32.mrf.mxu0  ;;  %v1065_v4 = vpop.f32.mrf.mxu1 }
 0x19c   : > { %1293 = vst.msk [vmem:[%s2196_s19 + $0x110] sm:$0xff] %vm1258_vm0, %v1228_v53  ;;  %v1051_v55 = vadd.f32 %v1556_v43, %v666_v3  ;;  %v736_v43 = vadd.f32 %v2185_v47, %v2124_v54 }
 0x19d   : > { %v670_v49 = vpop.f32.mrf.mxu0  ;;  %v1565_v11 = vpop.f32.mrf.mxu1 }
 0x19e   : > { %v1229_v17 = vmax.f32 %v1051_v55, 0.0  ;;  %v671_v12 = vadd.f32 %v2185_v47, %v670_v49  ;;  %v756_v49 = vadd.f32 %v2185_v47, %v2140_v6 }
 0x19f   : > { %v672_v15 = vpop.f32.mrf.mxu0  ;;  %v1075_v39 = vpop.f32.mrf.mxu1 }
 0x1a0   : > { %1294 = vst.msk [vmem:[%s2196_s19 + $0x118] sm:$0xff] %vm1258_vm0, %v1229_v17  ;;  %v1056_v16 = vadd.f32 %v1055_v63, %v671_v12  ;;  %v751_v15 = vadd.f32 %v2185_v47, %v2136_v2 }
 0x1a1   : > { %v675_v19 = vpop.f32.mrf.mxu0  ;;  %v2332_v29 = vpop.f32.mrf.mxu1 }
 0x1a2   : > { %v1230_v61 = vmax.f32 %v1056_v16, 0.0  ;;  %v676_v23 = vadd.f32 %v2185_v47, %v675_v19 }
 0x1a3   : > { %v677_v20 = vpop.f32.mrf.mxu0  ;;  %v1085_v57 = vpop.f32.mrf.mxu1 }
 0x1a4   : > { %1295 = vst.msk [vmem:[%s2196_s19 + $0x120] sm:$0xff] %vm1258_vm0, %v1230_v61  ;;  %v1061_v25 = vadd.f32 %v1559_v56, %v676_v23 }
 0x1a5   : > { %v680_v27 = vpop.f32.mrf.mxu0  ;;  %v2337_v8 = vpop.f32.mrf.mxu1 }
 0x1a6   : > { %v1231_v28 = vmax.f32 %v1061_v25, 0.0  ;;  %v681_v31 = vadd.f32 %v2185_v47, %v680_v27 }
 0x1a7   : > { %v682_v32 = vpop.f32.mrf.mxu0  ;;  %v2340_v37 = vpop.f32.mrf.mxu1 }
 0x1a8   : > { %1296 = vst.msk [vmem:[%s2196_s19 + $0x128] sm:$0xff] %vm1258_vm0, %v1231_v28  ;;  %v1066_v59 = vadd.f32 %v1065_v4, %v681_v31  ;;  %v761_v31 = vadd.f32 %v2185_v47, %v2144_v10 }
 0x1a9   : > { %v685_v5 = vpop.f32.mrf.mxu0  ;;  %v2344_v35 = vpop.f32.mrf.mxu1 }
 0x1aa   : > { %v1232_v40 = vmax.f32 %v1066_v59, 0.0  ;;  %v686_v33 = vadd.f32 %v2185_v47, %v685_v5 }
 0x1ab   : > { %v687_v36 = vpop.f32.mrf.mxu0  ;;  %v2347_v1 = vpop.f32.mrf.mxu1 }
 0x1ac   : > { %1297 = vst.msk [vmem:[%s2196_s19 + $0x130] sm:$0xff] %vm1258_vm0, %v1232_v40  ;;  %v1071_v44 = vadd.f32 %v1562_v7, %v686_v33 }
 0x1ad   : > { %v690_v48 = vpop.f32.mrf.mxu0  ;;  %v1577_v24 = vpop.f32.mrf.mxu1 }
 0x1ae   : > { %v1233_v51 = vmax.f32 %v1071_v44, 0.0  ;;  %v691_v13 = vadd.f32 %v2185_v47, %v690_v48  ;;  %v1121_v56 = vadd.f32 %v1577_v24, %v736_v43  ;;  %v771_v24 = vadd.f32 %v2185_v47, %v2152_v18 }
 0x1af   : > { %v692_v41 = vpop.f32.mrf.mxu0  ;;  %v1115_v60 = vpop.f32.mrf.mxu1 }
 0x1b0   : > { %1298 = vst.msk [vmem:[%s2196_s19 + $0x138] sm:$0xff] %vm1258_vm0, %v1233_v51  ;;  %v1076_v54 = vadd.f32 %v1075_v39, %v691_v13  ;;  %v1243_v63 = vmax.f32 %v1121_v56, 0.0  ;;  %v1116_v0 = vadd.f32 %v1115_v60, %v731_v45 }
 0x1b1   : > { %v695_v50 = vpop.f32.mrf.mxu0  ;;  %v1580_v7 = vpop.f32.mrf.mxu1 }
 0x1b2   : > { %v1234_v53 = vmax.f32 %v1076_v54, 0.0  ;;  %1308 = vst.msk [vmem:[%s2196_s19 + $0x188] sm:$0xff] %vm1258_vm0, %v1243_v63  ;;  %v1242_v3 = vmax.f32 %v1116_v0, 0.0  ;;  %v696_v21 = vadd.f32 %v2185_v47, %v695_v50  ;;  %v1131_v62 = vadd.f32 %v1580_v7, %v746_v9 }
 0x1b3   : > { %v697_v4 = vpop.f32.mrf.mxu0  ;;  %v1125_v55 = vpop.f32.mrf.mxu1  ;;  %v781_v0 = vadd.f32 %v2185_v47, %v2160_v26 }
 0x1b4   : > { %1299 = vst.msk [vmem:[%s2196_s19 + $0x140] sm:$0xff] %vm1258_vm0, %v1234_v53  ;;  %1307 = vst.msk [vmem:[%s2196_s19 + $0x180] sm:$0xff] %vm1258_vm0, %v1242_v3  ;;  %v1081_v58 = vadd.f32 %v1565_v11, %v696_v21  ;;  %v1245_v17 = vmax.f32 %v1131_v62, 0.0  ;;  %v1126_v12 = vadd.f32 %v1125_v55, %v741_v52  ;;  %v766_v11 = vadd.f32 %v2185_v47, %v2148_v14 }
 0x1b5   : > { %v700_v39 = vpop.f32.mrf.mxu0  ;;  %v1583_v16 = vpop.f32.mrf.mxu1 }
 0x1b6   : > { %v1235_v19 = vmax.f32 %v1081_v58, 0.0  ;;  %1310 = vst.msk [vmem:[%s2196_s19 + $0x198] sm:$0xff] %vm1258_vm0, %v1245_v17  ;;  %v1244_v61 = vmax.f32 %v1126_v12, 0.0  ;;  %v701_v6 = vadd.f32 %v2185_v47, %v700_v39  ;;  %v1141_v23 = vadd.f32 %v1583_v16, %v756_v49 }
 0x1b7   : > { %v702_v20 = vpop.f32.mrf.mxu0  ;;  %v1135_v25 = vpop.f32.mrf.mxu1  ;;  %v791_v49 = vadd.f32 %v2185_v47, %v2168_v34 }
 0x1b8   : > { %1300 = vst.msk [vmem:[%s2196_s19 + $0x148] sm:$0xff] %vm1258_vm0, %v1235_v19  ;;  %1309 = vst.msk [vmem:[%s2196_s19 + $0x190] sm:$0xff] %vm1258_vm0, %v1244_v61  ;;  %v1086_v2 = vadd.f32 %v1085_v57, %v701_v6  ;;  %v1247_v27 = vmax.f32 %v1141_v23, 0.0  ;;  %v1136_v28 = vadd.f32 %v1135_v25, %v751_v15  ;;  %v776_v57 = vadd.f32 %v2185_v47, %v2156_v22 }
 0x1b9   : > { %v705_v32 = vpop.f32.mrf.mxu0  ;;  %v1586_v59 = vpop.f32.mrf.mxu1  ;;  %v801_v23 = vadd.f32 %v2185_v47, %v2176_v42 }
 0x1ba   : > { %v1236_v5 = vmax.f32 %v1086_v2, 0.0  ;;  %1312 = vst.msk [vmem:[%s2196_s19 + $0x1a8] sm:$0xff] %vm1258_vm0, %v1247_v27  ;;  %v1246_v40 = vmax.f32 %v1136_v28, 0.0  ;;  %v706_v14 = vadd.f32 %v2185_v47, %v705_v32  ;;  %v1151_v33 = vadd.f32 %v1586_v59, %v766_v11 }
 0x1bb   : > { %v707_v36 = vpop.f32.mrf.mxu0  ;;  %v1145_v43 = vpop.f32.mrf.mxu1 }
 0x1bc   : > { %1301 = vst.msk [vmem:[%s2196_s19 + $0x150] sm:$0xff] %vm1258_vm0, %v1236_v5  ;;  %1311 = vst.msk [vmem:[%s2196_s19 + $0x1a0] sm:$0xff] %vm1258_vm0, %v1246_v40  ;;  %v1091_v10 = vadd.f32 %v2332_v29, %v706_v14  ;;  %v1249_v44 = vmax.f32 %v1151_v33, 0.0  ;;  %v1146_v48 = vadd.f32 %v1145_v43, %v761_v31  ;;  %v786_v29 = vadd.f32 %v2185_v47, %v2164_v30 }
 0x1bd   : > { %v710_v45 = vpop.f32.mrf.mxu0  ;;  %v1589_v51 = vpop.f32.mrf.mxu1 }
 0x1be   : > { %v1237_v13 = vmax.f32 %v1091_v10, 0.0  ;;  %1314 = vst.msk [vmem:[%s2196_s19 + $0x1b8] sm:$0xff] %vm1258_vm0, %v1249_v44  ;;  %v1248_v22 = vmax.f32 %v1146_v48, 0.0  ;;  %v711_v56 = vadd.f32 %v2185_v47, %v710_v45  ;;  %v1161_v41 = vadd.f32 %v1589_v51, %v776_v57 }
 0x1bf   : > { %v712_v60 = vpop.f32.mrf.mxu0  ;;  %v1155_v9 = vpop.f32.mrf.mxu1 }
 0x1c0   : > { %1302 = vst.msk [vmem:[%s2196_s19 + $0x158] sm:$0xff] %vm1258_vm0, %v1237_v13  ;;  %1313 = vst.msk [vmem:[%s2196_s19 + $0x1b0] sm:$0xff] %vm1258_vm0, %v1248_v22  ;;  %v1096_v18 = vadd.f32 %v2340_v37, %v711_v56  ;;  %v1251_v54 = vmax.f32 %v1161_v41, 0.0  ;;  %v1156_v63 = vadd.f32 %v1155_v9, %v771_v24  ;;  %v796_v37 = vadd.f32 %v2185_v47, %v2172_v38 }
 0x1c1   : > { %v715_v52 = vpop.f32.mrf.mxu0  ;;  %v1592_v50 = vpop.f32.mrf.mxu1 }
 0x1c2   : > { %v1238_v7 = vmax.f32 %v1096_v18, 0.0  ;;  %1316 = vst.msk [vmem:[%s2196_s19 + $0x1c8] sm:$0xff] %vm1258_vm0, %v1251_v54  ;;  %v1250_v30 = vmax.f32 %v1156_v63, 0.0  ;;  %v716_v53 = vadd.f32 %v2185_v47, %v715_v52  ;;  %v1171_v3 = vadd.f32 %v1592_v50, %v786_v29 }
 0x1c3   : > { %v717_v21 = vpop.f32.mrf.mxu0  ;;  %v1165_v62 = vpop.f32.mrf.mxu1 }
 0x1c4   : > { %1303 = vst.msk [vmem:[%s2196_s19 + $0x160] sm:$0xff] %vm1258_vm0, %v1238_v7  ;;  %1315 = vst.msk [vmem:[%s2196_s19 + $0x1c0] sm:$0xff] %vm1258_vm0, %v1250_v30  ;;  %v1101_v26 = vadd.f32 %v2337_v8, %v716_v53  ;;  %v1253_v4 = vmax.f32 %v1171_v3, 0.0  ;;  %v1166_v55 = vadd.f32 %v1165_v62, %v781_v0  ;;  %v806_v8 = vadd.f32 %v2185_v47, %v2180_v46 }
 0x1c5   : > { %v720_v58 = vpop.f32.mrf.mxu0  ;;  %v1595_v17 = vpop.f32.mrf.mxu1 }
 0x1c6   : > { %v1239_v12 = vmax.f32 %v1101_v26, 0.0  ;;  %1318 = vst.msk [vmem:[%s2196_s19 + $0x1d8] sm:$0xff] %vm1258_vm0, %v1253_v4  ;;  %v1252_v38 = vmax.f32 %v1166_v55, 0.0  ;;  %v721_v15 = vadd.f32 %v2185_v47, %v720_v58  ;;  %v1181_v39 = vadd.f32 %v1595_v17, %v796_v37 }
 0x1c7   : > { %v722_v16 = vpop.f32.mrf.mxu0  ;;  %v1175_v19 = vpop.f32.mrf.mxu1 }
 0x1c8   : > { %1304 = vst.msk [vmem:[%s2196_s19 + $0x168] sm:$0xff] %vm1258_vm0, %v1239_v12  ;;  %1317 = vst.msk [vmem:[%s2196_s19 + $0x1d0] sm:$0xff] %vm1258_vm0, %v1252_v38  ;;  %v1106_v34 = vadd.f32 %v2347_v1, %v721_v15  ;;  %v1255_v61 = vmax.f32 %v1181_v39, 0.0  ;;  %v1176_v6 = vadd.f32 %v1175_v19, %v791_v49 }
 0x1c9   : > { %v725_v20 = vpop.f32.mrf.mxu0  ;;  %v1598_v25 = vpop.f32.mrf.mxu1 }
 0x1ca   : > { %v1240_v11 = vmax.f32 %v1106_v34, 0.0  ;;  %1320 = vst.msk [vmem:[%s2196_s19 + $0x1e8] sm:$0xff] %vm1258_vm0, %v1255_v61  ;;  %v1254_v46 = vmax.f32 %v1176_v6, 0.0  ;;  %v726_v2 = vadd.f32 %v2185_v47, %v725_v20  ;;  %v1191_v27 = vadd.f32 %v1598_v25, %v806_v8 }
 0x1cb   : > { %v727_v28 = vpop.f32.mrf.mxu0  ;;  %v1185_v31 = vpop.f32.mrf.mxu1 }
 0x1cc   : > { %1305 = vst.msk [vmem:[%s2196_s19 + $0x170] sm:$0xff] %vm1258_vm0, %v1240_v11  ;;  %1319 = vst.msk [vmem:[%s2196_s19 + $0x1e0] sm:$0xff] %vm1258_vm0, %v1254_v46  ;;  %v1111_v42 = vadd.f32 %v2344_v35, %v726_v2  ;;  %v1257_v1 = vmax.f32 %v1191_v27, 0.0  ;;  %v1186_v32 = vadd.f32 %v1185_v31, %v801_v23 }
 0x1ce   : > { %v1241_v59 = vmax.f32 %v1111_v42, 0.0  ;;  %1322 = vst.msk [vmem:[%s2196_s19 + $0x1f8] sm:$0xff] %vm1258_vm0, %v1257_v1  ;;  %v1256_v5 = vmax.f32 %v1186_v32, 0.0 }
 0x1d0   : > { %1306 = vst.msk [vmem:[%s2196_s19 + $0x178] sm:$0xff] %vm1258_vm0, %v1241_v59  ;;  %1321 = vst.msk [vmem:[%s2196_s19 + $0x1f0] sm:$0xff] %vm1258_vm0, %v1256_v5 }
 0x1d1 PF: > { %s13_s12 = sadd.s32 1, %s1679_s12  }
 0x1d2   : > { %p10_p4 = scmp.ge.s32.totalorder %s13_s12, 5  }
 0x1d4   :  { %12 = sbr.rel (!%p10_p4) target bundleno = 1 (0x1), region = 62 }

// kernel: reference_encoder_forward.10
= control target key start
LH: loop header
LB: loop body
LE: loop exit
PB: predicated region body
PF: predicated region fallthrough
CT: control target
= control target key end

     0   :  { %v1018_v0 = vmov 0.0   ;;  %vm759_vm0 = vcmask 523264   ;;  %s1845_s1 = inlined_call_operand.vmem [shape: f32[384,64], index: 1, kind: input, shape index: {}]   ;;  %s1846_s0 = inlined_call_operand.vmem [shape: f32[320,384], index: 0, kind: input, shape index: {}]   ;;  %s1847_s2 = inlined_call_operand.vmem [shape: f32[1,64], index: 2, kind: input, shape index: {}]   ;;  %s1848_s3 = inlined_call_operand.vmem [shape: f32[320,64], index: 3, kind: output, shape index: {}]  }
   0x1   :  { %189 = vmatprep.subr.mxu0 %v1018_v0  ;;  %953 = vmatprep.subr.mxu1 %v1018_v0  ;;  %v149_v1 = vld [vmem:[%s1845_s1 + $0x78] sm:$0xff]  ;;  %v148_v2 = vld [vmem:[%s1845_s1 + $0x70] sm:$0xff]  ;;  %v147_v3 = vld [vmem:[%s1845_s1 + $0x68] sm:$0xff] }
   0x2   :  { %190 = vmatpush1.msra.mxu0 %v149_v1  ;;  %985 = vmatpush1.msra.mxu1 %v149_v1  ;;  %v146_v4 = vld [vmem:[%s1845_s1 + $0x60] sm:$0xff]  ;;  %v145_v5 = vld [vmem:[%s1845_s1 + $0x58] sm:$0xff]  ;;  %v144_v6 = vld [vmem:[%s1845_s1 + $0x50] sm:$0xff] }
   0x3   :  { %191 = vmatprep.subr.mxu0 %v1018_v0  ;;  %954 = vmatprep.subr.mxu1 %v1018_v0  ;;  %v143_v7 = vld [vmem:[%s1845_s1 + $0x48] sm:$0xff]  ;;  %v142_v8 = vld [vmem:[%s1845_s1 + $0x40] sm:$0xff]  ;;  %v141_v9 = vld [vmem:[%s1845_s1 + $0x38] sm:$0xff] }
   0x4   :  { %192 = vmatpush1.msra.mxu0 %v148_v2  ;;  %986 = vmatpush1.msra.mxu1 %v148_v2  ;;  %v140_v10 = vld [vmem:[%s1845_s1 + $0x30] sm:$0xff]  ;;  %v139_v11 = vld [vmem:[%s1845_s1 + $0x28] sm:$0xff]  ;;  %v138_v12 = vld [vmem:[%s1845_s1 + $0x20] sm:$0xff] }
   0x5   :  { %193 = vmatprep.subr.mxu0 %v1018_v0  ;;  %955 = vmatprep.subr.mxu1 %v1018_v0  ;;  %v137_v13 = vld [vmem:[%s1845_s1 + $0x18] sm:$0xff]  ;;  %v136_v14 = vld [vmem:[%s1845_s1 + $0x10] sm:$0xff]  ;;  %v135_v15 = vld [vmem:[%s1845_s1 + $0x8] sm:$0xff] }
   0x6   :  { %194 = vmatpush1.msra.mxu0 %v147_v3  ;;  %987 = vmatpush1.msra.mxu1 %v147_v3  ;;  %v134_v16 = vld [vmem:[%s1845_s1] sm:$0xff]  ;;  %v165_v17 = vld [vmem:[%s1845_s1 + $0xf8] sm:$0xff]  ;;  %v164_v18 = vld [vmem:[%s1845_s1 + $0xf0] sm:$0xff] }
   0x7   :  { %195 = vmatprep.subr.mxu0 %v1018_v0  ;;  %956 = vmatprep.subr.mxu1 %v1018_v0  ;;  %v163_v19 = vld [vmem:[%s1845_s1 + $0xe8] sm:$0xff]  ;;  %v162_v20 = vld [vmem:[%s1845_s1 + $0xe0] sm:$0xff]  ;;  %v161_v21 = vld [vmem:[%s1845_s1 + $0xd8] sm:$0xff] }
   0x8   :  { %196 = vmatpush1.msra.mxu0 %v146_v4  ;;  %988 = vmatpush1.msra.mxu1 %v146_v4  ;;  %v160_v22 = vld [vmem:[%s1845_s1 + $0xd0] sm:$0xff]  ;;  %v159_v23 = vld [vmem:[%s1845_s1 + $0xc8] sm:$0xff]  ;;  %v158_v24 = vld [vmem:[%s1845_s1 + $0xc0] sm:$0xff] }
   0x9   :  { %197 = vmatprep.subr.mxu0 %v1018_v0  ;;  %957 = vmatprep.subr.mxu1 %v1018_v0  ;;  %v157_v25 = vld [vmem:[%s1845_s1 + $0xb8] sm:$0xff]  ;;  %v156_v26 = vld [vmem:[%s1845_s1 + $0xb0] sm:$0xff]  ;;  %v155_v27 = vld [vmem:[%s1845_s1 + $0xa8] sm:$0xff] }
   0xa   :  { %198 = vmatpush1.msra.mxu0 %v145_v5  ;;  %989 = vmatpush1.msra.mxu1 %v145_v5  ;;  %v154_v28 = vld [vmem:[%s1845_s1 + $0xa0] sm:$0xff]  ;;  %v153_v29 = vld [vmem:[%s1845_s1 + $0x98] sm:$0xff]  ;;  %v152_v30 = vld [vmem:[%s1845_s1 + $0x90] sm:$0xff] }
   0xb   :  { %199 = vmatprep.subr.mxu0 %v1018_v0  ;;  %958 = vmatprep.subr.mxu1 %v1018_v0  ;;  %v151_v31 = vld [vmem:[%s1845_s1 + $0x88] sm:$0xff]  ;;  %v150_v32 = vld [vmem:[%s1845_s1 + $0x80] sm:$0xff]  ;;  %v105_v34 = vld [vmem:[%s1846_s0 + $0x2d8] sm:$0xff] }
   0xc   :  { %200 = vmatpush1.msra.mxu0 %v144_v6  ;;  %990 = vmatpush1.msra.mxu1 %v144_v6  ;;  %v15_v33 = vld [vmem:[%s1846_s0 + $0x8] sm:$0xff]  ;;  %v14_v35 = vld [vmem:[%s1846_s0] sm:$0xff]  ;;  %v104_v36 = vld [vmem:[%s1846_s0 + $0x2d0] sm:$0xff] }
   0xd   :  { %201 = vmatprep.subr.mxu0 %v1018_v0  ;;  %959 = vmatprep.subr.mxu1 %v1018_v0  ;;  %v181_v37 = vld [vmem:[%s1845_s1 + $0x178] sm:$0xff]  ;;  %v18_v38 = vld [vmem:[%s1846_s0 + $0x20] sm:$0xff]  ;;  %v108_v39 = vld [vmem:[%s1846_s0 + $0x2f0] sm:$0xff] }
   0xe   :  { %202 = vmatpush1.msra.mxu0 %v143_v7  ;;  %991 = vmatpush1.msra.mxu1 %v143_v7  ;;  %v180_v40 = vld [vmem:[%s1845_s1 + $0x170] sm:$0xff]  ;;  %v17_v41 = vld [vmem:[%s1846_s0 + $0x18] sm:$0xff]  ;;  %v107_v42 = vld [vmem:[%s1846_s0 + $0x2e8] sm:$0xff] }
   0xf   :  { %203 = vmatprep.subr.mxu0 %v1018_v0  ;;  %960 = vmatprep.subr.mxu1 %v1018_v0  ;;  %v21_v43 = vld [vmem:[%s1846_s0 + $0x38] sm:$0xff]  ;;  %v179_v44 = vld [vmem:[%s1845_s1 + $0x168] sm:$0xff]  ;;  %v20_v46 = vld [vmem:[%s1846_s0 + $0x30] sm:$0xff] }
  0x10   :  { %204 = vmatpush1.msra.mxu0 %v142_v8  ;;  %992 = vmatpush1.msra.mxu1 %v142_v8  ;;  %v111_v45 = vld [vmem:[%s1846_s0 + $0x308] sm:$0xff]  ;;  %v110_v47 = vld [vmem:[%s1846_s0 + $0x300] sm:$0xff]  ;;  %v24_v49 = vld [vmem:[%s1846_s0 + $0x50] sm:$0xff] }
  0x11   :  { %205 = vmatprep.subr.mxu0 %v1018_v0  ;;  %961 = vmatprep.subr.mxu1 %v1018_v0  ;;  %v178_v48 = vld [vmem:[%s1845_s1 + $0x160] sm:$0xff]  ;;  %v177_v51 = vld [vmem:[%s1845_s1 + $0x158] sm:$0xff]  ;;  %v23_v52 = vld [vmem:[%s1846_s0 + $0x48] sm:$0xff] }
  0x12   :  { %206 = vmatpush1.msra.mxu0 %v141_v9  ;;  %993 = vmatpush1.msra.mxu1 %v141_v9  ;;  %v114_v50 = vld [vmem:[%s1846_s0 + $0x320] sm:$0xff]  ;;  %v113_v53 = vld [vmem:[%s1846_s0 + $0x318] sm:$0xff]  ;;  %v176_v54 = vld [vmem:[%s1845_s1 + $0x150] sm:$0xff] }
  0x13   :  { %207 = vmatprep.subr.mxu0 %v1018_v0  ;;  %962 = vmatprep.subr.mxu1 %v1018_v0  ;;  %v27_v55 = vld [vmem:[%s1846_s0 + $0x68] sm:$0xff]  ;;  %v117_v56 = vld [vmem:[%s1846_s0 + $0x338] sm:$0xff]  ;;  %v26_v58 = vld [vmem:[%s1846_s0 + $0x60] sm:$0xff] }
  0x14   :  { %208 = vmatpush1.msra.mxu0 %v140_v10  ;;  %994 = vmatpush1.msra.mxu1 %v140_v10  ;;  %v175_v57 = vld [vmem:[%s1845_s1 + $0x148] sm:$0xff]  ;;  %v116_v59 = vld [vmem:[%s1846_s0 + $0x330] sm:$0xff]  ;;  %v174_v60 = vld [vmem:[%s1845_s1 + $0x140] sm:$0xff] }
  0x15   :  { %209 = vmatprep.subr.mxu0 %v1018_v0  ;;  %963 = vmatprep.subr.mxu1 %v1018_v0  ;;  %v30_v61 = vld [vmem:[%s1846_s0 + $0x80] sm:$0xff]  ;;  %v120_v62 = vld [vmem:[%s1846_s0 + $0x350] sm:$0xff]  ;;  %v29_v63 = vld [vmem:[%s1846_s0 + $0x78] sm:$0xff] }
  0x16   :  { %210 = vmatpush1.msra.mxu0 %v139_v11  ;;  %995 = vmatpush1.msra.mxu1 %v139_v11  ;;  %v119_v1 = vld [vmem:[%s1846_s0 + $0x348] sm:$0xff]  ;;  %v33_v2 = vld [vmem:[%s1846_s0 + $0x98] sm:$0xff]  ;;  %v172_v4 = vld [vmem:[%s1845_s1 + $0x130] sm:$0xff] }
  0x17   :  { %211 = vmatprep.subr.mxu0 %v1018_v0  ;;  %964 = vmatprep.subr.mxu1 %v1018_v0  ;;  %v123_v3 = vld [vmem:[%s1846_s0 + $0x368] sm:$0xff]  ;;  %v32_v5 = vld [vmem:[%s1846_s0 + $0x90] sm:$0xff]  ;;  %v122_v6 = vld [vmem:[%s1846_s0 + $0x360] sm:$0xff] }
  0x18   :  { %212 = vmatpush1.msra.mxu0 %v138_v12  ;;  %996 = vmatpush1.msra.mxu1 %v138_v12  ;;  %v171_v7 = vld [vmem:[%s1845_s1 + $0x128] sm:$0xff]  ;;  %v36_v8 = vld [vmem:[%s1846_s0 + $0xb0] sm:$0xff]  ;;  %v126_v9 = vld [vmem:[%s1846_s0 + $0x380] sm:$0xff] }
  0x19   :  { %213 = vmatprep.subr.mxu0 %v1018_v0  ;;  %965 = vmatprep.subr.mxu1 %v1018_v0  ;;  %v170_v10 = vld [vmem:[%s1845_s1 + $0x120] sm:$0xff]  ;;  %v35_v11 = vld [vmem:[%s1846_s0 + $0xa8] sm:$0xff]  ;;  %v125_v12 = vld [vmem:[%s1846_s0 + $0x378] sm:$0xff] }
  0x1a   :  { %214 = vmatpush1.msra.mxu0 %v137_v13  ;;  %997 = vmatpush1.msra.mxu1 %v137_v13  ;;  %v169_v13 = vld [vmem:[%s1845_s1 + $0x118] sm:$0xff] }
  0x1b   :  { %215 = vmatprep.subr.mxu0 %v1018_v0  ;;  %966 = vmatprep.subr.mxu1 %v1018_v0 }
  0x1c   :  { %216 = vmatpush1.msra.mxu0 %v136_v14  ;;  %998 = vmatpush1.msra.mxu1 %v136_v14  ;;  %v39_v14 = vld [vmem:[%s1846_s0 + $0xc8] sm:$0xff] }
  0x1d   :  { %217 = vmatprep.subr.mxu0 %v1018_v0  ;;  %967 = vmatprep.subr.mxu1 %v1018_v0 }
  0x1e   :  { %218 = vmatpush1.msra.mxu0 %v135_v15  ;;  %999 = vmatpush1.msra.mxu1 %v135_v15  ;;  %v129_v15 = vld [vmem:[%s1846_s0 + $0x398] sm:$0xff] }
  0x1f   :  { %219 = vmatprep.subr.mxu0 %v1018_v0  ;;  %968 = vmatprep.subr.mxu1 %v1018_v0 }
  0x20   :  { %220 = vmatpush1.msra.mxu0 %v134_v16  ;;  %1000 = vmatpush1.msra.mxu1 %v134_v16  ;;  %v38_v16 = vld [vmem:[%s1846_s0 + $0xc0] sm:$0xff] }
  0x21   :  { %221 = vmatprep.subr.mxu0 %v1018_v0  ;;  %969 = vmatprep.subr.mxu1 %v1018_v0 }
  0x22   :  { %222 = vmatpush2.msra.mxu0 %v165_v17  ;;  %1001 = vmatpush2.msra.mxu1 %v165_v17  ;;  %v168_v17 = vld [vmem:[%s1845_s1 + $0x110] sm:$0xff] }
  0x23   :  { %223 = vmatprep.subr.mxu0 %v1018_v0  ;;  %970 = vmatprep.subr.mxu1 %v1018_v0 }
  0x24   :  { %224 = vmatpush2.msra.mxu0 %v164_v18  ;;  %1002 = vmatpush2.msra.mxu1 %v164_v18  ;;  %v128_v18 = vld [vmem:[%s1846_s0 + $0x390] sm:$0xff] }
  0x25   :  { %225 = vmatprep.subr.mxu0 %v1018_v0  ;;  %971 = vmatprep.subr.mxu1 %v1018_v0 }
  0x26   :  { %226 = vmatpush2.msra.mxu0 %v163_v19  ;;  %1003 = vmatpush2.msra.mxu1 %v163_v19  ;;  %v42_v19 = vld [vmem:[%s1846_s0 + $0xe0] sm:$0xff] }
  0x27   :  { %227 = vmatprep.subr.mxu0 %v1018_v0  ;;  %972 = vmatprep.subr.mxu1 %v1018_v0 }
  0x28   :  { %228 = vmatpush2.msra.mxu0 %v162_v20  ;;  %1004 = vmatpush2.msra.mxu1 %v162_v20  ;;  %v132_v20 = vld [vmem:[%s1846_s0 + $0x3b0] sm:$0xff] }
  0x29   :  { %229 = vmatprep.subr.mxu0 %v1018_v0  ;;  %973 = vmatprep.subr.mxu1 %v1018_v0 }
  0x2a   :  { %230 = vmatpush2.msra.mxu0 %v161_v21  ;;  %1005 = vmatpush2.msra.mxu1 %v161_v21  ;;  %v167_v21 = vld [vmem:[%s1845_s1 + $0x108] sm:$0xff] }
  0x2b   :  { %231 = vmatprep.subr.mxu0 %v1018_v0  ;;  %974 = vmatprep.subr.mxu1 %v1018_v0 }
  0x2c   :  { %232 = vmatpush2.msra.mxu0 %v160_v22  ;;  %1006 = vmatpush2.msra.mxu1 %v160_v22  ;;  %v41_v22 = vld [vmem:[%s1846_s0 + $0xd8] sm:$0xff] }
  0x2d   :  { %233 = vmatprep.subr.mxu0 %v1018_v0  ;;  %975 = vmatprep.subr.mxu1 %v1018_v0 }
  0x2e   :  { %234 = vmatpush2.msra.mxu0 %v159_v23  ;;  %1007 = vmatpush2.msra.mxu1 %v159_v23  ;;  %v131_v23 = vld [vmem:[%s1846_s0 + $0x3a8] sm:$0xff] }
  0x2f   :  { %235 = vmatprep.subr.mxu0 %v1018_v0  ;;  %976 = vmatprep.subr.mxu1 %v1018_v0 }
  0x30   :  { %236 = vmatpush2.msra.mxu0 %v158_v24  ;;  %1008 = vmatpush2.msra.mxu1 %v158_v24  ;;  %v166_v24 = vld [vmem:[%s1845_s1 + $0x100] sm:$0xff] }
  0x31   :  { %237 = vmatprep.subr.mxu0 %v1018_v0  ;;  %977 = vmatprep.subr.mxu1 %v1018_v0 }
  0x32   :  { %238 = vmatpush2.msra.mxu0 %v157_v25  ;;  %1009 = vmatpush2.msra.mxu1 %v157_v25  ;;  %v45_v25 = vld [vmem:[%s1846_s0 + $0xf8] sm:$0xff] }
  0x33   :  { %239 = vmatprep.subr.mxu0 %v1018_v0  ;;  %978 = vmatprep.subr.mxu1 %v1018_v0 }
  0x34   :  { %240 = vmatpush2.msra.mxu0 %v156_v26  ;;  %1010 = vmatpush2.msra.mxu1 %v156_v26  ;;  %v16_v26 = vld [vmem:[%s1846_s0 + $0x10] sm:$0xff] }
  0x35   :  { %241 = vmatprep.subr.mxu0 %v1018_v0  ;;  %979 = vmatprep.subr.mxu1 %v1018_v0 }
  0x36   :  { %242 = vmatpush2.msra.mxu0 %v155_v27  ;;  %1011 = vmatpush2.msra.mxu1 %v155_v27  ;;  %v44_v27 = vld [vmem:[%s1846_s0 + $0xf0] sm:$0xff] }
  0x37   :  { %243 = vmatprep.subr.mxu0 %v1018_v0  ;;  %980 = vmatprep.subr.mxu1 %v1018_v0 }
  0x38   :  { %244 = vmatpush2.msra.mxu0 %v154_v28  ;;  %1012 = vmatpush2.msra.mxu1 %v154_v28  ;;  %v19_v28 = vld [vmem:[%s1846_s0 + $0x28] sm:$0xff] }
  0x39   :  { %245 = vmatprep.subr.mxu0 %v1018_v0  ;;  %981 = vmatprep.subr.mxu1 %v1018_v0 }
  0x3a   :  { %246 = vmatpush2.msra.mxu0 %v153_v29  ;;  %1013 = vmatpush2.msra.mxu1 %v153_v29  ;;  %v48_v29 = vld [vmem:[%s1846_s0 + $0x110] sm:$0xff] }
  0x3b   :  { %247 = vmatprep.subr.mxu0 %v1018_v0  ;;  %982 = vmatprep.subr.mxu1 %v1018_v0 }
  0x3c   :  { %248 = vmatpush2.msra.mxu0 %v152_v30  ;;  %1014 = vmatpush2.msra.mxu1 %v152_v30  ;;  %v22_v30 = vld [vmem:[%s1846_s0 + $0x40] sm:$0xff] }
  0x3d   :  { %249 = vmatprep.subr.mxu0 %v1018_v0  ;;  %983 = vmatprep.subr.mxu1 %v1018_v0 }
  0x3e   :  { %250 = vmatpush2.msra.mxu0 %v151_v31  ;;  %1015 = vmatpush2.msra.mxu1 %v151_v31  ;;  %v47_v31 = vld [vmem:[%s1846_s0 + $0x108] sm:$0xff] }
  0x3f   :  { %251 = vmatprep.subr.mxu0 %v1018_v0  ;;  %984 = vmatprep.subr.mxu1 %v1018_v0  ;;  %v173_v0 = vld [vmem:[%s1845_s1 + $0x138] sm:$0xff] }
  0x40   :  { %252 = vmatpush2.msra.mxu0 %v150_v32  ;;  %1016 = vmatpush2.msra.mxu1 %v150_v32  ;;  %v25_v32 = vld [vmem:[%s1846_s0 + $0x58] sm:$0xff] }
  0x41   :  { %253 = vmatprep.mubr.f32.mxu0 %v15_v33  ;;  %403 = vmatprep.mubr.f32.mxu1 %v105_v34  ;;  %v51_v33 = vld [vmem:[%s1846_s0 + $0x128] sm:$0xff]  ;;  %v28_v34 = vld [vmem:[%s1846_s0 + $0x70] sm:$0xff] }
  0x42   :  { %254 = vmatmul.mubr.f32.vlgmr.msra.gmra.mxu0 %v14_v35  ;;  %404 = vmatmul.mubr.f32.vlgmr.msra.gmra.mxu1 %v104_v36  ;;  %v50_v35 = vld [vmem:[%s1846_s0 + $0x120] sm:$0xff]  ;;  %v31_v36 = vld [vmem:[%s1846_s0 + $0x88] sm:$0xff] }
  0x43   :  { %861 = vmatprep.subr.mxu1 %v181_v37  ;;  %258 = vmatprep.mubr.f32.mxu0 %v18_v38  ;;  %v34_v38 = vld [vmem:[%s1846_s0 + $0xa0] sm:$0xff] }
  0x44   :  { %862 = vmatpush3.msra.mxu1 %v181_v37  ;;  %408 = vmatprep.mubr.f32.mxu1 %v108_v39  ;;  %v54_v37 = vld [vmem:[%s1846_s0 + $0x140] sm:$0xff]  ;;  %v53_v39 = vld [vmem:[%s1846_s0 + $0x138] sm:$0xff] }
  0x45   :  { %863 = vmatprep.subr.mxu1 %v180_v40 }
  0x46   :  { %259 = vmatmul.mubr.f32.gmra.mxu0 %v17_v41  ;;  %409 = vmatmul.mubr.f32.gmra.mxu1 %v107_v42  ;;  %v57_v41 = vld [vmem:[%s1846_s0 + $0x158] sm:$0xff]  ;;  %v40_v42 = vld [vmem:[%s1846_s0 + $0xd0] sm:$0xff] }
  0x47   :  { %864 = vmatpush3.msra.mxu1 %v180_v40  ;;  %263 = vmatprep.mubr.f32.mxu0 %v21_v43  ;;  %v37_v40 = vld [vmem:[%s1846_s0 + $0xb8] sm:$0xff]  ;;  %v56_v43 = vld [vmem:[%s1846_s0 + $0x150] sm:$0xff] }
  0x48   :  { %865 = vmatprep.subr.mxu1 %v179_v44  ;;  %413 = vmatprep.mubr.f32.mxu1 %v111_v45  ;;  %v60_v45 = vld [vmem:[%s1846_s0 + $0x170] sm:$0xff] }
  0x49   :  { %866 = vmatpush3.msra.mxu1 %v179_v44  ;;  %v43_v44 = vld [vmem:[%s1846_s0 + $0xe8] sm:$0xff] }
  0x4a   :  { %264 = vmatmul.mubr.f32.gmra.mxu0 %v20_v46  ;;  %414 = vmatmul.mubr.f32.gmra.mxu1 %v110_v47  ;;  %v46_v46 = vld [vmem:[%s1846_s0 + $0x100] sm:$0xff]  ;;  %v59_v47 = vld [vmem:[%s1846_s0 + $0x168] sm:$0xff] }
  0x4b   :  { %867 = vmatprep.subr.mxu1 %v178_v48  ;;  %268 = vmatprep.mubr.f32.mxu0 %v24_v49  ;;  %v63_v49 = vld [vmem:[%s1846_s0 + $0x188] sm:$0xff] }
  0x4c   :  { %868 = vmatpush3.msra.mxu1 %v178_v48  ;;  %418 = vmatprep.mubr.f32.mxu1 %v114_v50  ;;  %v49_v48 = vld [vmem:[%s1846_s0 + $0x118] sm:$0xff]  ;;  %v52_v50 = vld [vmem:[%s1846_s0 + $0x130] sm:$0xff] }
  0x4d   :  { %869 = vmatprep.subr.mxu1 %v177_v51 }
  0x4e   :  { %870 = vmatpush3.msra.mxu1 %v177_v51  ;;  %269 = vmatmul.mubr.f32.gmra.mxu0 %v23_v52  ;;  %v62_v51 = vld [vmem:[%s1846_s0 + $0x180] sm:$0xff]  ;;  %v55_v52 = vld [vmem:[%s1846_s0 + $0x148] sm:$0xff] }
  0x4f   :  { %419 = vmatmul.mubr.f32.gmra.mxu1 %v113_v53  ;;  %871 = vmatprep.subr.mxu1 %v176_v54  ;;  %v66_v53 = vld [vmem:[%s1846_s0 + $0x1a0] sm:$0xff] }
  0x50   :  { %872 = vmatpush3.msra.mxu1 %v176_v54  ;;  %273 = vmatprep.mubr.f32.mxu0 %v27_v55  ;;  %v58_v54 = vld [vmem:[%s1846_s0 + $0x160] sm:$0xff]  ;;  %v65_v55 = vld [vmem:[%s1846_s0 + $0x198] sm:$0xff] }
  0x51   :  { %423 = vmatprep.mubr.f32.mxu1 %v117_v56  ;;  %873 = vmatprep.subr.mxu1 %v175_v57  ;;  %v61_v56 = vld [vmem:[%s1846_s0 + $0x178] sm:$0xff] }
  0x52   :  { %274 = vmatmul.mubr.f32.gmra.mxu0 %v26_v58  ;;  %874 = vmatpush3.msra.mxu1 %v175_v57  ;;  %v69_v57 = vld [vmem:[%s1846_s0 + $0x1b8] sm:$0xff]  ;;  %v64_v58 = vld [vmem:[%s1846_s0 + $0x190] sm:$0xff] }
  0x53   :  { %424 = vmatmul.mubr.f32.gmra.mxu1 %v116_v59  ;;  %875 = vmatprep.subr.mxu1 %v174_v60  ;;  %v68_v59 = vld [vmem:[%s1846_s0 + $0x1b0] sm:$0xff] }
  0x54   :  { %278 = vmatprep.mubr.f32.mxu0 %v30_v61  ;;  %428 = vmatprep.mubr.f32.mxu1 %v120_v62  ;;  %v72_v61 = vld [vmem:[%s1846_s0 + $0x1d0] sm:$0xff]  ;;  %v70_v62 = vld [vmem:[%s1846_s0 + $0x1c0] sm:$0xff] }
  0x55   :  { %876 = vmatpush3.msra.mxu1 %v174_v60  ;;  %v67_v60 = vld [vmem:[%s1846_s0 + $0x1a8] sm:$0xff] }
  0x56   :  { %279 = vmatmul.mubr.f32.gmra.mxu0 %v29_v63  ;;  %877 = vmatprep.subr.mxu1 %v173_v0  ;;  %v71_v63 = vld [vmem:[%s1846_s0 + $0x1c8] sm:$0xff] }
  0x57   :  { %429 = vmatmul.mubr.f32.gmra.mxu1 %v119_v1  ;;  %283 = vmatprep.mubr.f32.mxu0 %v33_v2  ;;  %v75_v1 = vld [vmem:[%s1846_s0 + $0x1e8] sm:$0xff]  ;;  %v76_v2 = vld [vmem:[%s1846_s0 + $0x1f0] sm:$0xff] }
  0x58   :  { %878 = vmatpush3.msra.mxu1 %v173_v0  ;;  %433 = vmatprep.mubr.f32.mxu1 %v123_v3  ;;  %v73_v0 = vld [vmem:[%s1846_s0 + $0x1d8] sm:$0xff]  ;;  %v74_v3 = vld [vmem:[%s1846_s0 + $0x1e0] sm:$0xff] }
  0x59   :  { %879 = vmatprep.subr.mxu1 %v172_v4 }
  0x5a   :  { %284 = vmatmul.mubr.f32.gmra.mxu0 %v32_v5  ;;  %880 = vmatpush3.msra.mxu1 %v172_v4  ;;  %v79_v4 = vld [vmem:[%s1846_s0 + $0x208] sm:$0xff]  ;;  %v78_v5 = vld [vmem:[%s1846_s0 + $0x200] sm:$0xff] }
  0x5b   :  { %434 = vmatmul.mubr.f32.gmra.mxu1 %v122_v6  ;;  %881 = vmatprep.subr.mxu1 %v171_v7  ;;  %v82_v6 = vld [vmem:[%s1846_s0 + $0x220] sm:$0xff] }
  0x5c   :  { %882 = vmatpush3.msra.mxu1 %v171_v7  ;;  %288 = vmatprep.mubr.f32.mxu0 %v36_v8  ;;  %v77_v7 = vld [vmem:[%s1846_s0 + $0x1f8] sm:$0xff] }
  0x5d   :  { %438 = vmatprep.mubr.f32.mxu1 %v126_v9  ;;  %883 = vmatprep.subr.mxu1 %v170_v10  ;;  %v85_v8 = vld [vmem:[%s1846_s0 + $0x238] sm:$0xff] }
  0x5e   :  { %289 = vmatmul.mubr.f32.gmra.mxu0 %v35_v11  ;;  %884 = vmatpush3.msra.mxu1 %v170_v10  ;;  %v81_v9 = vld [vmem:[%s1846_s0 + $0x218] sm:$0xff]  ;;  %v88_v10 = vld [vmem:[%s1846_s0 + $0x250] sm:$0xff] }
  0x5f   :  { %439 = vmatmul.mubr.f32.gmra.mxu1 %v125_v12  ;;  %885 = vmatprep.subr.mxu1 %v169_v13  ;;  %v80_v11 = vld [vmem:[%s1846_s0 + $0x210] sm:$0xff]  ;;  %v91_v12 = vld [vmem:[%s1846_s0 + $0x268] sm:$0xff] }
  0x60   :  { %293 = vmatprep.mubr.f32.mxu0 %v39_v14  ;;  %443 = vmatprep.mubr.f32.mxu1 %v129_v15  ;;  %v94_v14 = vld [vmem:[%s1846_s0 + $0x280] sm:$0xff]  ;;  %v83_v15 = vld [vmem:[%s1846_s0 + $0x228] sm:$0xff] }
  0x61   :  { %886 = vmatpush3.msra.mxu1 %v169_v13  ;;  %v84_v13 = vld [vmem:[%s1846_s0 + $0x230] sm:$0xff] }
  0x62   :  { %294 = vmatmul.mubr.f32.gmra.mxu0 %v38_v16  ;;  %887 = vmatprep.subr.mxu1 %v168_v17  ;;  %v97_v16 = vld [vmem:[%s1846_s0 + $0x298] sm:$0xff] }
  0x63   :  { %444 = vmatmul.mubr.f32.gmra.mxu1 %v128_v18  ;;  %298 = vmatprep.mubr.f32.mxu0 %v42_v19  ;;  %v100_v18 = vld [vmem:[%s1846_s0 + $0x2b0] sm:$0xff]  ;;  %v86_v19 = vld [vmem:[%s1846_s0 + $0x240] sm:$0xff] }
  0x64   :  { %888 = vmatpush3.msra.mxu1 %v168_v17  ;;  %448 = vmatprep.mubr.f32.mxu1 %v132_v20  ;;  %v87_v17 = vld [vmem:[%s1846_s0 + $0x248] sm:$0xff] }
  0x65   :  { %889 = vmatprep.subr.mxu1 %v167_v21  ;;  %v103_v20 = vld [vmem:[%s1846_s0 + $0x2c8] sm:$0xff] }
  0x66   :  { %299 = vmatmul.mubr.f32.gmra.mxu0 %v41_v22  ;;  %890 = vmatpush3.msra.mxu1 %v167_v21  ;;  %v90_v21 = vld [vmem:[%s1846_s0 + $0x260] sm:$0xff] }
  0x67   :  { %449 = vmatmul.mubr.f32.gmra.mxu1 %v131_v23  ;;  %891 = vmatprep.subr.mxu1 %v166_v24  ;;  %v106_v22 = vld [vmem:[%s1846_s0 + $0x2e0] sm:$0xff]  ;;  %v89_v23 = vld [vmem:[%s1846_s0 + $0x258] sm:$0xff] }
  0x68   :  { %303 = vmatprep.mubr.f32.mxu0 %v45_v25  ;;  %892 = vmatpush3.msra.mxu1 %v166_v24  ;;  %v109_v24 = vld [vmem:[%s1846_s0 + $0x2f8] sm:$0xff] }
  0x69   :  { %893 = vmatprep.mubr.f32.mxu1 %v16_v26  ;;  %v93_v25 = vld [vmem:[%s1846_s0 + $0x278] sm:$0xff]  ;;  %v112_v26 = vld [vmem:[%s1846_s0 + $0x310] sm:$0xff] }
  0x6a   :  { %304 = vmatmul.mubr.f32.gmra.mxu0 %v44_v27  ;;  %v92_v27 = vld [vmem:[%s1846_s0 + $0x270] sm:$0xff] }
  0x6b   :  { %894 = vmatmul.mubr.f32.vlgmr.msra.gmra.mxu1 %v19_v28  ;;  %308 = vmatprep.mubr.f32.mxu0 %v48_v29  ;;  %v115_v28 = vld [vmem:[%s1846_s0 + $0x328] sm:$0xff]  ;;  %v96_v29 = vld [vmem:[%s1846_s0 + $0x290] sm:$0xff] }
  0x6c   :  { %896 = vmatprep.mubr.f32.mxu1 %v22_v30  ;;  %v118_v30 = vld [vmem:[%s1846_s0 + $0x340] sm:$0xff] }
  0x6e   :  { %309 = vmatmul.mubr.f32.gmra.mxu0 %v47_v31  ;;  %v95_v31 = vld [vmem:[%s1846_s0 + $0x288] sm:$0xff] }
  0x6f   :  { %897 = vmatmul.mubr.f32.gmra.mxu1 %v25_v32  ;;  %313 = vmatprep.mubr.f32.mxu0 %v51_v33  ;;  %v121_v32 = vld [vmem:[%s1846_s0 + $0x358] sm:$0xff]  ;;  %v99_v33 = vld [vmem:[%s1846_s0 + $0x2a8] sm:$0xff] }
  0x70   :  { %899 = vmatprep.mubr.f32.mxu1 %v28_v34  ;;  %v124_v34 = vld [vmem:[%s1846_s0 + $0x370] sm:$0xff] }
  0x72   :  { %314 = vmatmul.mubr.f32.gmra.mxu0 %v50_v35  ;;  %v98_v35 = vld [vmem:[%s1846_s0 + $0x2a0] sm:$0xff] }
  0x73   :  { %900 = vmatmul.mubr.f32.gmra.mxu1 %v31_v36  ;;  %318 = vmatprep.mubr.f32.mxu0 %v54_v37  ;;  %v127_v36 = vld [vmem:[%s1846_s0 + $0x388] sm:$0xff]  ;;  %v102_v37 = vld [vmem:[%s1846_s0 + $0x2c0] sm:$0xff] }
  0x74   :  { %902 = vmatprep.mubr.f32.mxu1 %v34_v38  ;;  %v130_v38 = vld [vmem:[%s1846_s0 + $0x3a0] sm:$0xff] }
  0x76   :  { %319 = vmatmul.mubr.f32.gmra.mxu0 %v53_v39  ;;  %v101_v39 = vld [vmem:[%s1846_s0 + $0x2b8] sm:$0xff] }
  0x77   :  { %903 = vmatmul.mubr.f32.gmra.mxu1 %v37_v40  ;;  %323 = vmatprep.mubr.f32.mxu0 %v57_v41  ;;  %v133_v40 = vld [vmem:[%s1846_s0 + $0x3b8] sm:$0xff] }
  0x78   :  { %905 = vmatprep.mubr.f32.mxu1 %v40_v42 }
  0x7a   :  { %324 = vmatmul.mubr.f32.gmra.mxu0 %v56_v43 }
  0x7b   :  { %906 = vmatmul.mubr.f32.gmra.mxu1 %v43_v44  ;;  %328 = vmatprep.mubr.f32.mxu0 %v60_v45 }
  0x7c   :  { %908 = vmatprep.mubr.f32.mxu1 %v46_v46 }
  0x7e   :  { %329 = vmatmul.mubr.f32.gmra.mxu0 %v59_v47 }
  0x7f   :  { %909 = vmatmul.mubr.f32.gmra.mxu1 %v49_v48  ;;  %333 = vmatprep.mubr.f32.mxu0 %v63_v49 }
  0x80   :  { %911 = vmatprep.mubr.f32.mxu1 %v52_v50 }
  0x82   :  { %334 = vmatmul.mubr.f32.gmra.mxu0 %v62_v51 }
  0x83   :  { %912 = vmatmul.mubr.f32.gmra.mxu1 %v55_v52  ;;  %338 = vmatprep.mubr.f32.mxu0 %v66_v53 }
  0x84   :  { %914 = vmatprep.mubr.f32.mxu1 %v58_v54 }
  0x86   :  { %339 = vmatmul.mubr.f32.gmra.mxu0 %v65_v55 }
  0x87   :  { %915 = vmatmul.mubr.f32.gmra.mxu1 %v61_v56  ;;  %343 = vmatprep.mubr.f32.mxu0 %v69_v57 }
  0x88   :  { %917 = vmatprep.mubr.f32.mxu1 %v64_v58 }
  0x8a   :  { %344 = vmatmul.mubr.f32.gmra.mxu0 %v68_v59 }
  0x8b   :  { %918 = vmatmul.mubr.f32.gmra.mxu1 %v67_v60  ;;  %348 = vmatprep.mubr.f32.mxu0 %v72_v61 }
  0x8c   :  { %920 = vmatprep.mubr.f32.mxu1 %v70_v62 }
  0x8e   :  { %349 = vmatmul.mubr.f32.gmra.mxu0 %v71_v63 }
  0x8f   :  { %921 = vmatmul.mubr.f32.gmra.mxu1 %v73_v0  ;;  %353 = vmatprep.mubr.f32.mxu0 %v75_v1 }
  0x90   :  { %923 = vmatprep.mubr.f32.mxu1 %v76_v2 }
  0x92   :  { %354 = vmatmul.mubr.f32.gmra.mxu0 %v74_v3 }
  0x93   :  { %924 = vmatmul.mubr.f32.gmra.mxu1 %v79_v4  ;;  %358 = vmatprep.mubr.f32.mxu0 %v78_v5 }
  0x94   :  { %926 = vmatprep.mubr.f32.mxu1 %v82_v6 }
  0x96   :  { %359 = vmatmul.mubr.f32.gmra.mxu0 %v77_v7 }
  0x97   :  { %927 = vmatmul.mubr.f32.gmra.mxu1 %v85_v8  ;;  %363 = vmatprep.mubr.f32.mxu0 %v81_v9 }
  0x98   :  { %929 = vmatprep.mubr.f32.mxu1 %v88_v10 }
  0x9a   :  { %364 = vmatmul.mubr.f32.gmra.mxu0 %v80_v11 }
  0x9b   :  { %930 = vmatmul.mubr.f32.gmra.mxu1 %v91_v12  ;;  %368 = vmatprep.mubr.f32.mxu0 %v84_v13 }
  0x9c   :  { %932 = vmatprep.mubr.f32.mxu1 %v94_v14 }
  0x9e   :  { %369 = vmatmul.mubr.f32.gmra.mxu0 %v83_v15 }
  0x9f   :  { %933 = vmatmul.mubr.f32.gmra.mxu1 %v97_v16  ;;  %373 = vmatprep.mubr.f32.mxu0 %v87_v17  ;;  %v1630_v16 = vld [vmem:[%s1847_s2] ss:$0 sm:$0xff] }
  0xa0   :  { %935 = vmatprep.mubr.f32.mxu1 %v100_v18 }
  0xa2   :  { %374 = vmatmul.mubr.f32.gmra.mxu0 %v86_v19 }
  0xa3   :  { %936 = vmatmul.mubr.f32.gmra.mxu1 %v103_v20  ;;  %378 = vmatprep.mubr.f32.mxu0 %v90_v21 }
  0xa4   :  { %938 = vmatprep.mubr.f32.mxu1 %v106_v22 }
  0xa6   :  { %379 = vmatmul.mubr.f32.gmra.mxu0 %v89_v23 }
  0xa7   :  { %939 = vmatmul.mubr.f32.gmra.mxu1 %v109_v24  ;;  %383 = vmatprep.mubr.f32.mxu0 %v93_v25 }
  0xa8   :  { %941 = vmatprep.mubr.f32.mxu1 %v112_v26 }
  0xaa   :  { %384 = vmatmul.mubr.f32.gmra.mxu0 %v92_v27 }
  0xab   :  { %942 = vmatmul.mubr.f32.gmra.mxu1 %v115_v28  ;;  %388 = vmatprep.mubr.f32.mxu0 %v96_v29 }
  0xac   :  { %944 = vmatprep.mubr.f32.mxu1 %v118_v30 }
  0xae   :  { %389 = vmatmul.mubr.f32.gmra.mxu0 %v95_v31 }
  0xaf   :  { %945 = vmatmul.mubr.f32.gmra.mxu1 %v121_v32  ;;  %393 = vmatprep.mubr.f32.mxu0 %v99_v33 }
  0xb0   :  { %947 = vmatprep.mubr.f32.mxu1 %v124_v34 }
  0xb2   :  { %394 = vmatmul.mubr.f32.gmra.mxu0 %v98_v35 }
  0xb3   :  { %948 = vmatmul.mubr.f32.gmra.mxu1 %v127_v36  ;;  %398 = vmatprep.mubr.f32.mxu0 %v102_v37 }
  0xb4   :  { %950 = vmatprep.mubr.f32.mxu1 %v130_v38 }
  0xb6   :  { %399 = vmatmul.mubr.f32.gmra.mxu0 %v101_v39 }
  0xb7   :  { %951 = vmatmul.mubr.f32.gmra.mxu1 %v133_v40 }
 0x102   :  { %v255_v41 = vpop.f32.mrf.mxu0  ;;  %v1607_v42 = vpop.f32.mrf.mxu1 }
 0x103   :  { %v256_v21 = vadd.f32 %v1630_v16, %v255_v41 }
 0x104   :  { %v257_v43 = vpop.f32.mrf.mxu0  ;;  %v407_v44 = vpop.f32.mrf.mxu1 }
 0x106   :  { %v260_v45 = vpop.f32.mrf.mxu0  ;;  %v1609_v46 = vpop.f32.mrf.mxu1 }
 0x107   :  { %v261_v18 = vadd.f32 %v1630_v16, %v260_v45 }
 0x108   :  { %v262_v47 = vpop.f32.mrf.mxu0  ;;  %v412_v48 = vpop.f32.mrf.mxu1 }
 0x10a   :  { %v265_v49 = vpop.f32.mrf.mxu0  ;;  %v1611_v50 = vpop.f32.mrf.mxu1 }
 0x10b   :  { %v266_v30 = vadd.f32 %v1630_v16, %v265_v49 }
 0x10c   :  { %v267_v51 = vpop.f32.mrf.mxu0  ;;  %v417_v52 = vpop.f32.mrf.mxu1 }
 0x10e   :  { %v270_v53 = vpop.f32.mrf.mxu0 }
 0x10f   :  { %v1613_v54 = vpop.f32.mrf.mxu1  ;;  %v271_v25 = vadd.f32 %v1630_v16, %v270_v53 }
 0x110   :  { %v272_v55 = vpop.f32.mrf.mxu0 }
 0x111   :  { %v422_v56 = vpop.f32.mrf.mxu1 }
 0x112   :  { %v275_v57 = vpop.f32.mrf.mxu0 }
 0x113   :  { %v1615_v58 = vpop.f32.mrf.mxu1  ;;  %v276_v40 = vadd.f32 %v1630_v16, %v275_v57 }
 0x114   :  { %v277_v59 = vpop.f32.mrf.mxu0 }
 0x115   :  { %v427_v60 = vpop.f32.mrf.mxu1 }
 0x116   :  { %v280_v61 = vpop.f32.mrf.mxu0 }
 0x117   :  { %v1617_v62 = vpop.f32.mrf.mxu1  ;;  %v281_v35 = vadd.f32 %v1630_v16, %v280_v61 }
 0x118   :  { %v282_v63 = vpop.f32.mrf.mxu0 }
 0x119   :  { %v432_v0 = vpop.f32.mrf.mxu1 }
 0x11a   :  { %v285_v1 = vpop.f32.mrf.mxu0 }
 0x11b   :  { %v1619_v2 = vpop.f32.mrf.mxu1  ;;  %v286_v53 = vadd.f32 %v1630_v16, %v285_v1 }
 0x11c   :  { %v287_v3 = vpop.f32.mrf.mxu0 }
 0x11d   :  { %v437_v4 = vpop.f32.mrf.mxu1 }
 0x11e   :  { %v290_v5 = vpop.f32.mrf.mxu0 }
 0x11f   :  { %v1621_v6 = vpop.f32.mrf.mxu1  ;;  %v291_v47 = vadd.f32 %v1630_v16, %v290_v5 }
 0x120   :  { %v292_v7 = vpop.f32.mrf.mxu0 }
 0x121   :  { %v442_v8 = vpop.f32.mrf.mxu1 }
 0x122   :  { %v295_v9 = vpop.f32.mrf.mxu0 }
 0x123   :  { %v1623_v10 = vpop.f32.mrf.mxu1  ;;  %v296_v3 = vadd.f32 %v1630_v16, %v295_v9 }
 0x124   :  { %v297_v11 = vpop.f32.mrf.mxu0 }
 0x125   :  { %v447_v12 = vpop.f32.mrf.mxu1 }
 0x126   :  { %v300_v13 = vpop.f32.mrf.mxu0 }
 0x127   :  { %v1625_v14 = vpop.f32.mrf.mxu1  ;;  %v301_v60 = vadd.f32 %v1630_v16, %v300_v13 }
 0x128   :  { %v302_v15 = vpop.f32.mrf.mxu0 }
 0x129   :  { %v452_v17 = vpop.f32.mrf.mxu1 }
 0x12a   :  { %v305_v19 = vpop.f32.mrf.mxu0 }
 0x12b   :  { %v895_v20 = vpop.f32.mrf.mxu1  ;;  %v306_v17 = vadd.f32 %v1630_v16, %v305_v19 }
 0x12c   :  { %v526_v22 = vadd.f32 %v895_v20, %v261_v18  ;;  %v307_v23 = vpop.f32.mrf.mxu0 }
 0x12d   :  { %v520_v24 = vpop.f32.mrf.mxu1 }
 0x12e   :  { %v720_v26 = vmax.f32 %v526_v22, 0.0  ;;  %v521_v27 = vadd.f32 %v520_v24, %v256_v21  ;;  %v310_v28 = vpop.f32.mrf.mxu0 }
 0x12f   :  { %v898_v29 = vpop.f32.mrf.mxu1  ;;  %v311_v11 = vadd.f32 %v1630_v16, %v310_v28 }
 0x130   :  { %761 = vst.msk [vmem:[%s1848_s3 + $0x8] sm:$0xff] %vm759_vm0, %v720_v26  ;;  %v719_v31 = vmax.f32 %v521_v27, 0.0  ;;  %v536_v32 = vadd.f32 %v898_v29, %v271_v25  ;;  %v312_v33 = vpop.f32.mrf.mxu0 }
 0x131   :  { %v530_v34 = vpop.f32.mrf.mxu1 }
 0x132   :  { %760 = vst.msk [vmem:[%s1848_s3] sm:$0xff] %vm759_vm0, %v719_v31  ;;  %v722_v36 = vmax.f32 %v536_v32, 0.0  ;;  %v531_v37 = vadd.f32 %v530_v34, %v266_v30  ;;  %v315_v38 = vpop.f32.mrf.mxu0 }
 0x133   :  { %v901_v39 = vpop.f32.mrf.mxu1  ;;  %v316_v27 = vadd.f32 %v1630_v16, %v315_v38 }
 0x134   :  { %763 = vst.msk [vmem:[%s1848_s3 + $0x18] sm:$0xff] %vm759_vm0, %v722_v36  ;;  %v721_v41 = vmax.f32 %v531_v37, 0.0  ;;  %v546_v43 = vadd.f32 %v901_v39, %v281_v35  ;;  %v317_v44 = vpop.f32.mrf.mxu0 }
 0x135   :  { %v540_v45 = vpop.f32.mrf.mxu1 }
 0x136   :  { %762 = vst.msk [vmem:[%s1848_s3 + $0x10] sm:$0xff] %vm759_vm0, %v721_v41  ;;  %v724_v48 = vmax.f32 %v546_v43, 0.0  ;;  %v541_v49 = vadd.f32 %v540_v45, %v276_v40  ;;  %v320_v51 = vpop.f32.mrf.mxu0 }
 0x137   :  { %v904_v52 = vpop.f32.mrf.mxu1  ;;  %v321_v23 = vadd.f32 %v1630_v16, %v320_v51 }
 0x138   :  { %765 = vst.msk [vmem:[%s1848_s3 + $0x28] sm:$0xff] %vm759_vm0, %v724_v48  ;;  %v723_v55 = vmax.f32 %v541_v49, 0.0  ;;  %v556_v56 = vadd.f32 %v904_v52, %v291_v47  ;;  %v322_v57 = vpop.f32.mrf.mxu0 }
 0x139   :  { %v550_v59 = vpop.f32.mrf.mxu1 }
 0x13a   :  { %764 = vst.msk [vmem:[%s1848_s3 + $0x20] sm:$0xff] %vm759_vm0, %v723_v55  ;;  %v726_v61 = vmax.f32 %v556_v56, 0.0  ;;  %v551_v63 = vadd.f32 %v550_v59, %v286_v53  ;;  %v325_v0 = vpop.f32.mrf.mxu0 }
 0x13b   :  { %v907_v1 = vpop.f32.mrf.mxu1  ;;  %v326_v37 = vadd.f32 %v1630_v16, %v325_v0 }
 0x13c   :  { %767 = vst.msk [vmem:[%s1848_s3 + $0x38] sm:$0xff] %vm759_vm0, %v726_v61  ;;  %v725_v4 = vmax.f32 %v551_v63, 0.0  ;;  %v566_v5 = vadd.f32 %v907_v1, %v301_v60  ;;  %v327_v7 = vpop.f32.mrf.mxu0 }
 0x13d   :  { %v560_v8 = vpop.f32.mrf.mxu1 }
 0x13e   :  { %766 = vst.msk [vmem:[%s1848_s3 + $0x30] sm:$0xff] %vm759_vm0, %v725_v4  ;;  %v728_v12 = vmax.f32 %v566_v5, 0.0  ;;  %v561_v13 = vadd.f32 %v560_v8, %v296_v3  ;;  %v330_v15 = vpop.f32.mrf.mxu0 }
 0x13f   :  { %v910_v9 = vpop.f32.mrf.mxu1  ;;  %v331_v32 = vadd.f32 %v1630_v16, %v330_v15 }
 0x140   :  { %769 = vst.msk [vmem:[%s1848_s3 + $0x48] sm:$0xff] %vm759_vm0, %v728_v12  ;;  %v727_v18 = vmax.f32 %v561_v13, 0.0  ;;  %v576_v20 = vadd.f32 %v910_v9, %v311_v11  ;;  %v332_v21 = vpop.f32.mrf.mxu0 }
 0x141   :  { %v570_v22 = vpop.f32.mrf.mxu1 }
 0x142   :  { %768 = vst.msk [vmem:[%s1848_s3 + $0x40] sm:$0xff] %vm759_vm0, %v727_v18  ;;  %v730_v24 = vmax.f32 %v576_v20, 0.0  ;;  %v571_v25 = vadd.f32 %v570_v22, %v306_v17  ;;  %v335_v26 = vpop.f32.mrf.mxu0 }
 0x143   :  { %v913_v19 = vpop.f32.mrf.mxu1  ;;  %v336_v49 = vadd.f32 %v1630_v16, %v335_v26 }
 0x144   :  { %771 = vst.msk [vmem:[%s1848_s3 + $0x58] sm:$0xff] %vm759_vm0, %v730_v24  ;;  %v729_v28 = vmax.f32 %v571_v25, 0.0  ;;  %v586_v29 = vadd.f32 %v913_v19, %v321_v23  ;;  %v337_v30 = vpop.f32.mrf.mxu0 }
 0x145   :  { %v580_v31 = vpop.f32.mrf.mxu1 }
 0x146   :  { %770 = vst.msk [vmem:[%s1848_s3 + $0x50] sm:$0xff] %vm759_vm0, %v729_v28  ;;  %v732_v33 = vmax.f32 %v586_v29, 0.0  ;;  %v581_v34 = vadd.f32 %v580_v31, %v316_v27  ;;  %v340_v35 = vpop.f32.mrf.mxu0 }
 0x147   :  { %v916_v36 = vpop.f32.mrf.mxu1  ;;  %v341_v43 = vadd.f32 %v1630_v16, %v340_v35 }
 0x148   :  { %773 = vst.msk [vmem:[%s1848_s3 + $0x68] sm:$0xff] %vm759_vm0, %v732_v33  ;;  %v731_v38 = vmax.f32 %v581_v34, 0.0  ;;  %v596_v39 = vadd.f32 %v916_v36, %v331_v32  ;;  %v342_v40 = vpop.f32.mrf.mxu0 }
 0x149   :  { %v590_v41 = vpop.f32.mrf.mxu1 }
 0x14a   :  { %772 = vst.msk [vmem:[%s1848_s3 + $0x60] sm:$0xff] %vm759_vm0, %v731_v38  ;;  %v734_v44 = vmax.f32 %v596_v39, 0.0  ;;  %v591_v45 = vadd.f32 %v590_v41, %v326_v37  ;;  %v345_v47 = vpop.f32.mrf.mxu0 }
 0x14b   :  { %v919_v48 = vpop.f32.mrf.mxu1  ;;  %v346_v63 = vadd.f32 %v1630_v16, %v345_v47 }
 0x14c   :  { %775 = vst.msk [vmem:[%s1848_s3 + $0x78] sm:$0xff] %vm759_vm0, %v734_v44  ;;  %v733_v51 = vmax.f32 %v591_v45, 0.0  ;;  %v606_v52 = vadd.f32 %v919_v48, %v341_v43  ;;  %v347_v53 = vpop.f32.mrf.mxu0  ;;  %v411_v48 = vadd.f32 %v1630_v16, %v1609_v46  ;;  %v421_v46 = vadd.f32 %v1630_v16, %v1613_v54 }
 0x14d   :  { %v600_v55 = vpop.f32.mrf.mxu1 }
 0x14e   :  { %774 = vst.msk [vmem:[%s1848_s3 + $0x70] sm:$0xff] %vm759_vm0, %v733_v51  ;;  %v736_v56 = vmax.f32 %v606_v52, 0.0  ;;  %v601_v57 = vadd.f32 %v600_v55, %v336_v49  ;;  %v350_v59 = vpop.f32.mrf.mxu0  ;;  %v406_v55 = vadd.f32 %v1630_v16, %v1607_v42  ;;  %v416_v42 = vadd.f32 %v1630_v16, %v1611_v50 }
 0x14f   :  { %v351_v60 = vadd.f32 %v1630_v16, %v350_v59  ;;  %v922_v61 = vpop.f32.mrf.mxu1 }
 0x150   :  { %777 = vst.msk [vmem:[%s1848_s3 + $0x88] sm:$0xff] %vm759_vm0, %v736_v56  ;;  %v735_v0 = vmax.f32 %v601_v57, 0.0  ;;  %v352_v1 = vpop.f32.mrf.mxu0 }
 0x151   :  { %v616_v3 = vadd.f32 %v922_v61, %v351_v60  ;;  %v610_v4 = vpop.f32.mrf.mxu1 }
 0x152   :  { %776 = vst.msk [vmem:[%s1848_s3 + $0x80] sm:$0xff] %vm759_vm0, %v735_v0  ;;  %v611_v5 = vadd.f32 %v610_v4, %v346_v63  ;;  %v355_v7 = vpop.f32.mrf.mxu0 }
 0x153   :  { %v738_v8 = vmax.f32 %v616_v3, 0.0  ;;  %v356_v11 = vadd.f32 %v1630_v16, %v355_v7  ;;  %v925_v12 = vpop.f32.mrf.mxu1 }
 0x154   :  { %v737_v13 = vmax.f32 %v611_v5, 0.0  ;;  %v357_v15 = vpop.f32.mrf.mxu0 }
 0x155   :  { %779 = vst.msk [vmem:[%s1848_s3 + $0x98] sm:$0xff] %vm759_vm0, %v738_v8  ;;  %v620_v9 = vpop.f32.mrf.mxu1 }
 0x156   :  { %778 = vst.msk [vmem:[%s1848_s3 + $0x90] sm:$0xff] %vm759_vm0, %v737_v13  ;;  %v621_v17 = vadd.f32 %v620_v9, %v356_v11  ;;  %v360_v18 = vpop.f32.mrf.mxu0 }
 0x157   :  { %v361_v20 = vadd.f32 %v1630_v16, %v360_v18  ;;  %v928_v21 = vpop.f32.mrf.mxu1 }
 0x158   :  { %v739_v22 = vmax.f32 %v621_v17, 0.0  ;;  %v362_v23 = vpop.f32.mrf.mxu0 }
 0x159   :  { %v626_v24 = vadd.f32 %v925_v12, %v361_v20  ;;  %v630_v25 = vpop.f32.mrf.mxu1  ;;  %v431_v12 = vadd.f32 %v1630_v16, %v1617_v62  ;;  %v426_v20 = vadd.f32 %v1630_v16, %v1615_v58 }
 0x15a   :  { %780 = vst.msk [vmem:[%s1848_s3 + $0xa0] sm:$0xff] %vm759_vm0, %v739_v22  ;;  %v365_v26 = vpop.f32.mrf.mxu0 }
 0x15b   :  { %v740_v19 = vmax.f32 %v626_v24, 0.0  ;;  %v366_v27 = vadd.f32 %v1630_v16, %v365_v26  ;;  %v931_v28 = vpop.f32.mrf.mxu1 }
 0x15c   :  { %v367_v29 = vpop.f32.mrf.mxu0 }
 0x15d   :  { %781 = vst.msk [vmem:[%s1848_s3 + $0xa8] sm:$0xff] %vm759_vm0, %v740_v19  ;;  %v631_v30 = vadd.f32 %v630_v25, %v366_v27  ;;  %v640_v31 = vpop.f32.mrf.mxu1  ;;  %v441_v25 = vadd.f32 %v1630_v16, %v1621_v6 }
 0x15e   :  { %v370_v32 = vpop.f32.mrf.mxu0 }
 0x15f   :  { %v741_v33 = vmax.f32 %v631_v30, 0.0  ;;  %v371_v34 = vadd.f32 %v1630_v16, %v370_v32  ;;  %v934_v35 = vpop.f32.mrf.mxu1  ;;  %v436_v30 = vadd.f32 %v1630_v16, %v1619_v2 }
 0x160   :  { %v372_v36 = vpop.f32.mrf.mxu0 }
 0x161   :  { %782 = vst.msk [vmem:[%s1848_s3 + $0xb0] sm:$0xff] %vm759_vm0, %v741_v33  ;;  %v636_v37 = vadd.f32 %v928_v21, %v371_v34  ;;  %v650_v38 = vpop.f32.mrf.mxu1 }
 0x162   :  { %v375_v39 = vpop.f32.mrf.mxu0 }
 0x163   :  { %v742_v40 = vmax.f32 %v636_v37, 0.0  ;;  %v376_v41 = vadd.f32 %v1630_v16, %v375_v39  ;;  %v1749_v43 = vpop.f32.mrf.mxu1 }
 0x164   :  { %v377_v44 = vpop.f32.mrf.mxu0 }
 0x165   :  { %783 = vst.msk [vmem:[%s1848_s3 + $0xb8] sm:$0xff] %vm759_vm0, %v742_v40  ;;  %v641_v45 = vadd.f32 %v640_v31, %v376_v41  ;;  %v660_v47 = vpop.f32.mrf.mxu1  ;;  %v446_v41 = vadd.f32 %v1630_v16, %v1623_v10 }
 0x166   :  { %v380_v49 = vpop.f32.mrf.mxu0 }
 0x167   :  { %v743_v51 = vmax.f32 %v641_v45, 0.0  ;;  %v381_v52 = vadd.f32 %v1630_v16, %v380_v49  ;;  %v940_v53 = vpop.f32.mrf.mxu1 }
 0x168   :  { %v676_v56 = vadd.f32 %v940_v53, %v411_v48  ;;  %v382_v57 = vpop.f32.mrf.mxu0 }
 0x169   :  { %784 = vst.msk [vmem:[%s1848_s3 + $0xc0] sm:$0xff] %vm759_vm0, %v743_v51  ;;  %v646_v59 = vadd.f32 %v931_v28, %v381_v52  ;;  %v670_v60 = vpop.f32.mrf.mxu1 }
 0x16a   :  { %v750_v61 = vmax.f32 %v676_v56, 0.0  ;;  %v671_v63 = vadd.f32 %v670_v60, %v406_v55  ;;  %v385_v0 = vpop.f32.mrf.mxu0 }
 0x16b   :  { %v744_v1 = vmax.f32 %v646_v59, 0.0  ;;  %v386_v3 = vadd.f32 %v1630_v16, %v385_v0  ;;  %v943_v4 = vpop.f32.mrf.mxu1 }
 0x16c   :  { %791 = vst.msk [vmem:[%s1848_s3 + $0xf8] sm:$0xff] %vm759_vm0, %v750_v61  ;;  %v749_v5 = vmax.f32 %v671_v63, 0.0  ;;  %v686_v7 = vadd.f32 %v943_v4, %v421_v46  ;;  %v387_v8 = vpop.f32.mrf.mxu0 }
 0x16d   :  { %785 = vst.msk [vmem:[%s1848_s3 + $0xc8] sm:$0xff] %vm759_vm0, %v744_v1  ;;  %v651_v54 = vadd.f32 %v650_v38, %v386_v3  ;;  %v680_v11 = vpop.f32.mrf.mxu1 }
 0x16e   :  { %790 = vst.msk [vmem:[%s1848_s3 + $0xf0] sm:$0xff] %vm759_vm0, %v749_v5  ;;  %v752_v50 = vmax.f32 %v686_v7, 0.0  ;;  %v681_v13 = vadd.f32 %v680_v11, %v416_v42  ;;  %v390_v15 = vpop.f32.mrf.mxu0 }
 0x16f   :  { %v745_v9 = vmax.f32 %v651_v54, 0.0  ;;  %v391_v17 = vadd.f32 %v1630_v16, %v390_v15  ;;  %v946_v18 = vpop.f32.mrf.mxu1 }
 0x170   :  { %793 = vst.msk [vmem:[%s1848_s3 + $0x108] sm:$0xff] %vm759_vm0, %v752_v50  ;;  %v751_v62 = vmax.f32 %v681_v13, 0.0  ;;  %v696_v21 = vadd.f32 %v946_v18, %v431_v12  ;;  %v392_v22 = vpop.f32.mrf.mxu0 }
 0x171   :  { %786 = vst.msk [vmem:[%s1848_s3 + $0xd0] sm:$0xff] %vm759_vm0, %v745_v9  ;;  %v656_v23 = vadd.f32 %v934_v35, %v391_v17  ;;  %v690_v24 = vpop.f32.mrf.mxu1  ;;  %v451_v35 = vadd.f32 %v1630_v16, %v1625_v14 }
 0x172   :  { %792 = vst.msk [vmem:[%s1848_s3 + $0x100] sm:$0xff] %vm759_vm0, %v751_v62  ;;  %v754_v58 = vmax.f32 %v696_v21, 0.0  ;;  %v691_v26 = vadd.f32 %v690_v24, %v426_v20  ;;  %v395_v19 = vpop.f32.mrf.mxu0 }
 0x173   :  { %v746_v27 = vmax.f32 %v656_v23, 0.0  ;;  %v396_v28 = vadd.f32 %v1630_v16, %v395_v19  ;;  %v949_v29 = vpop.f32.mrf.mxu1 }
 0x174   :  { %795 = vst.msk [vmem:[%s1848_s3 + $0x118] sm:$0xff] %vm759_vm0, %v754_v58  ;;  %v753_v6 = vmax.f32 %v691_v26, 0.0  ;;  %v706_v31 = vadd.f32 %v949_v29, %v441_v25  ;;  %v397_v32 = vpop.f32.mrf.mxu0 }
 0x175   :  { %787 = vst.msk [vmem:[%s1848_s3 + $0xd8] sm:$0xff] %vm759_vm0, %v746_v27  ;;  %v661_v33 = vadd.f32 %v660_v47, %v396_v28  ;;  %v700_v34 = vpop.f32.mrf.mxu1 }
 0x176   :  { %794 = vst.msk [vmem:[%s1848_s3 + $0x110] sm:$0xff] %vm759_vm0, %v753_v6  ;;  %v756_v2 = vmax.f32 %v706_v31, 0.0  ;;  %v701_v36 = vadd.f32 %v700_v34, %v436_v30  ;;  %v400_v37 = vpop.f32.mrf.mxu0 }
 0x177   :  { %v747_v38 = vmax.f32 %v661_v33, 0.0  ;;  %v401_v39 = vadd.f32 %v1630_v16, %v400_v37  ;;  %v952_v40 = vpop.f32.mrf.mxu1 }
 0x178   :  { %797 = vst.msk [vmem:[%s1848_s3 + $0x128] sm:$0xff] %vm759_vm0, %v756_v2  ;;  %v755_v14 = vmax.f32 %v701_v36, 0.0  ;;  %v716_v44 = vadd.f32 %v952_v40, %v451_v35  ;;  %v402_v45 = vpop.f32.mrf.mxu0 }
 0x179   :  { %788 = vst.msk [vmem:[%s1848_s3 + $0xe0] sm:$0xff] %vm759_vm0, %v747_v38  ;;  %v666_v47 = vadd.f32 %v1749_v43, %v401_v39  ;;  %v710_v48 = vpop.f32.mrf.mxu1 }
 0x17a   :  { %796 = vst.msk [vmem:[%s1848_s3 + $0x120] sm:$0xff] %vm759_vm0, %v755_v14  ;;  %v758_v10 = vmax.f32 %v716_v44, 0.0  ;;  %v711_v16 = vadd.f32 %v710_v48, %v446_v41 }
 0x17b   :  { %v748_v49 = vmax.f32 %v666_v47, 0.0 }
 0x17c   :  { %799 = vst.msk [vmem:[%s1848_s3 + $0x138] sm:$0xff] %vm759_vm0, %v758_v10  ;;  %v757_v51 = vmax.f32 %v711_v16, 0.0 }
 0x17d   :  { %789 = vst.msk [vmem:[%s1848_s3 + $0xe8] sm:$0xff] %vm759_vm0, %v748_v49 }
 0x17e   :  { %798 = vst.msk [vmem:[%s1848_s3 + $0x130] sm:$0xff] %vm759_vm0, %v757_v51 }

// kernel: reference_encoder_forward.11
= control target key start
LH: loop header
LB: loop body
LE: loop exit
PB: predicated region body
PF: predicated region fallthrough
CT: control target
= control target key end

     0   :  { %vm506_vm0 = vcmask 523264   ;;  %s1210_s1 = inlined_call_operand.vmem [shape: f32[640,64], index: 1, kind: input, shape index: {}]   ;;  %s1211_s0 = inlined_call_operand.vmem [shape: f32[80,640], index: 0, kind: input, shape index: {}]   ;;  %s1212_s2 = inlined_call_operand.vmem [shape: f32[1,64], index: 2, kind: input, shape index: {}]   ;;  %s1213_s3 = inlined_call_operand.vmem [shape: f32[80,64], index: 3, kind: output, shape index: {}]  }
   0x1   :  { %v95_v0 = vld [vmem:[%s1210_s1 + $0xf8] sm:$0xff]  ;;  %v94_v4 = vld [vmem:[%s1210_s1 + $0xf0] sm:$0xff]  ;;  %v93_v8 = vld [vmem:[%s1210_s1 + $0xe8] sm:$0xff] }
   0x2   :  { %v127_v1 = vld [vmem:[%s1210_s1 + $0x1f8] sm:$0xff]  ;;  %522 = vmatprep.subr.mxu0 %v95_v0  ;;  %v126_v5 = vld [vmem:[%s1210_s1 + $0x1f0] sm:$0xff]  ;;  %v125_v9 = vld [vmem:[%s1210_s1 + $0x1e8] sm:$0xff] }
   0x3   :  { %v79_v2 = vld [vmem:[%s1210_s1 + $0x78] sm:$0xff]  ;;  %584 = vmatprep.subr.mxu1 %v127_v1  ;;  %v78_v6 = vld [vmem:[%s1210_s1 + $0x70] sm:$0xff]  ;;  %v77_v10 = vld [vmem:[%s1210_s1 + $0x68] sm:$0xff] }
   0x4   :  { %v111_v3 = vld [vmem:[%s1210_s1 + $0x178] sm:$0xff]  ;;  %523 = vmatpush3.msra.mxu0 %v79_v2  ;;  %v110_v7 = vld [vmem:[%s1210_s1 + $0x170] sm:$0xff]  ;;  %v109_v11 = vld [vmem:[%s1210_s1 + $0x168] sm:$0xff] }
   0x5   :  { %585 = vmatpush3.msra.mxu1 %v111_v3  ;;  %524 = vmatprep.subr.mxu0 %v94_v4  ;;  %v92_v12 = vld [vmem:[%s1210_s1 + $0xe0] sm:$0xff]  ;;  %v91_v16 = vld [vmem:[%s1210_s1 + $0xd8] sm:$0xff]  ;;  %v90_v20 = vld [vmem:[%s1210_s1 + $0xd0] sm:$0xff] }
   0x6   :  { %586 = vmatprep.subr.mxu1 %v126_v5  ;;  %525 = vmatpush3.msra.mxu0 %v78_v6  ;;  %v124_v13 = vld [vmem:[%s1210_s1 + $0x1e0] sm:$0xff]  ;;  %v123_v17 = vld [vmem:[%s1210_s1 + $0x1d8] sm:$0xff]  ;;  %v122_v21 = vld [vmem:[%s1210_s1 + $0x1d0] sm:$0xff] }
   0x7   :  { %587 = vmatpush3.msra.mxu1 %v110_v7  ;;  %526 = vmatprep.subr.mxu0 %v93_v8  ;;  %v76_v14 = vld [vmem:[%s1210_s1 + $0x60] sm:$0xff]  ;;  %v75_v18 = vld [vmem:[%s1210_s1 + $0x58] sm:$0xff]  ;;  %v74_v22 = vld [vmem:[%s1210_s1 + $0x50] sm:$0xff] }
   0x8   :  { %588 = vmatprep.subr.mxu1 %v125_v9  ;;  %v108_v15 = vld [vmem:[%s1210_s1 + $0x160] sm:$0xff]  ;;  %527 = vmatpush3.msra.mxu0 %v77_v10  ;;  %v107_v19 = vld [vmem:[%s1210_s1 + $0x158] sm:$0xff]  ;;  %v106_v23 = vld [vmem:[%s1210_s1 + $0x150] sm:$0xff] }
   0x9   :  { %589 = vmatpush3.msra.mxu1 %v109_v11  ;;  %528 = vmatprep.subr.mxu0 %v92_v12  ;;  %v89_v24 = vld [vmem:[%s1210_s1 + $0xc8] sm:$0xff]  ;;  %v88_v28 = vld [vmem:[%s1210_s1 + $0xc0] sm:$0xff]  ;;  %v87_v32 = vld [vmem:[%s1210_s1 + $0xb8] sm:$0xff] }
   0xa   :  { %590 = vmatprep.subr.mxu1 %v124_v13  ;;  %529 = vmatpush3.msra.mxu0 %v76_v14  ;;  %v121_v25 = vld [vmem:[%s1210_s1 + $0x1c8] sm:$0xff]  ;;  %v120_v29 = vld [vmem:[%s1210_s1 + $0x1c0] sm:$0xff]  ;;  %v119_v33 = vld [vmem:[%s1210_s1 + $0x1b8] sm:$0xff] }
   0xb   :  { %591 = vmatpush3.msra.mxu1 %v108_v15  ;;  %530 = vmatprep.subr.mxu0 %v91_v16  ;;  %v73_v26 = vld [vmem:[%s1210_s1 + $0x48] sm:$0xff]  ;;  %v72_v30 = vld [vmem:[%s1210_s1 + $0x40] sm:$0xff]  ;;  %v71_v34 = vld [vmem:[%s1210_s1 + $0x38] sm:$0xff] }
   0xc   :  { %592 = vmatprep.subr.mxu1 %v123_v17  ;;  %531 = vmatpush3.msra.mxu0 %v75_v18  ;;  %v105_v27 = vld [vmem:[%s1210_s1 + $0x148] sm:$0xff]  ;;  %v104_v31 = vld [vmem:[%s1210_s1 + $0x140] sm:$0xff]  ;;  %v103_v35 = vld [vmem:[%s1210_s1 + $0x138] sm:$0xff] }
   0xd   :  { %593 = vmatpush3.msra.mxu1 %v107_v19  ;;  %532 = vmatprep.subr.mxu0 %v90_v20  ;;  %v86_v36 = vld [vmem:[%s1210_s1 + $0xb0] sm:$0xff]  ;;  %v85_v40 = vld [vmem:[%s1210_s1 + $0xa8] sm:$0xff]  ;;  %v84_v44 = vld [vmem:[%s1210_s1 + $0xa0] sm:$0xff] }
   0xe   :  { %594 = vmatprep.subr.mxu1 %v122_v21  ;;  %533 = vmatpush3.msra.mxu0 %v74_v22  ;;  %v118_v37 = vld [vmem:[%s1210_s1 + $0x1b0] sm:$0xff]  ;;  %v117_v41 = vld [vmem:[%s1210_s1 + $0x1a8] sm:$0xff]  ;;  %v116_v45 = vld [vmem:[%s1210_s1 + $0x1a0] sm:$0xff] }
   0xf   :  { %595 = vmatpush3.msra.mxu1 %v106_v23  ;;  %534 = vmatprep.subr.mxu0 %v89_v24  ;;  %v70_v38 = vld [vmem:[%s1210_s1 + $0x30] sm:$0xff]  ;;  %v69_v42 = vld [vmem:[%s1210_s1 + $0x28] sm:$0xff]  ;;  %v68_v46 = vld [vmem:[%s1210_s1 + $0x20] sm:$0xff] }
  0x10   :  { %596 = vmatprep.subr.mxu1 %v121_v25  ;;  %535 = vmatpush3.msra.mxu0 %v73_v26  ;;  %v102_v39 = vld [vmem:[%s1210_s1 + $0x130] sm:$0xff]  ;;  %v101_v43 = vld [vmem:[%s1210_s1 + $0x128] sm:$0xff]  ;;  %v100_v47 = vld [vmem:[%s1210_s1 + $0x120] sm:$0xff] }
  0x11   :  { %597 = vmatpush3.msra.mxu1 %v105_v27  ;;  %536 = vmatprep.subr.mxu0 %v88_v28  ;;  %v83_v48 = vld [vmem:[%s1210_s1 + $0x98] sm:$0xff]  ;;  %v82_v52 = vld [vmem:[%s1210_s1 + $0x90] sm:$0xff]  ;;  %v81_v56 = vld [vmem:[%s1210_s1 + $0x88] sm:$0xff] }
  0x12   :  { %598 = vmatprep.subr.mxu1 %v120_v29  ;;  %537 = vmatpush3.msra.mxu0 %v72_v30  ;;  %v115_v49 = vld [vmem:[%s1210_s1 + $0x198] sm:$0xff]  ;;  %v114_v53 = vld [vmem:[%s1210_s1 + $0x190] sm:$0xff]  ;;  %v113_v57 = vld [vmem:[%s1210_s1 + $0x188] sm:$0xff] }
  0x13   :  { %599 = vmatpush3.msra.mxu1 %v104_v31  ;;  %538 = vmatprep.subr.mxu0 %v87_v32  ;;  %v67_v50 = vld [vmem:[%s1210_s1 + $0x18] sm:$0xff]  ;;  %v66_v54 = vld [vmem:[%s1210_s1 + $0x10] sm:$0xff]  ;;  %v65_v58 = vld [vmem:[%s1210_s1 + $0x8] sm:$0xff] }
  0x14   :  { %600 = vmatprep.subr.mxu1 %v119_v33  ;;  %539 = vmatpush3.msra.mxu0 %v71_v34  ;;  %v99_v51 = vld [vmem:[%s1210_s1 + $0x118] sm:$0xff]  ;;  %v98_v55 = vld [vmem:[%s1210_s1 + $0x110] sm:$0xff]  ;;  %v97_v59 = vld [vmem:[%s1210_s1 + $0x108] sm:$0xff] }
  0x15   :  { %601 = vmatpush3.msra.mxu1 %v103_v35  ;;  %540 = vmatprep.subr.mxu0 %v86_v36  ;;  %v80_v60 = vld [vmem:[%s1210_s1 + $0x80] sm:$0xff]  ;;  %v15_v63 = vld [vmem:[%s1211_s0 + $0x8] sm:$0xff]  ;;  %v17_v1 = vld [vmem:[%s1211_s0 + $0x18] sm:$0xff] }
  0x16   :  { %602 = vmatprep.subr.mxu1 %v118_v37  ;;  %541 = vmatpush3.msra.mxu0 %v70_v38  ;;  %v112_v61 = vld [vmem:[%s1210_s1 + $0x180] sm:$0xff]  ;;  %v16_v3 = vld [vmem:[%s1211_s0 + $0x10] sm:$0xff]  ;;  %v143_v4 = vld [vmem:[%s1210_s1 + $0x278] sm:$0xff] }
  0x17   :  { %603 = vmatpush3.msra.mxu1 %v102_v39  ;;  %542 = vmatprep.subr.mxu0 %v85_v40  ;;  %v64_v62 = vld [vmem:[%s1210_s1] sm:$0xff]  ;;  %v20_v5 = vld [vmem:[%s1211_s0 + $0x30] sm:$0xff]  ;;  %v19_v8 = vld [vmem:[%s1211_s0 + $0x28] sm:$0xff] }
  0x18   :  { %604 = vmatprep.subr.mxu1 %v117_v41  ;;  %543 = vmatpush3.msra.mxu0 %v69_v42  ;;  %v96_v0 = vld [vmem:[%s1210_s1 + $0x100] sm:$0xff]  ;;  %v142_v7 = vld [vmem:[%s1210_s1 + $0x270] sm:$0xff]  ;;  %v21_v9 = vld [vmem:[%s1211_s0 + $0x38] sm:$0xff] }
  0x19   :  { %605 = vmatpush3.msra.mxu1 %v101_v43  ;;  %544 = vmatprep.subr.mxu0 %v84_v44  ;;  %v14_v2 = vld [vmem:[%s1211_s0] sm:$0xff]  ;;  %v141_v10 = vld [vmem:[%s1210_s1 + $0x268] sm:$0xff]  ;;  %v25_v11 = vld [vmem:[%s1211_s0 + $0x58] sm:$0xff] }
  0x1a   :  { %606 = vmatprep.subr.mxu1 %v116_v45  ;;  %545 = vmatpush3.msra.mxu0 %v68_v46  ;;  %v22_v6 = vld [vmem:[%s1211_s0 + $0x40] sm:$0xff]  ;;  %v27_v12 = vld [vmem:[%s1211_s0 + $0x68] sm:$0xff]  ;;  %v24_v13 = vld [vmem:[%s1211_s0 + $0x50] sm:$0xff] }
  0x1b   :  { %607 = vmatpush3.msra.mxu1 %v100_v47  ;;  %546 = vmatprep.subr.mxu0 %v83_v48  ;;  %v26_v14 = vld [vmem:[%s1211_s0 + $0x60] sm:$0xff]  ;;  %v139_v16 = vld [vmem:[%s1210_s1 + $0x258] sm:$0xff]  ;;  %v32_v18 = vld [vmem:[%s1211_s0 + $0x90] sm:$0xff] }
  0x1c   :  { %608 = vmatprep.subr.mxu1 %v115_v49  ;;  %547 = vmatpush3.msra.mxu0 %v67_v50  ;;  %v140_v15 = vld [vmem:[%s1210_s1 + $0x260] sm:$0xff]  ;;  %v29_v19 = vld [vmem:[%s1211_s0 + $0x78] sm:$0xff]  ;;  %v31_v20 = vld [vmem:[%s1211_s0 + $0x88] sm:$0xff] }
  0x1d   :  { %609 = vmatpush3.msra.mxu1 %v99_v51  ;;  %548 = vmatprep.subr.mxu0 %v82_v52  ;;  %v30_v17 = vld [vmem:[%s1211_s0 + $0x80] sm:$0xff]  ;;  %v138_v21 = vld [vmem:[%s1210_s1 + $0x250] sm:$0xff]  ;;  %v35_v22 = vld [vmem:[%s1211_s0 + $0xa8] sm:$0xff] }
  0x1e   :  { %610 = vmatprep.subr.mxu1 %v114_v53  ;;  %549 = vmatpush3.msra.mxu0 %v66_v54  ;;  %v37_v23 = vld [vmem:[%s1211_s0 + $0xb8] sm:$0xff]  ;;  %v137_v24 = vld [vmem:[%s1210_s1 + $0x248] sm:$0xff]  ;;  %v34_v25 = vld [vmem:[%s1211_s0 + $0xa0] sm:$0xff] }
  0x1f   :  { %611 = vmatpush3.msra.mxu1 %v98_v55  ;;  %550 = vmatprep.subr.mxu0 %v81_v56  ;;  %v36_v26 = vld [vmem:[%s1211_s0 + $0xb0] sm:$0xff]  ;;  %v136_v27 = vld [vmem:[%s1210_s1 + $0x240] sm:$0xff]  ;;  %v41_v30 = vld [vmem:[%s1211_s0 + $0xd8] sm:$0xff] }
  0x20   :  { %612 = vmatprep.subr.mxu1 %v113_v57  ;;  %551 = vmatpush3.msra.mxu0 %v65_v58  ;;  %v40_v28 = vld [vmem:[%s1211_s0 + $0xd0] sm:$0xff]  ;;  %v42_v29 = vld [vmem:[%s1211_s0 + $0xe0] sm:$0xff]  ;;  %v39_v31 = vld [vmem:[%s1211_s0 + $0xc8] sm:$0xff] }
  0x21   :  { %613 = vmatpush3.msra.mxu1 %v97_v59  ;;  %552 = vmatprep.subr.mxu0 %v80_v60  ;;  %v135_v32 = vld [vmem:[%s1210_s1 + $0x238] sm:$0xff]  ;;  %v47_v34 = vld [vmem:[%s1211_s0 + $0x108] sm:$0xff]  ;;  %v134_v35 = vld [vmem:[%s1210_s1 + $0x230] sm:$0xff] }
  0x22   :  { %614 = vmatprep.subr.mxu1 %v112_v61  ;;  %553 = vmatpush3.msra.mxu0 %v64_v62  ;;  %v45_v33 = vld [vmem:[%s1211_s0 + $0xf8] sm:$0xff]  ;;  %v44_v36 = vld [vmem:[%s1211_s0 + $0xf0] sm:$0xff]  ;;  %v46_v37 = vld [vmem:[%s1211_s0 + $0x100] sm:$0xff] }
  0x23   :  { %215 = vmatprep.mubr.f32.mxu0 %v15_v63  ;;  %615 = vmatpush3.msra.mxu1 %v96_v0  ;;  %v133_v38 = vld [vmem:[%s1210_s1 + $0x228] sm:$0xff]  ;;  %v50_v39 = vld [vmem:[%s1211_s0 + $0x120] sm:$0xff]  ;;  %v52_v40 = vld [vmem:[%s1211_s0 + $0x130] sm:$0xff] }
  0x24   :  { %330 = vmatprep.mubr.f32.mxu1 %v17_v1  ;;  %216 = vmatmul.mubr.f32.vlgmr.msra.gmra.mxu0 %v14_v2  ;;  %v49_v41 = vld [vmem:[%s1211_s0 + $0x118] sm:$0xff]  ;;  %v51_v42 = vld [vmem:[%s1211_s0 + $0x128] sm:$0xff]  ;;  %v132_v43 = vld [vmem:[%s1210_s1 + $0x220] sm:$0xff] }
  0x25   :  { %331 = vmatmul.mubr.f32.vlgmr.msra.gmra.mxu1 %v16_v3  ;;  %672 = vmatprep.subr.mxu0 %v143_v4  ;;  %v131_v44 = vld [vmem:[%s1210_s1 + $0x218] sm:$0xff]  ;;  %v55_v45 = vld [vmem:[%s1211_s0 + $0x148] sm:$0xff]  ;;  %v54_v47 = vld [vmem:[%s1211_s0 + $0x140] sm:$0xff] }
  0x26   :  { %220 = vmatprep.mubr.f32.mxu0 %v20_v5  ;;  %673 = vmatpush3.msra.mxu0 %v143_v4  ;;  %v57_v46 = vld [vmem:[%s1211_s0 + $0x158] sm:$0xff]  ;;  %v56_v48 = vld [vmem:[%s1211_s0 + $0x150] sm:$0xff]  ;;  %v62_v51 = vld [vmem:[%s1211_s0 + $0x180] sm:$0xff] }
  0x27   :  { %335 = vmatprep.mubr.f32.mxu1 %v22_v6  ;;  %674 = vmatprep.subr.mxu0 %v142_v7  ;;  %v130_v49 = vld [vmem:[%s1210_s1 + $0x210] sm:$0xff]  ;;  %v129_v52 = vld [vmem:[%s1210_s1 + $0x208] sm:$0xff]  ;;  %v61_v54 = vld [vmem:[%s1211_s0 + $0x178] sm:$0xff] }
  0x28   :  { %719 = vmatprep.subr.mxu1 %v143_v4  ;;  %221 = vmatmul.mubr.f32.gmra.mxu0 %v19_v8  ;;  %v60_v50 = vld [vmem:[%s1211_s0 + $0x170] sm:$0xff]  ;;  %v59_v53 = vld [vmem:[%s1211_s0 + $0x168] sm:$0xff]  ;;  %v128_v55 = vld [vmem:[%s1210_s1 + $0x200] sm:$0xff] }
  0x29   :  { %336 = vmatmul.mubr.f32.gmra.mxu1 %v21_v9  ;;  %675 = vmatpush3.msra.mxu0 %v142_v7  ;;  %v18_v56 = vld [vmem:[%s1211_s0 + $0x20] sm:$0xff]  ;;  %v48_v57 = vld [vmem:[%s1211_s0 + $0x110] sm:$0xff]  ;;  %v23_v58 = vld [vmem:[%s1211_s0 + $0x48] sm:$0xff] }
  0x2a   :  { %735 = vmatpush3.msra.mxu1 %v143_v4  ;;  %676 = vmatprep.subr.mxu0 %v141_v10  ;;  %v53_v59 = vld [vmem:[%s1211_s0 + $0x138] sm:$0xff]  ;;  %v28_v60 = vld [vmem:[%s1211_s0 + $0x70] sm:$0xff]  ;;  %v58_v61 = vld [vmem:[%s1211_s0 + $0x160] sm:$0xff] }
  0x2b   :  { %225 = vmatprep.mubr.f32.mxu0 %v25_v11  ;;  %677 = vmatpush3.msra.mxu0 %v141_v10  ;;  %v33_v62 = vld [vmem:[%s1211_s0 + $0x98] sm:$0xff]  ;;  %v63_v63 = vld [vmem:[%s1211_s0 + $0x188] sm:$0xff]  ;;  %v38_v0 = vld [vmem:[%s1211_s0 + $0xc0] sm:$0xff] }
  0x2c   :  { %340 = vmatprep.mubr.f32.mxu1 %v27_v12  ;;  %720 = vmatprep.subr.mxu1 %v142_v7  ;;  %v43_v1 = vld [vmem:[%s1211_s0 + $0xe8] sm:$0xff] }
  0x2d   :  { %226 = vmatmul.mubr.f32.gmra.mxu0 %v24_v13  ;;  %341 = vmatmul.mubr.f32.gmra.mxu1 %v26_v14 }
  0x2e   :  { %678 = vmatprep.subr.mxu0 %v140_v15  ;;  %736 = vmatpush3.msra.mxu1 %v142_v7 }
  0x2f   :  { %679 = vmatpush3.msra.mxu0 %v140_v15  ;;  %721 = vmatprep.subr.mxu1 %v141_v10 }
  0x30   :  { %680 = vmatprep.subr.mxu0 %v139_v16  ;;  %737 = vmatpush3.msra.mxu1 %v141_v10 }
  0x31   :  { %230 = vmatprep.mubr.f32.mxu0 %v30_v17  ;;  %345 = vmatprep.mubr.f32.mxu1 %v32_v18 }
  0x32   :  { %681 = vmatpush3.msra.mxu0 %v139_v16  ;;  %346 = vmatmul.mubr.f32.gmra.mxu1 %v31_v20 }
  0x33   :  { %231 = vmatmul.mubr.f32.gmra.mxu0 %v29_v19  ;;  %722 = vmatprep.subr.mxu1 %v140_v15 }
  0x34   :  { %682 = vmatprep.subr.mxu0 %v138_v21  ;;  %738 = vmatpush3.msra.mxu1 %v140_v15 }
  0x35   :  { %683 = vmatpush3.msra.mxu0 %v138_v21  ;;  %723 = vmatprep.subr.mxu1 %v139_v16 }
  0x36   :  { %235 = vmatprep.mubr.f32.mxu0 %v35_v22  ;;  %350 = vmatprep.mubr.f32.mxu1 %v37_v23 }
  0x37   :  { %739 = vmatpush3.msra.mxu1 %v139_v16  ;;  %684 = vmatprep.subr.mxu0 %v137_v24 }
  0x38   :  { %236 = vmatmul.mubr.f32.gmra.mxu0 %v34_v25  ;;  %351 = vmatmul.mubr.f32.gmra.mxu1 %v36_v26 }
  0x39   :  { %685 = vmatpush3.msra.mxu0 %v137_v24  ;;  %724 = vmatprep.subr.mxu1 %v138_v21 }
  0x3a   :  { %686 = vmatprep.subr.mxu0 %v136_v27  ;;  %740 = vmatpush3.msra.mxu1 %v138_v21 }
  0x3b   :  { %240 = vmatprep.mubr.f32.mxu0 %v40_v28  ;;  %355 = vmatprep.mubr.f32.mxu1 %v42_v29 }
  0x3c   :  { %725 = vmatprep.subr.mxu1 %v137_v24  ;;  %687 = vmatpush3.msra.mxu0 %v136_v27 }
  0x3d   :  { %356 = vmatmul.mubr.f32.gmra.mxu1 %v41_v30  ;;  %241 = vmatmul.mubr.f32.gmra.mxu0 %v39_v31 }
  0x3e   :  { %741 = vmatpush3.msra.mxu1 %v137_v24  ;;  %688 = vmatprep.subr.mxu0 %v135_v32 }
  0x3f   :  { %726 = vmatprep.subr.mxu1 %v136_v27  ;;  %689 = vmatpush3.msra.mxu0 %v135_v32 }
  0x40   :  { %245 = vmatprep.mubr.f32.mxu0 %v45_v33  ;;  %360 = vmatprep.mubr.f32.mxu1 %v47_v34 }
  0x41   :  { %742 = vmatpush3.msra.mxu1 %v136_v27  ;;  %690 = vmatprep.subr.mxu0 %v134_v35 }
  0x42   :  { %246 = vmatmul.mubr.f32.gmra.mxu0 %v44_v36  ;;  %361 = vmatmul.mubr.f32.gmra.mxu1 %v46_v37  ;;  %v521_v37 = vld [vmem:[%s1212_s2] ss:$0 sm:$0xff] }
  0x43   :  { %727 = vmatprep.subr.mxu1 %v135_v32  ;;  %691 = vmatpush3.msra.mxu0 %v134_v35 }
  0x44   :  { %743 = vmatpush3.msra.mxu1 %v135_v32  ;;  %692 = vmatprep.subr.mxu0 %v133_v38 }
  0x45   :  { %728 = vmatprep.subr.mxu1 %v134_v35  ;;  %693 = vmatpush3.msra.mxu0 %v133_v38 }
  0x46   :  { %250 = vmatprep.mubr.f32.mxu0 %v50_v39  ;;  %365 = vmatprep.mubr.f32.mxu1 %v52_v40 }
  0x47   :  { %744 = vmatpush3.msra.mxu1 %v134_v35  ;;  %251 = vmatmul.mubr.f32.gmra.mxu0 %v49_v41 }
  0x48   :  { %366 = vmatmul.mubr.f32.gmra.mxu1 %v51_v42  ;;  %729 = vmatprep.subr.mxu1 %v133_v38 }
  0x49   :  { %694 = vmatprep.subr.mxu0 %v132_v43  ;;  %745 = vmatpush3.msra.mxu1 %v133_v38 }
  0x4a   :  { %695 = vmatpush3.msra.mxu0 %v132_v43  ;;  %730 = vmatprep.subr.mxu1 %v132_v43 }
  0x4b   :  { %696 = vmatprep.subr.mxu0 %v131_v44  ;;  %255 = vmatprep.mubr.f32.mxu0 %v55_v45 }
  0x4c   :  { %370 = vmatprep.mubr.f32.mxu1 %v57_v46  ;;  %746 = vmatpush3.msra.mxu1 %v132_v43 }
  0x4d   :  { %697 = vmatpush3.msra.mxu0 %v131_v44  ;;  %371 = vmatmul.mubr.f32.gmra.mxu1 %v56_v48 }
  0x4e   :  { %256 = vmatmul.mubr.f32.gmra.mxu0 %v54_v47  ;;  %731 = vmatprep.subr.mxu1 %v131_v44 }
  0x4f   :  { %698 = vmatprep.subr.mxu0 %v130_v49  ;;  %747 = vmatpush3.msra.mxu1 %v131_v44 }
  0x50   :  { %699 = vmatpush3.msra.mxu0 %v130_v49  ;;  %732 = vmatprep.subr.mxu1 %v130_v49 }
  0x51   :  { %260 = vmatprep.mubr.f32.mxu0 %v60_v50  ;;  %375 = vmatprep.mubr.f32.mxu1 %v62_v51 }
  0x52   :  { %748 = vmatpush3.msra.mxu1 %v130_v49  ;;  %700 = vmatprep.subr.mxu0 %v129_v52 }
  0x53   :  { %261 = vmatmul.mubr.f32.gmra.mxu0 %v59_v53  ;;  %376 = vmatmul.mubr.f32.gmra.mxu1 %v61_v54 }
  0x54   :  { %733 = vmatprep.subr.mxu1 %v129_v52  ;;  %701 = vmatpush3.msra.mxu0 %v129_v52 }
  0x55   :  { %749 = vmatpush3.msra.mxu1 %v129_v52  ;;  %702 = vmatprep.subr.mxu0 %v128_v55 }
  0x56   :  { %734 = vmatprep.subr.mxu1 %v128_v55  ;;  %703 = vmatpush3.msra.mxu0 %v128_v55 }
  0x57   :  { %750 = vmatpush3.msra.mxu1 %v128_v55  ;;  %704 = vmatprep.mubr.f32.mxu0 %v18_v56 }
  0x58   :  { %713 = vmatprep.mubr.f32.mxu1 %v48_v57  ;;  %705 = vmatmul.mubr.f32.vlgmr.msra.gmra.mxu0 %v23_v58 }
  0x59   :  { %714 = vmatmul.mubr.f32.vlgmr.msra.gmra.mxu1 %v53_v59  ;;  %707 = vmatprep.mubr.f32.mxu0 %v28_v60 }
  0x5a   :  { %716 = vmatprep.mubr.f32.mxu1 %v58_v61 }
  0x5c   :  { %708 = vmatmul.mubr.f32.gmra.mxu0 %v33_v62 }
  0x5d   :  { %717 = vmatmul.mubr.f32.gmra.mxu1 %v63_v63  ;;  %710 = vmatprep.mubr.f32.mxu0 %v38_v0 }
  0x60   :  { %711 = vmatmul.mubr.f32.gmra.mxu0 %v43_v1 }
  0xe4   :  { %v554_v2 = vpop.f32.mrf.mxu0 }
  0xe5   :  { %v616_v3 = vpop.f32.mrf.mxu1 }
  0xe6   :  { %v555_v4 = vpop.f32.mrf.mxu0 }
  0xe7   :  { %v617_v5 = vpop.f32.mrf.mxu1  ;;  %v556_v34 = vadd.f32 %v555_v4, %v554_v2 }
  0xe8   :  { %v557_v6 = vpop.f32.mrf.mxu0  ;;  %v618_v43 = vadd.f32 %v617_v5, %v616_v3 }
  0xe9   :  { %v619_v7 = vpop.f32.mrf.mxu1  ;;  %v218_v42 = vadd.f32 %v556_v34, %v521_v37 }
  0xea   :  { %v558_v8 = vpop.f32.mrf.mxu0 }
  0xeb   :  { %v620_v9 = vpop.f32.mrf.mxu1  ;;  %v559_v38 = vadd.f32 %v558_v8, %v557_v6  ;;  %v333_v59 = vadd.f32 %v618_v43, %v218_v42 }
  0xec   :  { %v621_v48 = vadd.f32 %v620_v9, %v619_v7 }
  0xed   :  { %v560_v10 = vpop.f32.mrf.mxu0  ;;  %v622_v11 = vpop.f32.mrf.mxu1  ;;  %v223_v47 = vadd.f32 %v559_v38, %v521_v37 }
  0xef   :  { %v561_v12 = vpop.f32.mrf.mxu0  ;;  %v623_v13 = vpop.f32.mrf.mxu1  ;;  %v338_v2 = vadd.f32 %v621_v48, %v223_v47 }
  0xf0   :  { %v562_v52 = vadd.f32 %v561_v12, %v560_v10  ;;  %v624_v0 = vadd.f32 %v623_v13, %v622_v11 }
  0xf2   :  { %v625_v15 = vpop.f32.mrf.mxu1  ;;  %v228_v4 = vadd.f32 %v562_v52, %v521_v37 }
  0xf3   :  { %v563_v14 = vpop.f32.mrf.mxu0 }
  0xf4   :  { %v626_v17 = vpop.f32.mrf.mxu1 }
  0xf5   :  { %v564_v16 = vpop.f32.mrf.mxu0  ;;  %v627_v61 = vadd.f32 %v626_v17, %v625_v15 }
  0xf6   :  { %v565_v45 = vadd.f32 %v564_v16, %v563_v14 }
  0xf8   :  { %v566_v18 = vpop.f32.mrf.mxu0  ;;  %v1161_v19 = vpop.f32.mrf.mxu1  ;;  %v233_v60 = vadd.f32 %v565_v45, %v521_v37 }
  0xfa   :  { %v567_v20 = vpop.f32.mrf.mxu0  ;;  %v1163_v21 = vpop.f32.mrf.mxu1 }
  0xfb   :  { %v568_v5 = vadd.f32 %v567_v20, %v566_v18  ;;  %v630_v18 = vadd.f32 %v1163_v21, %v1161_v19 }
  0xfd   :  { %v631_v22 = vpop.f32.mrf.mxu1  ;;  %v569_v23 = vpop.f32.mrf.mxu0 }
  0xff   :  { %v632_v24 = vpop.f32.mrf.mxu1  ;;  %v570_v25 = vpop.f32.mrf.mxu0 }
 0x100   :  { %v571_v62 = vadd.f32 %v570_v25, %v569_v23  ;;  %v348_v23 = vadd.f32 %v627_v61, %v233_v60 }
 0x102   :  { %v572_v26 = vpop.f32.mrf.mxu0  ;;  %v634_v27 = vpop.f32.mrf.mxu1 }
 0x104   :  { %v573_v28 = vpop.f32.mrf.mxu0  ;;  %v635_v29 = vpop.f32.mrf.mxu1 }
 0x105   :  { %v574_v44 = vadd.f32 %v573_v28, %v572_v26  ;;  %v636_v56 = vadd.f32 %v635_v29, %v634_v27  ;;  %v243_v26 = vadd.f32 %v571_v62, %v521_v37  ;;  %v633_v27 = vadd.f32 %v632_v24, %v631_v22 }
 0x106   :  { %v238_v29 = vadd.f32 %v568_v5, %v521_v37 }
 0x107   :  { %v575_v30 = vpop.f32.mrf.mxu0  ;;  %v248_v55 = vadd.f32 %v574_v44, %v521_v37  ;;  %v358_v21 = vadd.f32 %v633_v27, %v243_v26 }
 0x108   :  { %v637_v31 = vpop.f32.mrf.mxu1  ;;  %v353_v44 = vadd.f32 %v630_v18, %v238_v29 }
 0x109   :  { %v576_v32 = vpop.f32.mrf.mxu0  ;;  %v363_v14 = vadd.f32 %v636_v56, %v248_v55 }
 0x10a   :  { %v638_v33 = vpop.f32.mrf.mxu1  ;;  %v577_v39 = vadd.f32 %v576_v32, %v575_v30 }
 0x10b   :  { %v639_v50 = vadd.f32 %v638_v33, %v637_v31  ;;  %v343_v31 = vadd.f32 %v624_v0, %v228_v4 }
 0x10c   :  { %v253_v49 = vadd.f32 %v577_v39, %v521_v37 }
 0x10d   :  { %v640_v36 = vpop.f32.mrf.mxu1 }
 0x10e   :  { %v578_v35 = vpop.f32.mrf.mxu0  ;;  %v368_v3 = vadd.f32 %v639_v50, %v253_v49 }
 0x10f   :  { %v641_v41 = vpop.f32.mrf.mxu1 }
 0x110   :  { %v579_v40 = vpop.f32.mrf.mxu0  ;;  %v642_v7 = vadd.f32 %v641_v41, %v640_v36 }
 0x111   :  { %v580_v53 = vadd.f32 %v579_v40, %v578_v35 }
 0x113   :  { %v581_v46 = vpop.f32.mrf.mxu0  ;;  %v643_v51 = vpop.f32.mrf.mxu1  ;;  %v258_v6 = vadd.f32 %v580_v53, %v521_v37 }
 0x115   :  { %v582_v54 = vpop.f32.mrf.mxu0  ;;  %v644_v58 = vpop.f32.mrf.mxu1  ;;  %v373_v32 = vadd.f32 %v642_v7, %v258_v6 }
 0x116   :  { %v583_v57 = vadd.f32 %v582_v54, %v581_v46  ;;  %v645_v63 = vadd.f32 %v644_v58, %v643_v51 }
 0x118   :  { %v263_v1 = vadd.f32 %v583_v57, %v521_v37  ;;  %v706_v8 = vpop.f32.mrf.mxu0 }
 0x119   :  { %v715_v9 = vpop.f32.mrf.mxu1  ;;  %v453_v10 = vadd.f32 %v706_v8, %v338_v2 }
 0x11a   :  { %v483_v12 = vadd.f32 %v715_v9, %v368_v3  ;;  %v378_v16 = vadd.f32 %v645_v63, %v263_v1  ;;  %v447_v15 = vpop.f32.mrf.mxu0 }
 0x11b   :  { %v477_v17 = vpop.f32.mrf.mxu1  ;;  %v497_v11 = vmax.f32 %v453_v10, 0.0  ;;  %v448_v25 = vadd.f32 %v447_v15, %v333_v59 }
 0x11c   :  { %v503_v13 = vmax.f32 %v483_v12, 0.0  ;;  %v478_v28 = vadd.f32 %v477_v17, %v363_v14  ;;  %v709_v20 = vpop.f32.mrf.mxu0 }
 0x11d   :  { %v718_v30 = vpop.f32.mrf.mxu1  ;;  %508 = vst.msk [vmem:[%s1213_s3 + $0x8] sm:$0xff] %vm506_vm0, %v497_v11  ;;  %v496_v22 = vmax.f32 %v448_v25, 0.0  ;;  %v463_v33 = vadd.f32 %v709_v20, %v348_v23 }
 0x11e   :  { %514 = vst.msk [vmem:[%s1213_s3 + $0x38] sm:$0xff] %vm506_vm0, %v503_v13  ;;  %v502_v24 = vmax.f32 %v478_v28, 0.0  ;;  %v493_v34 = vadd.f32 %v718_v30, %v378_v16  ;;  %v457_v35 = vpop.f32.mrf.mxu0 }
 0x11f   :  { %v487_v19 = vpop.f32.mrf.mxu1  ;;  %507 = vst.msk [vmem:[%s1213_s3] sm:$0xff] %vm506_vm0, %v496_v22  ;;  %v499_v36 = vmax.f32 %v463_v33, 0.0  ;;  %v458_v38 = vadd.f32 %v457_v35, %v343_v31 }
 0x120   :  { %513 = vst.msk [vmem:[%s1213_s3 + $0x30] sm:$0xff] %vm506_vm0, %v502_v24  ;;  %v505_v37 = vmax.f32 %v493_v34, 0.0  ;;  %v488_v39 = vadd.f32 %v487_v19, %v373_v32  ;;  %v712_v40 = vpop.f32.mrf.mxu0 }
 0x121   :  { %510 = vst.msk [vmem:[%s1213_s3 + $0x18] sm:$0xff] %vm506_vm0, %v499_v36  ;;  %v498_v41 = vmax.f32 %v458_v38, 0.0  ;;  %v473_v43 = vadd.f32 %v712_v40, %v358_v21 }
 0x122   :  { %516 = vst.msk [vmem:[%s1213_s3 + $0x48] sm:$0xff] %vm506_vm0, %v505_v37  ;;  %v504_v42 = vmax.f32 %v488_v39, 0.0  ;;  %v467_v45 = vpop.f32.mrf.mxu0 }
 0x123   :  { %509 = vst.msk [vmem:[%s1213_s3 + $0x10] sm:$0xff] %vm506_vm0, %v498_v41  ;;  %v501_v46 = vmax.f32 %v473_v43, 0.0  ;;  %v468_v47 = vadd.f32 %v467_v45, %v353_v44 }
 0x124   :  { %515 = vst.msk [vmem:[%s1213_s3 + $0x40] sm:$0xff] %vm506_vm0, %v504_v42 }
 0x125   :  { %512 = vst.msk [vmem:[%s1213_s3 + $0x28] sm:$0xff] %vm506_vm0, %v501_v46  ;;  %v500_v48 = vmax.f32 %v468_v47, 0.0 }
 0x127   :  { %511 = vst.msk [vmem:[%s1213_s3 + $0x20] sm:$0xff] %vm506_vm0, %v500_v48 }

// kernel: reference_encoder_forward.12
= control target key start
LH: loop header
LB: loop body
LE: loop exit
PB: predicated region body
PF: predicated region fallthrough
CT: control target
= control target key end

     0   :  { %vm544_vm0 = vmmov 0   ;;  %s897_s1 = inlined_call_operand.vmem [shape: f32[640,128], index: 1, kind: input, shape index: {}]   ;;  %s898_s0 = inlined_call_operand.vmem [shape: f32[24,640], index: 0, kind: input, shape index: {}]   ;;  %s899_s2 = inlined_call_operand.vmem [shape: f32[1,128], index: 2, kind: input, shape index: {}]   ;;  %s900_s3 = inlined_call_operand.vmem [shape: f32[24,128], index: 3, kind: output, shape index: {}]  }
   0x1   :  { %v60_v0 = vld [vmem:[%s897_s1 + $0xf8] sm:$0xff]  ;;  %v59_v4 = vld [vmem:[%s897_s1 + $0xf0] sm:$0xff]  ;;  %v58_v8 = vld [vmem:[%s897_s1 + $0xe8] sm:$0xff] }
   0x2   :  { %v92_v1 = vld [vmem:[%s897_s1 + $0x1f8] sm:$0xff]  ;;  %367 = vmatprep.subr.mxu0 %v60_v0  ;;  %v91_v5 = vld [vmem:[%s897_s1 + $0x1f0] sm:$0xff]  ;;  %v90_v9 = vld [vmem:[%s897_s1 + $0x1e8] sm:$0xff] }
   0x3   :  { %v44_v2 = vld [vmem:[%s897_s1 + $0x78] sm:$0xff]  ;;  %408 = vmatprep.subr.mxu1 %v92_v1  ;;  %v43_v6 = vld [vmem:[%s897_s1 + $0x70] sm:$0xff]  ;;  %v42_v10 = vld [vmem:[%s897_s1 + $0x68] sm:$0xff] }
   0x4   :  { %v76_v3 = vld [vmem:[%s897_s1 + $0x178] sm:$0xff]  ;;  %368 = vmatpush3.msra.mxu0 %v44_v2  ;;  %v75_v7 = vld [vmem:[%s897_s1 + $0x170] sm:$0xff]  ;;  %v74_v11 = vld [vmem:[%s897_s1 + $0x168] sm:$0xff] }
   0x5   :  { %409 = vmatpush3.msra.mxu1 %v76_v3  ;;  %369 = vmatprep.subr.mxu0 %v59_v4  ;;  %v57_v12 = vld [vmem:[%s897_s1 + $0xe0] sm:$0xff]  ;;  %v56_v16 = vld [vmem:[%s897_s1 + $0xd8] sm:$0xff]  ;;  %v55_v20 = vld [vmem:[%s897_s1 + $0xd0] sm:$0xff] }
   0x6   :  { %410 = vmatprep.subr.mxu1 %v91_v5  ;;  %370 = vmatpush3.msra.mxu0 %v43_v6  ;;  %v89_v13 = vld [vmem:[%s897_s1 + $0x1e0] sm:$0xff]  ;;  %v88_v17 = vld [vmem:[%s897_s1 + $0x1d8] sm:$0xff]  ;;  %v87_v21 = vld [vmem:[%s897_s1 + $0x1d0] sm:$0xff]  ;;  %v543_v5 = vmov 0.0  }
   0x7   :  { %411 = vmatpush3.msra.mxu1 %v75_v7  ;;  %371 = vmatprep.subr.mxu0 %v58_v8  ;;  %v41_v14 = vld [vmem:[%s897_s1 + $0x60] sm:$0xff]  ;;  %v40_v18 = vld [vmem:[%s897_s1 + $0x58] sm:$0xff]  ;;  %v39_v22 = vld [vmem:[%s897_s1 + $0x50] sm:$0xff] }
   0x8   :  { %412 = vmatprep.subr.mxu1 %v90_v9  ;;  %v73_v15 = vld [vmem:[%s897_s1 + $0x160] sm:$0xff]  ;;  %372 = vmatpush3.msra.mxu0 %v42_v10  ;;  %v72_v19 = vld [vmem:[%s897_s1 + $0x158] sm:$0xff]  ;;  %v71_v23 = vld [vmem:[%s897_s1 + $0x150] sm:$0xff] }
   0x9   :  { %413 = vmatpush3.msra.mxu1 %v74_v11  ;;  %373 = vmatprep.subr.mxu0 %v57_v12  ;;  %v54_v24 = vld [vmem:[%s897_s1 + $0xc8] sm:$0xff]  ;;  %v53_v28 = vld [vmem:[%s897_s1 + $0xc0] sm:$0xff]  ;;  %v52_v32 = vld [vmem:[%s897_s1 + $0xb8] sm:$0xff] }
   0xa   :  { %414 = vmatprep.subr.mxu1 %v89_v13  ;;  %374 = vmatpush3.msra.mxu0 %v41_v14  ;;  %v86_v25 = vld [vmem:[%s897_s1 + $0x1c8] sm:$0xff]  ;;  %v85_v29 = vld [vmem:[%s897_s1 + $0x1c0] sm:$0xff]  ;;  %v84_v33 = vld [vmem:[%s897_s1 + $0x1b8] sm:$0xff] }
   0xb   :  { %415 = vmatpush3.msra.mxu1 %v73_v15  ;;  %375 = vmatprep.subr.mxu0 %v56_v16  ;;  %v38_v26 = vld [vmem:[%s897_s1 + $0x48] sm:$0xff]  ;;  %v37_v30 = vld [vmem:[%s897_s1 + $0x40] sm:$0xff]  ;;  %v36_v34 = vld [vmem:[%s897_s1 + $0x38] sm:$0xff] }
   0xc   :  { %416 = vmatprep.subr.mxu1 %v88_v17  ;;  %376 = vmatpush3.msra.mxu0 %v40_v18  ;;  %v70_v27 = vld [vmem:[%s897_s1 + $0x148] sm:$0xff]  ;;  %v69_v31 = vld [vmem:[%s897_s1 + $0x140] sm:$0xff]  ;;  %v68_v35 = vld [vmem:[%s897_s1 + $0x138] sm:$0xff] }
   0xd   :  { %417 = vmatpush3.msra.mxu1 %v72_v19  ;;  %377 = vmatprep.subr.mxu0 %v55_v20  ;;  %v51_v36 = vld [vmem:[%s897_s1 + $0xb0] sm:$0xff]  ;;  %v50_v40 = vld [vmem:[%s897_s1 + $0xa8] sm:$0xff]  ;;  %v49_v44 = vld [vmem:[%s897_s1 + $0xa0] sm:$0xff] }
   0xe   :  { %418 = vmatprep.subr.mxu1 %v87_v21  ;;  %378 = vmatpush3.msra.mxu0 %v39_v22  ;;  %v83_v37 = vld [vmem:[%s897_s1 + $0x1b0] sm:$0xff]  ;;  %v82_v41 = vld [vmem:[%s897_s1 + $0x1a8] sm:$0xff]  ;;  %v81_v45 = vld [vmem:[%s897_s1 + $0x1a0] sm:$0xff] }
   0xf   :  { %419 = vmatpush3.msra.mxu1 %v71_v23  ;;  %379 = vmatprep.subr.mxu0 %v54_v24  ;;  %v35_v38 = vld [vmem:[%s897_s1 + $0x30] sm:$0xff]  ;;  %v34_v42 = vld [vmem:[%s897_s1 + $0x28] sm:$0xff]  ;;  %v33_v46 = vld [vmem:[%s897_s1 + $0x20] sm:$0xff] }
  0x10   :  { %420 = vmatprep.subr.mxu1 %v86_v25  ;;  %380 = vmatpush3.msra.mxu0 %v38_v26  ;;  %v67_v39 = vld [vmem:[%s897_s1 + $0x130] sm:$0xff]  ;;  %v66_v43 = vld [vmem:[%s897_s1 + $0x128] sm:$0xff]  ;;  %v65_v47 = vld [vmem:[%s897_s1 + $0x120] sm:$0xff] }
  0x11   :  { %421 = vmatpush3.msra.mxu1 %v70_v27  ;;  %381 = vmatprep.subr.mxu0 %v53_v28  ;;  %v48_v48 = vld [vmem:[%s897_s1 + $0x98] sm:$0xff]  ;;  %v47_v52 = vld [vmem:[%s897_s1 + $0x90] sm:$0xff]  ;;  %v46_v56 = vld [vmem:[%s897_s1 + $0x88] sm:$0xff] }
  0x12   :  { %422 = vmatprep.subr.mxu1 %v85_v29  ;;  %382 = vmatpush3.msra.mxu0 %v37_v30  ;;  %v80_v49 = vld [vmem:[%s897_s1 + $0x198] sm:$0xff]  ;;  %v79_v53 = vld [vmem:[%s897_s1 + $0x190] sm:$0xff]  ;;  %v78_v57 = vld [vmem:[%s897_s1 + $0x188] sm:$0xff] }
  0x13   :  { %423 = vmatpush3.msra.mxu1 %v69_v31  ;;  %383 = vmatprep.subr.mxu0 %v52_v32  ;;  %v32_v50 = vld [vmem:[%s897_s1 + $0x18] sm:$0xff]  ;;  %v31_v54 = vld [vmem:[%s897_s1 + $0x10] sm:$0xff]  ;;  %v30_v58 = vld [vmem:[%s897_s1 + $0x8] sm:$0xff] }
  0x14   :  { %424 = vmatprep.subr.mxu1 %v84_v33  ;;  %384 = vmatpush3.msra.mxu0 %v36_v34  ;;  %v64_v51 = vld [vmem:[%s897_s1 + $0x118] sm:$0xff]  ;;  %v63_v55 = vld [vmem:[%s897_s1 + $0x110] sm:$0xff]  ;;  %v62_v59 = vld [vmem:[%s897_s1 + $0x108] sm:$0xff] }
  0x15   :  { %425 = vmatpush3.msra.mxu1 %v68_v35  ;;  %385 = vmatprep.subr.mxu0 %v51_v36  ;;  %v45_v60 = vld [vmem:[%s897_s1 + $0x80] sm:$0xff]  ;;  %v15_v63 = vld [vmem:[%s898_s0 + $0x8] sm:$0xff]  ;;  %v17_v1 = vld [vmem:[%s898_s0 + $0x18] sm:$0xff] }
  0x16   :  { %426 = vmatprep.subr.mxu1 %v83_v37  ;;  %386 = vmatpush3.msra.mxu0 %v35_v38  ;;  %v77_v61 = vld [vmem:[%s897_s1 + $0x180] sm:$0xff]  ;;  %v16_v3 = vld [vmem:[%s898_s0 + $0x10] sm:$0xff]  ;;  %v108_v4 = vld [vmem:[%s897_s1 + $0x278] sm:$0xff] }
  0x17   :  { %427 = vmatpush3.msra.mxu1 %v67_v39  ;;  %387 = vmatprep.subr.mxu0 %v50_v40  ;;  %v29_v62 = vld [vmem:[%s897_s1] sm:$0xff]  ;;  %v107_v6 = vld [vmem:[%s897_s1 + $0x270] sm:$0xff]  ;;  %v106_v7 = vld [vmem:[%s897_s1 + $0x268] sm:$0xff] }
  0x18   :  { %428 = vmatprep.subr.mxu1 %v82_v41  ;;  %388 = vmatpush3.msra.mxu0 %v34_v42  ;;  %v61_v0 = vld [vmem:[%s897_s1 + $0x100] sm:$0xff]  ;;  %v104_v9 = vld [vmem:[%s897_s1 + $0x258] sm:$0xff]  ;;  %v103_v10 = vld [vmem:[%s897_s1 + $0x250] sm:$0xff] }
  0x19   :  { %429 = vmatpush3.msra.mxu1 %v66_v43  ;;  %389 = vmatprep.subr.mxu0 %v49_v44  ;;  %v14_v2 = vld [vmem:[%s898_s0] sm:$0xff]  ;;  %v102_v11 = vld [vmem:[%s897_s1 + $0x248] sm:$0xff]  ;;  %v100_v13 = vld [vmem:[%s897_s1 + $0x238] sm:$0xff] }
  0x1a   :  { %430 = vmatprep.subr.mxu1 %v81_v45  ;;  %390 = vmatpush3.msra.mxu0 %v33_v46  ;;  %v105_v8 = vld [vmem:[%s897_s1 + $0x260] sm:$0xff]  ;;  %v20_v14 = vld [vmem:[%s898_s0 + $0x30] sm:$0xff]  ;;  %v19_v16 = vld [vmem:[%s898_s0 + $0x28] sm:$0xff] }
  0x1b   :  { %431 = vmatpush3.msra.mxu1 %v65_v47  ;;  %391 = vmatprep.subr.mxu0 %v48_v48  ;;  %v101_v12 = vld [vmem:[%s897_s1 + $0x240] sm:$0xff]  ;;  %v99_v15 = vld [vmem:[%s897_s1 + $0x230] sm:$0xff]  ;;  %v98_v18 = vld [vmem:[%s897_s1 + $0x228] sm:$0xff] }
  0x1c   :  { %432 = vmatprep.subr.mxu1 %v80_v49  ;;  %392 = vmatpush3.msra.mxu0 %v32_v50  ;;  %v22_v17 = vld [vmem:[%s898_s0 + $0x40] sm:$0xff]  ;;  %v21_v19 = vld [vmem:[%s898_s0 + $0x38] sm:$0xff]  ;;  %v24_v22 = vld [vmem:[%s898_s0 + $0x50] sm:$0xff] }
  0x1d   :  { %433 = vmatpush3.msra.mxu1 %v64_v51  ;;  %393 = vmatprep.subr.mxu0 %v47_v52  ;;  %v25_v20 = vld [vmem:[%s898_s0 + $0x58] sm:$0xff]  ;;  %v97_v21 = vld [vmem:[%s897_s1 + $0x220] sm:$0xff]  ;;  %v27_v23 = vld [vmem:[%s898_s0 + $0x68] sm:$0xff] }
  0x1e   :  { %434 = vmatprep.subr.mxu1 %v79_v53  ;;  %394 = vmatpush3.msra.mxu0 %v31_v54  ;;  %v96_v24 = vld [vmem:[%s897_s1 + $0x218] sm:$0xff]  ;;  %v26_v25 = vld [vmem:[%s898_s0 + $0x60] sm:$0xff]  ;;  %v95_v26 = vld [vmem:[%s897_s1 + $0x210] sm:$0xff] }
  0x1f   :  { %435 = vmatpush3.msra.mxu1 %v63_v55  ;;  %395 = vmatprep.subr.mxu0 %v46_v56  ;;  %v94_v27 = vld [vmem:[%s897_s1 + $0x208] sm:$0xff]  ;;  %v93_v28 = vld [vmem:[%s897_s1 + $0x200] sm:$0xff]  ;;  %v28_v31 = vld [vmem:[%s898_s0 + $0x70] sm:$0xff] }
  0x20   :  { %436 = vmatprep.subr.mxu1 %v78_v57  ;;  %396 = vmatpush3.msra.mxu0 %v30_v58  ;;  %v18_v29 = vld [vmem:[%s898_s0 + $0x20] sm:$0xff]  ;;  %v23_v30 = vld [vmem:[%s898_s0 + $0x48] sm:$0xff] }
  0x21   :  { %437 = vmatpush3.msra.mxu1 %v62_v59  ;;  %397 = vmatprep.subr.mxu0 %v45_v60  ;;  %v366_v43 = vld [vmem:[%s899_s2] ss:$0 sm:$0xff] }
  0x22   :  { %438 = vmatprep.subr.mxu1 %v77_v61  ;;  %398 = vmatpush3.msra.mxu0 %v29_v62 }
  0x23   :  { %180 = vmatprep.mubr.f32.mxu0 %v15_v63  ;;  %439 = vmatpush3.msra.mxu1 %v61_v0 }
  0x24   :  { %260 = vmatprep.mubr.f32.mxu1 %v17_v1  ;;  %181 = vmatmul.mubr.f32.vlgmr.msra.gmra.mxu0 %v14_v2 }
  0x25   :  { %261 = vmatmul.mubr.f32.vlgmr.msra.gmra.mxu1 %v16_v3  ;;  %468 = vmatprep.subr.mxu0 %v543_v5 }
  0x26   :  { %509 = vmatprep.subr.mxu1 %v543_v5  ;;  %469 = vmatpush3.msra.mxu0 %v108_v4 }
  0x27   :  { %525 = vmatpush3.msra.mxu1 %v108_v4  ;;  %470 = vmatprep.subr.mxu0 %v543_v5 }
  0x28   :  { %510 = vmatprep.subr.mxu1 %v543_v5  ;;  %471 = vmatpush3.msra.mxu0 %v107_v6 }
  0x29   :  { %526 = vmatpush3.msra.mxu1 %v107_v6  ;;  %472 = vmatprep.subr.mxu0 %v543_v5 }
  0x2a   :  { %511 = vmatprep.subr.mxu1 %v543_v5  ;;  %473 = vmatpush3.msra.mxu0 %v106_v7 }
  0x2b   :  { %527 = vmatpush3.msra.mxu1 %v106_v7  ;;  %474 = vmatprep.subr.mxu0 %v543_v5 }
  0x2c   :  { %512 = vmatprep.subr.mxu1 %v543_v5  ;;  %475 = vmatpush3.msra.mxu0 %v105_v8 }
  0x2d   :  { %528 = vmatpush3.msra.mxu1 %v105_v8  ;;  %476 = vmatprep.subr.mxu0 %v543_v5 }
  0x2e   :  { %513 = vmatprep.subr.mxu1 %v543_v5  ;;  %477 = vmatpush3.msra.mxu0 %v104_v9 }
  0x2f   :  { %529 = vmatpush3.msra.mxu1 %v104_v9  ;;  %478 = vmatprep.subr.mxu0 %v543_v5 }
  0x30   :  { %514 = vmatprep.subr.mxu1 %v543_v5  ;;  %479 = vmatpush3.msra.mxu0 %v103_v10 }
  0x31   :  { %530 = vmatpush3.msra.mxu1 %v103_v10  ;;  %480 = vmatprep.subr.mxu0 %v543_v5 }
  0x32   :  { %515 = vmatprep.subr.mxu1 %v543_v5  ;;  %481 = vmatpush3.msra.mxu0 %v102_v11 }
  0x33   :  { %531 = vmatpush3.msra.mxu1 %v102_v11  ;;  %482 = vmatprep.subr.mxu0 %v543_v5 }
  0x34   :  { %516 = vmatprep.subr.mxu1 %v543_v5  ;;  %483 = vmatpush3.msra.mxu0 %v101_v12 }
  0x35   :  { %532 = vmatpush3.msra.mxu1 %v101_v12  ;;  %484 = vmatprep.subr.mxu0 %v543_v5 }
  0x36   :  { %517 = vmatprep.subr.mxu1 %v543_v5  ;;  %485 = vmatpush3.msra.mxu0 %v100_v13 }
  0x37   :  { %533 = vmatpush3.msra.mxu1 %v100_v13  ;;  %486 = vmatprep.subr.mxu0 %v543_v5 }
  0x38   :  { %518 = vmatprep.subr.mxu1 %v543_v5  ;;  %185 = vmatprep.mubr.f32.mxu0 %v20_v14 }
  0x39   :  { %487 = vmatpush3.msra.mxu0 %v99_v15  ;;  %534 = vmatpush3.msra.mxu1 %v99_v15 }
  0x3a   :  { %186 = vmatmul.mubr.f32.gmra.mxu0 %v19_v16  ;;  %488 = vmatprep.subr.mxu0 %v543_v5 }
  0x3b   :  { %519 = vmatprep.subr.mxu1 %v543_v5  ;;  %265 = vmatprep.mubr.f32.mxu1 %v22_v17 }
  0x3c   :  { %489 = vmatpush3.msra.mxu0 %v98_v18  ;;  %535 = vmatpush3.msra.mxu1 %v98_v18 }
  0x3d   :  { %490 = vmatprep.subr.mxu0 %v543_v5  ;;  %266 = vmatmul.mubr.f32.gmra.mxu1 %v21_v19 }
  0x3e   :  { %520 = vmatprep.subr.mxu1 %v543_v5  ;;  %190 = vmatprep.mubr.f32.mxu0 %v25_v20 }
  0x3f   :  { %491 = vmatpush3.msra.mxu0 %v97_v21  ;;  %536 = vmatpush3.msra.mxu1 %v97_v21 }
  0x40   :  { %191 = vmatmul.mubr.f32.gmra.mxu0 %v24_v22  ;;  %492 = vmatprep.subr.mxu0 %v543_v5 }
  0x41   :  { %521 = vmatprep.subr.mxu1 %v543_v5  ;;  %270 = vmatprep.mubr.f32.mxu1 %v27_v23 }
  0x42   :  { %493 = vmatpush3.msra.mxu0 %v96_v24  ;;  %537 = vmatpush3.msra.mxu1 %v96_v24 }
  0x43   :  { %494 = vmatprep.subr.mxu0 %v543_v5  ;;  %271 = vmatmul.mubr.f32.gmra.mxu1 %v26_v25 }
  0x44   :  { %522 = vmatprep.subr.mxu1 %v543_v5  ;;  %495 = vmatpush3.msra.mxu0 %v95_v26 }
  0x45   :  { %538 = vmatpush3.msra.mxu1 %v95_v26  ;;  %496 = vmatprep.subr.mxu0 %v543_v5 }
  0x46   :  { %523 = vmatprep.subr.mxu1 %v543_v5  ;;  %497 = vmatpush3.msra.mxu0 %v94_v27 }
  0x47   :  { %539 = vmatpush3.msra.mxu1 %v94_v27  ;;  %498 = vmatprep.subr.mxu0 %v543_v5 }
  0x48   :  { %524 = vmatprep.subr.mxu1 %v543_v5  ;;  %499 = vmatpush3.msra.mxu0 %v93_v28 }
  0x49   :  { %540 = vmatpush3.msra.mxu1 %v93_v28  ;;  %500 = vmatprep.mubr.msk.f32.mxu0 %vm544_vm0, %v543_v5 }
  0x4a   :  { %503 = vmatprep.mubr.msk.f32.mxu1 %vm544_vm0, %v543_v5  ;;  %501 = vmatmul.mubr.f32.vlgmr.msra.gmra.mxu0 %v18_v29 }
  0x4b   :  { %504 = vmatmul.mubr.f32.vlgmr.msra.gmra.mxu1 %v23_v30 }
  0x4c   :  { %506 = vmatprep.mubr.msk.f32.mxu1 %vm544_vm0, %v543_v5 }
  0x4f   :  { %507 = vmatmul.mubr.f32.gmra.mxu1 %v28_v31 }
  0xe4   :  { %v399_v32 = vpop.f32.mrf.mxu0 }
  0xe5   :  { %v440_v33 = vpop.f32.mrf.mxu1 }
  0xe6   :  { %v400_v34 = vpop.f32.mrf.mxu0 }
  0xe7   :  { %v441_v36 = vpop.f32.mrf.mxu1  ;;  %v401_v41 = vadd.f32 %v400_v34, %v399_v32 }
  0xe8   :  { %v442_v51 = vadd.f32 %v441_v36, %v440_v33 }
  0xe9   :  { %v183_v46 = vadd.f32 %v401_v41, %v366_v43 }
  0xeb   :  { %v263_v54 = vadd.f32 %v442_v51, %v183_v46 }
  0xfa   :  { %v402_v35 = vpop.f32.mrf.mxu0 }
  0xfc   :  { %v403_v37 = vpop.f32.mrf.mxu0 }
  0xfd   :  { %v443_v38 = vpop.f32.mrf.mxu1  ;;  %v404_v42 = vadd.f32 %v403_v37, %v402_v35 }
  0xff   :  { %v444_v40 = vpop.f32.mrf.mxu1  ;;  %v188_v47 = vadd.f32 %v404_v42, %v366_v43 }
 0x100   :  { %v405_v39 = vpop.f32.mrf.mxu0  ;;  %v445_v48 = vadd.f32 %v444_v40, %v443_v38 }
 0x102   :  { %v406_v44 = vpop.f32.mrf.mxu0  ;;  %v268_v55 = vadd.f32 %v445_v48, %v188_v47 }
 0x103   :  { %v446_v45 = vpop.f32.mrf.mxu1  ;;  %v407_v49 = vadd.f32 %v406_v44, %v405_v39 }
 0x105   :  { %v447_v50 = vpop.f32.mrf.mxu1  ;;  %v193_v52 = vadd.f32 %v407_v49, %v366_v43 }
 0x106   :  { %v448_v53 = vadd.f32 %v447_v50, %v446_v45 }
 0x108   :  { %v273_v0 = vadd.f32 %v448_v53, %v193_v52 }
 0x10a   :  { %v342_v56 = vpop.f32.mrf.mxu0 }
 0x10b   :  { %v347_v57 = vpop.f32.mrf.mxu1  ;;  %v343_v58 = vadd.f32 %v342_v56, %v263_v54 }
 0x10c   :  { %v348_v59 = vadd.f32 %v347_v57, %v268_v55  ;;  %v502_v61 = vpop.f32.mrf.mxu0 }
 0x10d   :  { %v505_v60 = vpop.f32.mrf.mxu1  ;;  %v356_v62 = vmax.f32 %v343_v58, 0.0 }
 0x10e   :  { %v357_v63 = vmax.f32 %v348_v59, 0.0 }
 0x10f   :  { %v352_v1 = vpop.f32.mrf.mxu1  ;;  %359 = vst [vmem:[%s900_s3] sm:$0xff] %v356_v62 }
 0x110   :  { %360 = vst [vmem:[%s900_s3 + $0x8] sm:$0xff] %v357_v63  ;;  %v353_v2 = vadd.f32 %v352_v1, %v273_v0 }
 0x111   :  { %v508_v3 = vpop.f32.mrf.mxu1 }
 0x112   :  { %v358_v4 = vmax.f32 %v353_v2, 0.0 }
 0x114   :  { %361 = vst [vmem:[%s900_s3 + $0x10] sm:$0xff] %v358_v4 }

// kernel: reference_encoder_forward.13
= control target key start
LH: loop header
LB: loop body
LE: loop exit
PB: predicated region body
PF: predicated region fallthrough
CT: control target
= control target key end

     0   :  { %vm726_vm0 = vmmov 0   ;;  %s1212_s1 = inlined_call_operand.vmem [shape: f32[1152,128], index: 1, kind: input, shape index: {}]   ;;  %s1213_s0 = inlined_call_operand.vmem [shape: f32[8,1152], index: 0, kind: input, shape index: {}]   ;;  %s1214_s2 = inlined_call_operand.vmem [shape: f32[1,128], index: 2, kind: input, shape index: {}]   ;;  %s1215_s3 = inlined_call_operand.vmem [shape: f32[8,128], index: 3, kind: output, shape index: {}]  }
   0x1   :  { %v54_v0 = vld [vmem:[%s1212_s1 + $0xf8] sm:$0xff]  ;;  %v53_v2 = vld [vmem:[%s1212_s1 + $0xf0] sm:$0xff]  ;;  %v52_v6 = vld [vmem:[%s1212_s1 + $0xe8] sm:$0xff] }
   0x2   :  { %v38_v1 = vld [vmem:[%s1212_s1 + $0x78] sm:$0xff]  ;;  %531 = vmatprep.subr.mxu0 %v54_v0  ;;  %v37_v4 = vld [vmem:[%s1212_s1 + $0x70] sm:$0xff]  ;;  %v36_v8 = vld [vmem:[%s1212_s1 + $0x68] sm:$0xff] }
   0x3   :  { %v86_v3 = vld [vmem:[%s1212_s1 + $0x1f8] sm:$0xff]  ;;  %532 = vmatpush3.msra.mxu0 %v38_v1  ;;  %v85_v7 = vld [vmem:[%s1212_s1 + $0x1f0] sm:$0xff]  ;;  %v84_v10 = vld [vmem:[%s1212_s1 + $0x1e8] sm:$0xff] }
   0x4   :  { %v70_v5 = vld [vmem:[%s1212_s1 + $0x178] sm:$0xff]  ;;  %566 = vmatprep.subr.mxu1 %v86_v3  ;;  %533 = vmatprep.subr.mxu0 %v53_v2  ;;  %v69_v9 = vld [vmem:[%s1212_s1 + $0x170] sm:$0xff]  ;;  %v51_v11 = vld [vmem:[%s1212_s1 + $0xe0] sm:$0xff] }
   0x5   :  { %567 = vmatpush3.msra.mxu1 %v70_v5  ;;  %534 = vmatpush3.msra.mxu0 %v37_v4  ;;  %v68_v12 = vld [vmem:[%s1212_s1 + $0x168] sm:$0xff]  ;;  %v35_v13 = vld [vmem:[%s1212_s1 + $0x60] sm:$0xff]  ;;  %v50_v15 = vld [vmem:[%s1212_s1 + $0xd8] sm:$0xff] }
   0x6   :  { %568 = vmatprep.subr.mxu1 %v85_v7  ;;  %535 = vmatprep.subr.mxu0 %v52_v6  ;;  %v83_v14 = vld [vmem:[%s1212_s1 + $0x1e0] sm:$0xff]  ;;  %v34_v17 = vld [vmem:[%s1212_s1 + $0x58] sm:$0xff]  ;;  %v49_v19 = vld [vmem:[%s1212_s1 + $0xd0] sm:$0xff] }
   0x7   :  { %569 = vmatpush3.msra.mxu1 %v69_v9  ;;  %536 = vmatpush3.msra.mxu0 %v36_v8  ;;  %v67_v16 = vld [vmem:[%s1212_s1 + $0x160] sm:$0xff]  ;;  %v82_v18 = vld [vmem:[%s1212_s1 + $0x1d8] sm:$0xff]  ;;  %v33_v21 = vld [vmem:[%s1212_s1 + $0x50] sm:$0xff] }
   0x8   :  { %570 = vmatprep.subr.mxu1 %v84_v10  ;;  %537 = vmatprep.subr.mxu0 %v51_v11  ;;  %v66_v20 = vld [vmem:[%s1212_s1 + $0x158] sm:$0xff]  ;;  %v81_v22 = vld [vmem:[%s1212_s1 + $0x1d0] sm:$0xff]  ;;  %v48_v23 = vld [vmem:[%s1212_s1 + $0xc8] sm:$0xff] }
   0x9   :  { %571 = vmatpush3.msra.mxu1 %v68_v12  ;;  %538 = vmatpush3.msra.mxu0 %v35_v13  ;;  %v65_v24 = vld [vmem:[%s1212_s1 + $0x150] sm:$0xff]  ;;  %v32_v25 = vld [vmem:[%s1212_s1 + $0x48] sm:$0xff]  ;;  %v47_v27 = vld [vmem:[%s1212_s1 + $0xc0] sm:$0xff] }
   0xa   :  { %572 = vmatprep.subr.mxu1 %v83_v14  ;;  %539 = vmatprep.subr.mxu0 %v50_v15  ;;  %v80_v26 = vld [vmem:[%s1212_s1 + $0x1c8] sm:$0xff]  ;;  %v31_v29 = vld [vmem:[%s1212_s1 + $0x40] sm:$0xff]  ;;  %v46_v31 = vld [vmem:[%s1212_s1 + $0xb8] sm:$0xff] }
   0xb   :  { %573 = vmatpush3.msra.mxu1 %v67_v16  ;;  %540 = vmatpush3.msra.mxu0 %v34_v17  ;;  %v64_v28 = vld [vmem:[%s1212_s1 + $0x148] sm:$0xff]  ;;  %v79_v30 = vld [vmem:[%s1212_s1 + $0x1c0] sm:$0xff]  ;;  %v30_v33 = vld [vmem:[%s1212_s1 + $0x38] sm:$0xff] }
   0xc   :  { %574 = vmatprep.subr.mxu1 %v82_v18  ;;  %541 = vmatprep.subr.mxu0 %v49_v19  ;;  %v63_v32 = vld [vmem:[%s1212_s1 + $0x140] sm:$0xff]  ;;  %v78_v34 = vld [vmem:[%s1212_s1 + $0x1b8] sm:$0xff]  ;;  %v45_v35 = vld [vmem:[%s1212_s1 + $0xb0] sm:$0xff] }
   0xd   :  { %575 = vmatpush3.msra.mxu1 %v66_v20  ;;  %542 = vmatpush3.msra.mxu0 %v33_v21  ;;  %v62_v36 = vld [vmem:[%s1212_s1 + $0x138] sm:$0xff]  ;;  %v29_v37 = vld [vmem:[%s1212_s1 + $0x30] sm:$0xff]  ;;  %v44_v39 = vld [vmem:[%s1212_s1 + $0xa8] sm:$0xff] }
   0xe   :  { %576 = vmatprep.subr.mxu1 %v81_v22  ;;  %543 = vmatprep.subr.mxu0 %v48_v23  ;;  %v77_v38 = vld [vmem:[%s1212_s1 + $0x1b0] sm:$0xff]  ;;  %v28_v41 = vld [vmem:[%s1212_s1 + $0x28] sm:$0xff]  ;;  %v43_v43 = vld [vmem:[%s1212_s1 + $0xa0] sm:$0xff] }
   0xf   :  { %577 = vmatpush3.msra.mxu1 %v65_v24  ;;  %544 = vmatpush3.msra.mxu0 %v32_v25  ;;  %v61_v40 = vld [vmem:[%s1212_s1 + $0x130] sm:$0xff]  ;;  %v76_v42 = vld [vmem:[%s1212_s1 + $0x1a8] sm:$0xff]  ;;  %v27_v45 = vld [vmem:[%s1212_s1 + $0x20] sm:$0xff] }
  0x10   :  { %578 = vmatprep.subr.mxu1 %v80_v26  ;;  %545 = vmatprep.subr.mxu0 %v47_v27  ;;  %v60_v44 = vld [vmem:[%s1212_s1 + $0x128] sm:$0xff]  ;;  %v75_v46 = vld [vmem:[%s1212_s1 + $0x1a0] sm:$0xff]  ;;  %v42_v47 = vld [vmem:[%s1212_s1 + $0x98] sm:$0xff] }
  0x11   :  { %579 = vmatpush3.msra.mxu1 %v64_v28  ;;  %546 = vmatpush3.msra.mxu0 %v31_v29  ;;  %v59_v48 = vld [vmem:[%s1212_s1 + $0x120] sm:$0xff]  ;;  %v26_v49 = vld [vmem:[%s1212_s1 + $0x18] sm:$0xff]  ;;  %v41_v51 = vld [vmem:[%s1212_s1 + $0x90] sm:$0xff] }
  0x12   :  { %580 = vmatprep.subr.mxu1 %v79_v30  ;;  %547 = vmatprep.subr.mxu0 %v46_v31  ;;  %v74_v50 = vld [vmem:[%s1212_s1 + $0x198] sm:$0xff]  ;;  %v25_v53 = vld [vmem:[%s1212_s1 + $0x10] sm:$0xff]  ;;  %v40_v55 = vld [vmem:[%s1212_s1 + $0x88] sm:$0xff] }
  0x13   :  { %581 = vmatpush3.msra.mxu1 %v63_v32  ;;  %548 = vmatpush3.msra.mxu0 %v30_v33  ;;  %v58_v52 = vld [vmem:[%s1212_s1 + $0x118] sm:$0xff]  ;;  %v73_v54 = vld [vmem:[%s1212_s1 + $0x190] sm:$0xff]  ;;  %v24_v57 = vld [vmem:[%s1212_s1 + $0x8] sm:$0xff] }
  0x14   :  { %582 = vmatprep.subr.mxu1 %v78_v34  ;;  %549 = vmatprep.subr.mxu0 %v45_v35  ;;  %v57_v56 = vld [vmem:[%s1212_s1 + $0x110] sm:$0xff]  ;;  %v72_v58 = vld [vmem:[%s1212_s1 + $0x188] sm:$0xff]  ;;  %v39_v59 = vld [vmem:[%s1212_s1 + $0x80] sm:$0xff] }
  0x15   :  { %583 = vmatpush3.msra.mxu1 %v62_v36  ;;  %550 = vmatpush3.msra.mxu0 %v29_v37  ;;  %v15_v60 = vld [vmem:[%s1213_s0 + $0x8] sm:$0xff]  ;;  %v23_v61 = vld [vmem:[%s1212_s1] sm:$0xff]  ;;  %v118_v1 = vld [vmem:[%s1212_s1 + $0x2f8] sm:$0xff] }
  0x16   :  { %584 = vmatprep.subr.mxu1 %v77_v38  ;;  %551 = vmatprep.subr.mxu0 %v44_v39  ;;  %v56_v62 = vld [vmem:[%s1212_s1 + $0x108] sm:$0xff]  ;;  %v14_v63 = vld [vmem:[%s1213_s0] sm:$0xff]  ;;  %v17_v3 = vld [vmem:[%s1213_s0 + $0x18] sm:$0xff] }
  0x17   :  { %585 = vmatpush3.msra.mxu1 %v61_v40  ;;  %552 = vmatpush3.msra.mxu0 %v28_v41  ;;  %v71_v0 = vld [vmem:[%s1212_s1 + $0x180] sm:$0xff]  ;;  %v102_v4 = vld [vmem:[%s1212_s1 + $0x278] sm:$0xff]  ;;  %v16_v5 = vld [vmem:[%s1213_s0 + $0x10] sm:$0xff] }
  0x18   :  { %586 = vmatprep.subr.mxu1 %v76_v42  ;;  %553 = vmatprep.subr.mxu0 %v43_v43  ;;  %v55_v2 = vld [vmem:[%s1212_s1 + $0x100] sm:$0xff]  ;;  %v117_v6 = vld [vmem:[%s1212_s1 + $0x2f0] sm:$0xff]  ;;  %v150_v7 = vld [vmem:[%s1212_s1 + $0x3f8] sm:$0xff] }
  0x19   :  { %587 = vmatpush3.msra.mxu1 %v60_v44  ;;  %554 = vmatpush3.msra.mxu0 %v27_v45  ;;  %v101_v8 = vld [vmem:[%s1212_s1 + $0x270] sm:$0xff]  ;;  %v134_v9 = vld [vmem:[%s1212_s1 + $0x378] sm:$0xff]  ;;  %v116_v10 = vld [vmem:[%s1212_s1 + $0x2e8] sm:$0xff] }
  0x1a   :  { %588 = vmatprep.subr.mxu1 %v75_v46  ;;  %555 = vmatprep.subr.mxu0 %v42_v47  ;;  %v149_v11 = vld [vmem:[%s1212_s1 + $0x3f0] sm:$0xff]  ;;  %v100_v12 = vld [vmem:[%s1212_s1 + $0x268] sm:$0xff]  ;;  %v115_v14 = vld [vmem:[%s1212_s1 + $0x2e0] sm:$0xff] }
  0x1b   :  { %589 = vmatpush3.msra.mxu1 %v59_v48  ;;  %556 = vmatpush3.msra.mxu0 %v26_v49  ;;  %v133_v13 = vld [vmem:[%s1212_s1 + $0x370] sm:$0xff]  ;;  %v148_v15 = vld [vmem:[%s1212_s1 + $0x3e8] sm:$0xff]  ;;  %v99_v16 = vld [vmem:[%s1212_s1 + $0x260] sm:$0xff] }
  0x1c   :  { %590 = vmatprep.subr.mxu1 %v74_v50  ;;  %557 = vmatprep.subr.mxu0 %v41_v51  ;;  %v132_v17 = vld [vmem:[%s1212_s1 + $0x368] sm:$0xff]  ;;  %v114_v18 = vld [vmem:[%s1212_s1 + $0x2d8] sm:$0xff]  ;;  %v147_v19 = vld [vmem:[%s1212_s1 + $0x3e0] sm:$0xff] }
  0x1d   :  { %591 = vmatpush3.msra.mxu1 %v58_v52  ;;  %558 = vmatpush3.msra.mxu0 %v25_v53  ;;  %v98_v20 = vld [vmem:[%s1212_s1 + $0x258] sm:$0xff]  ;;  %v131_v21 = vld [vmem:[%s1212_s1 + $0x360] sm:$0xff]  ;;  %v113_v22 = vld [vmem:[%s1212_s1 + $0x2d0] sm:$0xff] }
  0x1e   :  { %592 = vmatprep.subr.mxu1 %v73_v54  ;;  %559 = vmatprep.subr.mxu0 %v40_v55  ;;  %v146_v23 = vld [vmem:[%s1212_s1 + $0x3d8] sm:$0xff]  ;;  %v97_v24 = vld [vmem:[%s1212_s1 + $0x250] sm:$0xff]  ;;  %v112_v26 = vld [vmem:[%s1212_s1 + $0x2c8] sm:$0xff] }
  0x1f   :  { %593 = vmatpush3.msra.mxu1 %v57_v56  ;;  %560 = vmatpush3.msra.mxu0 %v24_v57  ;;  %v130_v25 = vld [vmem:[%s1212_s1 + $0x358] sm:$0xff]  ;;  %v145_v27 = vld [vmem:[%s1212_s1 + $0x3d0] sm:$0xff]  ;;  %v96_v28 = vld [vmem:[%s1212_s1 + $0x248] sm:$0xff] }
  0x20   :  { %594 = vmatprep.subr.mxu1 %v72_v58  ;;  %561 = vmatprep.subr.mxu0 %v39_v59  ;;  %v129_v29 = vld [vmem:[%s1212_s1 + $0x350] sm:$0xff]  ;;  %v111_v30 = vld [vmem:[%s1212_s1 + $0x2c0] sm:$0xff]  ;;  %v144_v31 = vld [vmem:[%s1212_s1 + $0x3c8] sm:$0xff] }
  0x21   :  { %238 = vmatprep.mubr.f32.mxu0 %v15_v60  ;;  %562 = vmatpush3.msra.mxu0 %v23_v61  ;;  %v95_v32 = vld [vmem:[%s1212_s1 + $0x240] sm:$0xff]  ;;  %v128_v33 = vld [vmem:[%s1212_s1 + $0x348] sm:$0xff]  ;;  %v110_v34 = vld [vmem:[%s1212_s1 + $0x2b8] sm:$0xff] }
  0x22   :  { %595 = vmatpush3.msra.mxu1 %v56_v62  ;;  %239 = vmatmul.mubr.f32.vlgmr.msra.gmra.mxu0 %v14_v63  ;;  %v143_v35 = vld [vmem:[%s1212_s1 + $0x3c0] sm:$0xff]  ;;  %v94_v36 = vld [vmem:[%s1212_s1 + $0x238] sm:$0xff]  ;;  %v109_v38 = vld [vmem:[%s1212_s1 + $0x2b0] sm:$0xff] }
  0x23   :  { %596 = vmatprep.subr.mxu1 %v71_v0  ;;  %601 = vmatprep.subr.mxu0 %v118_v1  ;;  %v127_v37 = vld [vmem:[%s1212_s1 + $0x340] sm:$0xff]  ;;  %v142_v39 = vld [vmem:[%s1212_s1 + $0x3b8] sm:$0xff]  ;;  %v93_v40 = vld [vmem:[%s1212_s1 + $0x230] sm:$0xff] }
  0x24   :  { %597 = vmatpush3.msra.mxu1 %v55_v2  ;;  %308 = vmatprep.mubr.f32.mxu1 %v17_v3  ;;  %v126_v41 = vld [vmem:[%s1212_s1 + $0x338] sm:$0xff]  ;;  %v108_v42 = vld [vmem:[%s1212_s1 + $0x2a8] sm:$0xff]  ;;  %v141_v43 = vld [vmem:[%s1212_s1 + $0x3b0] sm:$0xff] }
  0x25   :  { %602 = vmatpush3.msra.mxu0 %v102_v4  ;;  %309 = vmatmul.mubr.f32.vlgmr.msra.gmra.mxu1 %v16_v5  ;;  %v92_v44 = vld [vmem:[%s1212_s1 + $0x228] sm:$0xff]  ;;  %v125_v45 = vld [vmem:[%s1212_s1 + $0x330] sm:$0xff]  ;;  %v107_v46 = vld [vmem:[%s1212_s1 + $0x2a0] sm:$0xff] }
  0x26   :  { %603 = vmatprep.subr.mxu0 %v117_v6  ;;  %636 = vmatprep.subr.mxu1 %v150_v7  ;;  %v140_v47 = vld [vmem:[%s1212_s1 + $0x3a8] sm:$0xff]  ;;  %v91_v48 = vld [vmem:[%s1212_s1 + $0x220] sm:$0xff]  ;;  %v106_v50 = vld [vmem:[%s1212_s1 + $0x298] sm:$0xff] }
  0x27   :  { %604 = vmatpush3.msra.mxu0 %v101_v8  ;;  %637 = vmatpush3.msra.mxu1 %v134_v9  ;;  %v124_v49 = vld [vmem:[%s1212_s1 + $0x328] sm:$0xff]  ;;  %v139_v51 = vld [vmem:[%s1212_s1 + $0x3a0] sm:$0xff]  ;;  %v90_v52 = vld [vmem:[%s1212_s1 + $0x218] sm:$0xff]  ;;  %v725_v9 = vmov 0.0  }
  0x28   :  { %605 = vmatprep.subr.mxu0 %v116_v10  ;;  %638 = vmatprep.subr.mxu1 %v149_v11  ;;  %v123_v53 = vld [vmem:[%s1212_s1 + $0x320] sm:$0xff]  ;;  %v105_v54 = vld [vmem:[%s1212_s1 + $0x290] sm:$0xff]  ;;  %v138_v55 = vld [vmem:[%s1212_s1 + $0x398] sm:$0xff] }
  0x29   :  { %606 = vmatpush3.msra.mxu0 %v100_v12  ;;  %639 = vmatpush3.msra.mxu1 %v133_v13  ;;  %v89_v56 = vld [vmem:[%s1212_s1 + $0x210] sm:$0xff]  ;;  %v122_v57 = vld [vmem:[%s1212_s1 + $0x318] sm:$0xff]  ;;  %v104_v58 = vld [vmem:[%s1212_s1 + $0x288] sm:$0xff] }
  0x2a   :  { %607 = vmatprep.subr.mxu0 %v115_v14  ;;  %640 = vmatprep.subr.mxu1 %v148_v15  ;;  %v137_v59 = vld [vmem:[%s1212_s1 + $0x390] sm:$0xff]  ;;  %v88_v60 = vld [vmem:[%s1212_s1 + $0x208] sm:$0xff]  ;;  %v103_v62 = vld [vmem:[%s1212_s1 + $0x280] sm:$0xff] }
  0x2b   :  { %608 = vmatpush3.msra.mxu0 %v99_v16  ;;  %641 = vmatpush3.msra.mxu1 %v132_v17  ;;  %v121_v61 = vld [vmem:[%s1212_s1 + $0x310] sm:$0xff]  ;;  %v136_v63 = vld [vmem:[%s1212_s1 + $0x388] sm:$0xff]  ;;  %v87_v0 = vld [vmem:[%s1212_s1 + $0x200] sm:$0xff] }
  0x2c   :  { %609 = vmatprep.subr.mxu0 %v114_v18  ;;  %642 = vmatprep.subr.mxu1 %v147_v19  ;;  %v19_v1 = vld [vmem:[%s1213_s0 + $0x28] sm:$0xff]  ;;  %v18_v3 = vld [vmem:[%s1213_s0 + $0x20] sm:$0xff]  ;;  %v21_v6 = vld [vmem:[%s1213_s0 + $0x38] sm:$0xff] }
  0x2d   :  { %610 = vmatpush3.msra.mxu0 %v98_v20  ;;  %643 = vmatpush3.msra.mxu1 %v131_v21  ;;  %v120_v2 = vld [vmem:[%s1212_s1 + $0x308] sm:$0xff]  ;;  %v135_v4 = vld [vmem:[%s1212_s1 + $0x380] sm:$0xff]  ;;  %v166_v7 = vld [vmem:[%s1212_s1 + $0x478] sm:$0xff] }
  0x2e   :  { %611 = vmatprep.subr.mxu0 %v113_v22  ;;  %644 = vmatprep.subr.mxu1 %v146_v23  ;;  %v119_v5 = vld [vmem:[%s1212_s1 + $0x300] sm:$0xff]  ;;  %v20_v8 = vld [vmem:[%s1213_s0 + $0x30] sm:$0xff]  ;;  %v164_v11 = vld [vmem:[%s1212_s1 + $0x468] sm:$0xff] }
  0x2f   :  { %612 = vmatpush3.msra.mxu0 %v97_v24  ;;  %645 = vmatpush3.msra.mxu1 %v130_v25  ;;  %v165_v10 = vld [vmem:[%s1212_s1 + $0x470] sm:$0xff]  ;;  %v163_v12 = vld [vmem:[%s1212_s1 + $0x460] sm:$0xff]  ;;  %v162_v13 = vld [vmem:[%s1212_s1 + $0x458] sm:$0xff] }
  0x30   :  { %613 = vmatprep.subr.mxu0 %v112_v26  ;;  %646 = vmatprep.subr.mxu1 %v145_v27  ;;  %v161_v14 = vld [vmem:[%s1212_s1 + $0x450] sm:$0xff]  ;;  %v160_v15 = vld [vmem:[%s1212_s1 + $0x448] sm:$0xff]  ;;  %v159_v16 = vld [vmem:[%s1212_s1 + $0x440] sm:$0xff] }
  0x31   :  { %614 = vmatpush3.msra.mxu0 %v96_v28  ;;  %647 = vmatpush3.msra.mxu1 %v129_v29  ;;  %v158_v17 = vld [vmem:[%s1212_s1 + $0x438] sm:$0xff]  ;;  %v157_v18 = vld [vmem:[%s1212_s1 + $0x430] sm:$0xff]  ;;  %v156_v19 = vld [vmem:[%s1212_s1 + $0x428] sm:$0xff] }
  0x32   :  { %615 = vmatprep.subr.mxu0 %v111_v30  ;;  %648 = vmatprep.subr.mxu1 %v144_v31  ;;  %v155_v20 = vld [vmem:[%s1212_s1 + $0x420] sm:$0xff]  ;;  %v154_v21 = vld [vmem:[%s1212_s1 + $0x418] sm:$0xff]  ;;  %v153_v22 = vld [vmem:[%s1212_s1 + $0x410] sm:$0xff] }
  0x33   :  { %616 = vmatpush3.msra.mxu0 %v95_v32  ;;  %649 = vmatpush3.msra.mxu1 %v128_v33  ;;  %v152_v23 = vld [vmem:[%s1212_s1 + $0x408] sm:$0xff]  ;;  %v151_v24 = vld [vmem:[%s1212_s1 + $0x400] sm:$0xff] }
  0x34   :  { %617 = vmatprep.subr.mxu0 %v110_v34  ;;  %650 = vmatprep.subr.mxu1 %v143_v35  ;;  %v22_v25 = vld [vmem:[%s1213_s0 + $0x40] sm:$0xff] }
  0x35   :  { %618 = vmatpush3.msra.mxu0 %v94_v36  ;;  %651 = vmatpush3.msra.mxu1 %v127_v37  ;;  %v530_v31 = vld [vmem:[%s1214_s2] ss:$0 sm:$0xff] }
  0x36   :  { %619 = vmatprep.subr.mxu0 %v109_v38  ;;  %652 = vmatprep.subr.mxu1 %v142_v39 }
  0x37   :  { %620 = vmatpush3.msra.mxu0 %v93_v40  ;;  %653 = vmatpush3.msra.mxu1 %v126_v41 }
  0x38   :  { %621 = vmatprep.subr.mxu0 %v108_v42  ;;  %654 = vmatprep.subr.mxu1 %v141_v43 }
  0x39   :  { %622 = vmatpush3.msra.mxu0 %v92_v44  ;;  %655 = vmatpush3.msra.mxu1 %v125_v45 }
  0x3a   :  { %623 = vmatprep.subr.mxu0 %v107_v46  ;;  %656 = vmatprep.subr.mxu1 %v140_v47 }
  0x3b   :  { %624 = vmatpush3.msra.mxu0 %v91_v48  ;;  %657 = vmatpush3.msra.mxu1 %v124_v49 }
  0x3c   :  { %625 = vmatprep.subr.mxu0 %v106_v50  ;;  %658 = vmatprep.subr.mxu1 %v139_v51 }
  0x3d   :  { %626 = vmatpush3.msra.mxu0 %v90_v52  ;;  %659 = vmatpush3.msra.mxu1 %v123_v53 }
  0x3e   :  { %627 = vmatprep.subr.mxu0 %v105_v54  ;;  %660 = vmatprep.subr.mxu1 %v138_v55 }
  0x3f   :  { %628 = vmatpush3.msra.mxu0 %v89_v56  ;;  %661 = vmatpush3.msra.mxu1 %v122_v57 }
  0x40   :  { %629 = vmatprep.subr.mxu0 %v104_v58  ;;  %662 = vmatprep.subr.mxu1 %v137_v59 }
  0x41   :  { %630 = vmatpush3.msra.mxu0 %v88_v60  ;;  %663 = vmatpush3.msra.mxu1 %v121_v61 }
  0x42   :  { %631 = vmatprep.subr.mxu0 %v103_v62  ;;  %664 = vmatprep.subr.mxu1 %v136_v63 }
  0x43   :  { %632 = vmatpush3.msra.mxu0 %v87_v0  ;;  %378 = vmatprep.mubr.f32.mxu0 %v19_v1 }
  0x44   :  { %665 = vmatpush3.msra.mxu1 %v120_v2  ;;  %379 = vmatmul.mubr.f32.vlgmr.msra.gmra.mxu0 %v18_v3 }
  0x45   :  { %666 = vmatprep.subr.mxu1 %v135_v4  ;;  %688 = vmatprep.subr.mxu0 %v725_v9 }
  0x46   :  { %667 = vmatpush3.msra.mxu1 %v119_v5  ;;  %448 = vmatprep.mubr.f32.mxu1 %v21_v6 }
  0x47   :  { %689 = vmatpush3.msra.mxu0 %v166_v7  ;;  %449 = vmatmul.mubr.f32.vlgmr.msra.gmra.mxu1 %v20_v8 }
  0x48   :  { %690 = vmatprep.subr.mxu0 %v725_v9  ;;  %720 = vmatprep.mubr.msk.f32.mxu0 %vm726_vm0, %v725_v9 }
  0x49   :  { %691 = vmatpush3.msra.mxu0 %v165_v10 }
  0x4a   :  { %692 = vmatprep.subr.mxu0 %v725_v9 }
  0x4b   :  { %693 = vmatpush3.msra.mxu0 %v164_v11 }
  0x4c   :  { %694 = vmatprep.subr.mxu0 %v725_v9 }
  0x4d   :  { %695 = vmatpush3.msra.mxu0 %v163_v12 }
  0x4e   :  { %696 = vmatprep.subr.mxu0 %v725_v9 }
  0x4f   :  { %697 = vmatpush3.msra.mxu0 %v162_v13 }
  0x50   :  { %698 = vmatprep.subr.mxu0 %v725_v9 }
  0x51   :  { %699 = vmatpush3.msra.mxu0 %v161_v14 }
  0x52   :  { %700 = vmatprep.subr.mxu0 %v725_v9 }
  0x53   :  { %701 = vmatpush3.msra.mxu0 %v160_v15 }
  0x54   :  { %702 = vmatprep.subr.mxu0 %v725_v9 }
  0x55   :  { %703 = vmatpush3.msra.mxu0 %v159_v16 }
  0x56   :  { %704 = vmatprep.subr.mxu0 %v725_v9 }
  0x57   :  { %705 = vmatpush3.msra.mxu0 %v158_v17 }
  0x58   :  { %706 = vmatprep.subr.mxu0 %v725_v9 }
  0x59   :  { %707 = vmatpush3.msra.mxu0 %v157_v18 }
  0x5a   :  { %708 = vmatprep.subr.mxu0 %v725_v9 }
  0x5b   :  { %709 = vmatpush3.msra.mxu0 %v156_v19 }
  0x5c   :  { %710 = vmatprep.subr.mxu0 %v725_v9 }
  0x5d   :  { %711 = vmatpush3.msra.mxu0 %v155_v20 }
  0x5e   :  { %712 = vmatprep.subr.mxu0 %v725_v9 }
  0x5f   :  { %713 = vmatpush3.msra.mxu0 %v154_v21 }
  0x60   :  { %714 = vmatprep.subr.mxu0 %v725_v9 }
  0x61   :  { %715 = vmatpush3.msra.mxu0 %v153_v22 }
  0x62   :  { %716 = vmatprep.subr.mxu0 %v725_v9 }
  0x63   :  { %717 = vmatpush3.msra.mxu0 %v152_v23 }
  0x64   :  { %718 = vmatprep.subr.mxu0 %v725_v9 }
  0x65   :  { %719 = vmatpush3.msra.mxu0 %v151_v24 }
  0x66   :  { %721 = vmatmul.mubr.f32.vlgmr.msra.gmra.mxu0 %v22_v25 }
  0xe2   :  { %v563_v26 = vpop.f32.mrf.mxu0 }
  0xe4   :  { %v564_v27 = vpop.f32.mrf.mxu0 }
  0xe5   :  { %v598_v28 = vpop.f32.mrf.mxu1  ;;  %v565_v30 = vadd.f32 %v564_v27, %v563_v26 }
  0xe7   :  { %v599_v32 = vpop.f32.mrf.mxu1  ;;  %v241_v35 = vadd.f32 %v565_v30, %v530_v31 }
  0xe8   :  { %v600_v36 = vadd.f32 %v599_v32, %v598_v28 }
  0xea   :  { %v311_v39 = vadd.f32 %v600_v36, %v241_v35 }
 0x104   :  { %v633_v29 = vpop.f32.mrf.mxu0 }
 0x106   :  { %v634_v33 = vpop.f32.mrf.mxu0 }
 0x107   :  { %v668_v34 = vpop.f32.mrf.mxu1  ;;  %v635_v37 = vadd.f32 %v634_v33, %v633_v29 }
 0x109   :  { %v669_v38 = vpop.f32.mrf.mxu1  ;;  %v381_v40 = vadd.f32 %v635_v37, %v311_v39 }
 0x10a   :  { %v670_v41 = vadd.f32 %v669_v38, %v668_v34 }
 0x10c   :  { %v451_v42 = vadd.f32 %v670_v41, %v381_v40 }
 0x126   :  { %v520_v43 = vpop.f32.mrf.mxu0 }
 0x127   :  { %v521_v44 = vadd.f32 %v520_v43, %v451_v42 }
 0x128   :  { %v722_v45 = vpop.f32.mrf.mxu0 }
 0x129   :  { %v524_v46 = vmax.f32 %v521_v44, 0.0 }
 0x12b   :  { %525 = vst [vmem:[%s1215_s3] sm:$0xff] %v524_v46 }

// kernel: reference_encoder_forward.14
= control target key start
LH: loop header
LB: loop body
LE: loop exit
PB: predicated region body
PF: predicated region fallthrough
CT: control target
= control target key end

     0   :  { %s638_s1 = inlined_call_operand.vmem [shape: f32[256,384], index: 1, kind: input, shape index: {}]   ;;  %s639_s0 = inlined_call_operand.vmem [shape: f32[8,256], index: 0, kind: input, shape index: {}]   ;;  %s640_s2 = inlined_call_operand.vmem [shape: f32[1,384], index: 2, kind: input, shape index: {}]   ;;  %s641_s3 = inlined_call_operand.vmem [shape: f32[8,384], index: 3, kind: output, shape index: {}]  }
   0x1   :  { %v62_v0 = vld [vmem:[%s638_s1 + $0x170] sm:$0xff]  ;;  %v61_v1 = vld [vmem:[%s638_s1 + $0x168] sm:$0xff]  ;;  %v59_v2 = vld [vmem:[%s638_s1 + $0x158] sm:$0xff] }
   0x2   :  { %129 = vmatprep.subr.mxu0 %v62_v0  ;;  %v58_v3 = vld [vmem:[%s638_s1 + $0x150] sm:$0xff]  ;;  %v56_v4 = vld [vmem:[%s638_s1 + $0x140] sm:$0xff]  ;;  %v55_v5 = vld [vmem:[%s638_s1 + $0x138] sm:$0xff] }
   0x3   :  { %130 = vmatpush1.msra.mxu0 %v61_v1  ;;  %v53_v6 = vld [vmem:[%s638_s1 + $0x128] sm:$0xff]  ;;  %v52_v7 = vld [vmem:[%s638_s1 + $0x120] sm:$0xff]  ;;  %v50_v8 = vld [vmem:[%s638_s1 + $0x110] sm:$0xff] }
   0x4   :  { %131 = vmatprep.subr.mxu0 %v59_v2  ;;  %v49_v9 = vld [vmem:[%s638_s1 + $0x108] sm:$0xff]  ;;  %v47_v10 = vld [vmem:[%s638_s1 + $0xf8] sm:$0xff]  ;;  %v46_v11 = vld [vmem:[%s638_s1 + $0xf0] sm:$0xff] }
   0x5   :  { %132 = vmatpush1.msra.mxu0 %v58_v3  ;;  %v111_v12 = vld [vmem:[%s638_s1 + $0x2f8] sm:$0xff]  ;;  %v44_v13 = vld [vmem:[%s638_s1 + $0xe0] sm:$0xff]  ;;  %v41_v18 = vld [vmem:[%s638_s1 + $0xc8] sm:$0xff] }
   0x6   :  { %133 = vmatprep.subr.mxu0 %v56_v4  ;;  %277 = vmatprep.subr.mxu1 %v111_v12  ;;  %v63_v14 = vld [vmem:[%s638_s1 + $0x178] sm:$0xff]  ;;  %v108_v16 = vld [vmem:[%s638_s1 + $0x2e0] sm:$0xff]  ;;  %v105_v19 = vld [vmem:[%s638_s1 + $0x2c8] sm:$0xff] }
   0x7   :  { %134 = vmatpush1.msra.mxu0 %v55_v5  ;;  %v43_v15 = vld [vmem:[%s638_s1 + $0xd8] sm:$0xff]  ;;  %278 = vmatpush3.msra.mxu1 %v63_v14  ;;  %v60_v17 = vld [vmem:[%s638_s1 + $0x160] sm:$0xff]  ;;  %v57_v21 = vld [vmem:[%s638_s1 + $0x148] sm:$0xff] }
   0x8   :  { %135 = vmatprep.subr.mxu0 %v53_v6  ;;  %279 = vmatprep.subr.mxu1 %v108_v16  ;;  %v40_v20 = vld [vmem:[%s638_s1 + $0xc0] sm:$0xff]  ;;  %v102_v22 = vld [vmem:[%s638_s1 + $0x2b0] sm:$0xff]  ;;  %v37_v25 = vld [vmem:[%s638_s1 + $0xa8] sm:$0xff] }
   0x9   :  { %136 = vmatpush1.msra.mxu0 %v52_v7  ;;  %280 = vmatpush3.msra.mxu1 %v60_v17  ;;  %v38_v23 = vld [vmem:[%s638_s1 + $0xb0] sm:$0xff]  ;;  %v99_v26 = vld [vmem:[%s638_s1 + $0x298] sm:$0xff]  ;;  %v96_v30 = vld [vmem:[%s638_s1 + $0x280] sm:$0xff] }
   0xa   :  { %137 = vmatprep.subr.mxu0 %v50_v8  ;;  %281 = vmatprep.subr.mxu1 %v105_v19  ;;  %v54_v24 = vld [vmem:[%s638_s1 + $0x130] sm:$0xff]  ;;  %v35_v27 = vld [vmem:[%s638_s1 + $0x98] sm:$0xff]  ;;  %v32_v31 = vld [vmem:[%s638_s1 + $0x80] sm:$0xff] }
   0xb   :  { %138 = vmatpush1.msra.mxu0 %v49_v9  ;;  %282 = vmatpush3.msra.mxu1 %v57_v21  ;;  %v51_v28 = vld [vmem:[%s638_s1 + $0x118] sm:$0xff]  ;;  %v34_v29 = vld [vmem:[%s638_s1 + $0x90] sm:$0xff]  ;;  %v48_v32 = vld [vmem:[%s638_s1 + $0x100] sm:$0xff] }
   0xc   :  { %139 = vmatprep.subr.mxu0 %v47_v10  ;;  %283 = vmatprep.subr.mxu1 %v102_v22  ;;  %v31_v33 = vld [vmem:[%s638_s1 + $0x78] sm:$0xff]  ;;  %v93_v34 = vld [vmem:[%s638_s1 + $0x268] sm:$0xff]  ;;  %v28_v37 = vld [vmem:[%s638_s1 + $0x60] sm:$0xff] }
   0xd   :  { %140 = vmatpush1.msra.mxu0 %v46_v11  ;;  %284 = vmatpush3.msra.mxu1 %v54_v24  ;;  %v29_v35 = vld [vmem:[%s638_s1 + $0x68] sm:$0xff]  ;;  %v90_v38 = vld [vmem:[%s638_s1 + $0x250] sm:$0xff]  ;;  %v87_v42 = vld [vmem:[%s638_s1 + $0x238] sm:$0xff] }
   0xe   :  { %141 = vmatprep.subr.mxu0 %v44_v13  ;;  %285 = vmatprep.subr.mxu1 %v99_v26  ;;  %v45_v36 = vld [vmem:[%s638_s1 + $0xe8] sm:$0xff]  ;;  %v26_v39 = vld [vmem:[%s638_s1 + $0x50] sm:$0xff]  ;;  %v23_v43 = vld [vmem:[%s638_s1 + $0x38] sm:$0xff] }
   0xf   :  { %142 = vmatpush1.msra.mxu0 %v43_v15  ;;  %286 = vmatpush3.msra.mxu1 %v51_v28  ;;  %v42_v40 = vld [vmem:[%s638_s1 + $0xd0] sm:$0xff]  ;;  %v25_v41 = vld [vmem:[%s638_s1 + $0x48] sm:$0xff]  ;;  %v39_v44 = vld [vmem:[%s638_s1 + $0xb8] sm:$0xff] }
  0x10   :  { %143 = vmatprep.subr.mxu0 %v41_v18  ;;  %287 = vmatprep.subr.mxu1 %v96_v30  ;;  %v22_v45 = vld [vmem:[%s638_s1 + $0x30] sm:$0xff]  ;;  %v84_v46 = vld [vmem:[%s638_s1 + $0x220] sm:$0xff]  ;;  %v19_v49 = vld [vmem:[%s638_s1 + $0x18] sm:$0xff] }
  0x11   :  { %144 = vmatpush1.msra.mxu0 %v40_v20  ;;  %288 = vmatpush3.msra.mxu1 %v48_v32  ;;  %v20_v47 = vld [vmem:[%s638_s1 + $0x20] sm:$0xff]  ;;  %v81_v50 = vld [vmem:[%s638_s1 + $0x208] sm:$0xff]  ;;  %v78_v54 = vld [vmem:[%s638_s1 + $0x1f0] sm:$0xff] }
  0x12   :  { %145 = vmatprep.subr.mxu0 %v38_v23  ;;  %289 = vmatprep.subr.mxu1 %v93_v34  ;;  %v36_v48 = vld [vmem:[%s638_s1 + $0xa0] sm:$0xff]  ;;  %v17_v51 = vld [vmem:[%s638_s1 + $0x8] sm:$0xff]  ;;  %v110_v55 = vld [vmem:[%s638_s1 + $0x2f0] sm:$0xff]  ;;  %v114_v34 = vlaneseq }
  0x13   :  { %146 = vmatpush1.msra.mxu0 %v37_v25  ;;  %290 = vmatpush3.msra.mxu1 %v45_v36  ;;  %v33_v52 = vld [vmem:[%s638_s1 + $0x88] sm:$0xff]  ;;  %v16_v53 = vld [vmem:[%s638_s1] sm:$0xff]  ;;  %v30_v56 = vld [vmem:[%s638_s1 + $0x70] sm:$0xff] }
  0x14   :  { %147 = vmatprep.subr.mxu0 %v35_v27  ;;  %291 = vmatprep.subr.mxu1 %v90_v38  ;;  %v109_v57 = vld [vmem:[%s638_s1 + $0x2e8] sm:$0xff]  ;;  %v75_v58 = vld [vmem:[%s638_s1 + $0x1d8] sm:$0xff]  ;;  %v106_v61 = vld [vmem:[%s638_s1 + $0x2d0] sm:$0xff] }
  0x15   :  { %148 = vmatpush1.msra.mxu0 %v34_v29  ;;  %292 = vmatpush3.msra.mxu1 %v42_v40  ;;  %v107_v59 = vld [vmem:[%s638_s1 + $0x2d8] sm:$0xff]  ;;  %v72_v62 = vld [vmem:[%s638_s1 + $0x1c0] sm:$0xff]  ;;  %v69_v2 = vld [vmem:[%s638_s1 + $0x1a8] sm:$0xff] }
  0x16   :  { %149 = vmatprep.subr.mxu0 %v32_v31  ;;  %293 = vmatprep.subr.mxu1 %v87_v42  ;;  %v27_v60 = vld [vmem:[%s638_s1 + $0x58] sm:$0xff]  ;;  %v104_v63 = vld [vmem:[%s638_s1 + $0x2c0] sm:$0xff]  ;;  %v101_v3 = vld [vmem:[%s638_s1 + $0x2a8] sm:$0xff] }
  0x17   :  { %150 = vmatpush1.msra.mxu0 %v31_v33  ;;  %294 = vmatpush3.msra.mxu1 %v39_v44  ;;  %v24_v0 = vld [vmem:[%s638_s1 + $0x40] sm:$0xff]  ;;  %v103_v1 = vld [vmem:[%s638_s1 + $0x2b8] sm:$0xff]  ;;  %v21_v4 = vld [vmem:[%s638_s1 + $0x28] sm:$0xff] }
  0x18   :  { %151 = vmatprep.subr.mxu0 %v29_v35  ;;  %295 = vmatprep.subr.mxu1 %v84_v46  ;;  %v100_v5 = vld [vmem:[%s638_s1 + $0x2a0] sm:$0xff]  ;;  %v66_v6 = vld [vmem:[%s638_s1 + $0x190] sm:$0xff]  ;;  %v97_v9 = vld [vmem:[%s638_s1 + $0x288] sm:$0xff]  ;;  %v115_v35 = vshrl.u32 %v114_v34, 7 }
  0x19   :  { %152 = vmatpush1.msra.mxu0 %v28_v37  ;;  %296 = vmatpush3.msra.mxu1 %v36_v48  ;;  %v98_v7 = vld [vmem:[%s638_s1 + $0x290] sm:$0xff]  ;;  %v15_v10 = vld [vmem:[%s639_s0 + $0x8] sm:$0xff]  ;;  %v95_v11 = vld [vmem:[%s638_s1 + $0x278] sm:$0xff] }
  0x1a   :  { %153 = vmatprep.subr.mxu0 %v26_v39  ;;  %297 = vmatprep.subr.mxu1 %v81_v50  ;;  %v18_v8 = vld [vmem:[%s638_s1 + $0x10] sm:$0xff]  ;;  %v14_v12 = vld [vmem:[%s639_s0] sm:$0xff]  ;;  %v91_v15 = vld [vmem:[%s638_s1 + $0x258] sm:$0xff]  ;;  %v124_v36 = vsub.s32 2, %v115_v35  ;;  %v120_v44 = vsub.s32 1, %v115_v35 }
  0x1b   :  { %154 = vmatpush1.msra.mxu0 %v25_v41  ;;  %298 = vmatpush3.msra.mxu1 %v33_v52  ;;  %v94_v13 = vld [vmem:[%s638_s1 + $0x270] sm:$0xff]  ;;  %v92_v14 = vld [vmem:[%s638_s1 + $0x260] sm:$0xff]  ;;  %v89_v16 = vld [vmem:[%s638_s1 + $0x248] sm:$0xff] }
  0x1c   :  { %155 = vmatprep.subr.mxu0 %v23_v43  ;;  %299 = vmatprep.subr.mxu1 %v78_v54  ;;  %v88_v17 = vld [vmem:[%s638_s1 + $0x240] sm:$0xff]  ;;  %v86_v18 = vld [vmem:[%s638_s1 + $0x230] sm:$0xff]  ;;  %v85_v19 = vld [vmem:[%s638_s1 + $0x228] sm:$0xff]  ;;  %v116_v43 = vsub.s32 0, %v115_v35 }
  0x1d   :  { %156 = vmatpush1.msra.mxu0 %v22_v45  ;;  %300 = vmatpush3.msra.mxu1 %v30_v56  ;;  %v83_v20 = vld [vmem:[%s638_s1 + $0x218] sm:$0xff]  ;;  %v82_v21 = vld [vmem:[%s638_s1 + $0x210] sm:$0xff]  ;;  %v80_v22 = vld [vmem:[%s638_s1 + $0x200] sm:$0xff] }
  0x1e   :  { %157 = vmatprep.subr.mxu0 %v20_v47  ;;  %301 = vmatprep.subr.mxu1 %v75_v58  ;;  %v79_v23 = vld [vmem:[%s638_s1 + $0x1f8] sm:$0xff]  ;;  %v77_v24 = vld [vmem:[%s638_s1 + $0x1e8] sm:$0xff]  ;;  %v76_v25 = vld [vmem:[%s638_s1 + $0x1e0] sm:$0xff] }
  0x1f   :  { %158 = vmatpush1.msra.mxu0 %v19_v49  ;;  %302 = vmatpush3.msra.mxu1 %v27_v60  ;;  %v74_v26 = vld [vmem:[%s638_s1 + $0x1d0] sm:$0xff]  ;;  %v73_v27 = vld [vmem:[%s638_s1 + $0x1c8] sm:$0xff]  ;;  %v71_v28 = vld [vmem:[%s638_s1 + $0x1b8] sm:$0xff] }
  0x20   :  { %159 = vmatprep.subr.mxu0 %v17_v51  ;;  %303 = vmatprep.subr.mxu1 %v72_v62  ;;  %v70_v29 = vld [vmem:[%s638_s1 + $0x1b0] sm:$0xff]  ;;  %v68_v30 = vld [vmem:[%s638_s1 + $0x1a0] sm:$0xff]  ;;  %v67_v31 = vld [vmem:[%s638_s1 + $0x198] sm:$0xff] }
  0x21   :  { %160 = vmatpush1.msra.mxu0 %v16_v53  ;;  %304 = vmatpush3.msra.mxu1 %v24_v0  ;;  %v65_v32 = vld [vmem:[%s638_s1 + $0x188] sm:$0xff]  ;;  %v64_v33 = vld [vmem:[%s638_s1 + $0x180] sm:$0xff] }
  0x22   :  { %161 = vmatprep.subr.mxu0 %v110_v55  ;;  %305 = vmatprep.subr.mxu1 %v69_v2  ;;  %v112_v37 = vld [vmem:[%s640_s2] sm:$0x7] }
  0x23   :  { %162 = vmatpush2.msra.mxu0 %v109_v57  ;;  %306 = vmatpush3.msra.mxu1 %v21_v4  ;;  %v125_v39 = vrot.slane %v112_v37, %v124_v36  ;;  %v117_v45 = vrot.slane %v112_v37, %v116_v43  ;;  %v121_v46 = vrot.slane %v112_v37, %v120_v44 }
  0x24   :  { %163 = vmatprep.subr.mxu0 %v107_v59  ;;  %307 = vmatprep.subr.mxu1 %v66_v6 }
  0x25   :  { %164 = vmatpush2.msra.mxu0 %v106_v61  ;;  %308 = vmatpush3.msra.mxu1 %v18_v8 }
  0x26   :  { %165 = vmatprep.subr.mxu0 %v104_v63  ;;  %264 = vmatprep.mubr.f32.mxu1 %v15_v10 }
  0x27   :  { %166 = vmatpush2.msra.mxu0 %v103_v1  ;;  %265 = vmatmul.mubr.f32.vlgmr.msra.gmra.mxu1 %v14_v12 }
  0x28   :  { %167 = vmatprep.subr.mxu0 %v101_v3  ;;  %193 = vmatprep.mubr.f32.mxu0 %v15_v10 }
  0x29   :  { %168 = vmatpush2.msra.mxu0 %v100_v5 }
  0x2a   :  { %169 = vmatprep.subr.mxu0 %v98_v7 }
  0x2b   :  { %170 = vmatpush2.msra.mxu0 %v97_v9 }
  0x2c   :  { %171 = vmatprep.subr.mxu0 %v95_v11 }
  0x2d   :  { %172 = vmatpush2.msra.mxu0 %v94_v13 }
  0x2e   :  { %173 = vmatprep.subr.mxu0 %v92_v14 }
  0x2f   :  { %174 = vmatpush2.msra.mxu0 %v91_v15 }
  0x30   :  { %175 = vmatprep.subr.mxu0 %v89_v16 }
  0x31   :  { %176 = vmatpush2.msra.mxu0 %v88_v17 }
  0x32   :  { %177 = vmatprep.subr.mxu0 %v86_v18 }
  0x33   :  { %178 = vmatpush2.msra.mxu0 %v85_v19 }
  0x34   :  { %179 = vmatprep.subr.mxu0 %v83_v20 }
  0x35   :  { %180 = vmatpush2.msra.mxu0 %v82_v21 }
  0x36   :  { %181 = vmatprep.subr.mxu0 %v80_v22 }
  0x37   :  { %182 = vmatpush2.msra.mxu0 %v79_v23 }
  0x38   :  { %183 = vmatprep.subr.mxu0 %v77_v24 }
  0x39   :  { %184 = vmatpush2.msra.mxu0 %v76_v25 }
  0x3a   :  { %185 = vmatprep.subr.mxu0 %v74_v26 }
  0x3b   :  { %186 = vmatpush2.msra.mxu0 %v73_v27 }
  0x3c   :  { %187 = vmatprep.subr.mxu0 %v71_v28 }
  0x3d   :  { %188 = vmatpush2.msra.mxu0 %v70_v29 }
  0x3e   :  { %189 = vmatprep.subr.mxu0 %v68_v30 }
  0x3f   :  { %190 = vmatpush2.msra.mxu0 %v67_v31 }
  0x40   :  { %191 = vmatprep.subr.mxu0 %v65_v32 }
  0x41   :  { %192 = vmatpush2.msra.mxu0 %v64_v33 }
  0x42   :  { %194 = vmatmul.mubr.f32.vlgmr.msra.gmra.mxu0 %v14_v12 }
  0xe7   :  { %v309_v38 = vpop.f32.mrf.mxu1 }
  0xe9   :  { %v310_v40 = vpop.f32.mrf.mxu1 }
  0xea   :  { %v311_v41 = vadd.f32 %v310_v40, %v309_v38 }
  0xec   :  { %v267_v42 = vadd.f32 %v311_v41, %v125_v39 }
  0xee   :  { %272 = vst [vmem:[%s641_s3 + $0x10] sm:$0xff] %v267_v42 }
 0x102   :  { %v195_v47 = vpop.f32.mrf.mxu0 }
 0x103   :  { %v196_v48 = vadd.f32 %v195_v47, %v117_v45 }
 0x104   :  { %v197_v49 = vpop.f32.mrf.mxu0 }
 0x105   :  { %270 = vst [vmem:[%s641_s3] sm:$0xff] %v196_v48  ;;  %v198_v50 = vadd.f32 %v197_v49, %v121_v46 }
 0x107   :  { %271 = vst [vmem:[%s641_s3 + $0x8] sm:$0xff] %v198_v50 }

// kernel: reference_encoder_forward.15
= control target key start
LH: loop header
LB: loop body
LE: loop exit
PB: predicated region body
PF: predicated region fallthrough
CT: control target
= control target key end

     0   :  { %s542_s12 = smov 0   ;;  %s735_s0 = inlined_call_operand.vmem [shape: f32[2,8,384], index: 0, kind: input, shape index: {}]   ;;  %s736_s1 = inlined_call_operand.vmem [shape: f32[128,384], index: 1, kind: input, shape index: {}]   ;;  %s737_s2 = inlined_call_operand.vmem [shape: f32[1,384], index: 2, kind: input, shape index: {}]   ;;  %s738_s3 = inlined_call_operand.vmem [shape: f32[8,128], index: 3, kind: output, shape index: {}]  }
   0x1 LB: > { %s548_s13 = sadd.s32 4294967295, %s517_s12   ;;  %p429_p0 = scmp.ge.s32.totalorder %s517_s12, 1  ;;  %s517_s12 = sphi %s542_s12, %s13_s12  }
   0x2   : > { %p132_p1 = scmp.lt.s32.totalorder %s517_s12, 3 }
   0x4   : > { %p133_p2 = pnand %p429_p0, %p132_p1 }
   0x5   : > { %p151_p3 = scmp.lt.s32.totalorder (!%p133_p2), %s548_s13, 1  ;;  %p431_p4 = scmp.ne.s32.totalorder (!%p133_p2), %s548_s13, 0 }
   0x6   : > { %136 = sbr.rel (%p133_p2) target bundleno = 305 (0x131), region = 32 }
   0xb   : > { %s152_s14 = scalar_select %p151_p3, %s548_s13, 1 }
   0xc   : > { %159 = sbr.rel (%p431_p4) target bundleno = 19 (0x13), region = 36 }
   0xd   : > { %s489_s15 = smul.u32 24, %s152_s14 }
   0xf   : > { %s557_s18 = scalar_lea.vmem %s735_s0, %s489_s15 }
  0x11   : > { %v519_v0 = vmov 0.0  }
  0x12   : > { %160 = vst [vmem:[#allocation2] sm:$0xff] %v519_v0 }
  0x13 PF: > { %v211_v1 = vld [vmem:[%s736_s1 + $0x170] sm:$0xff]  ;;  %v210_v2 = vld [vmem:[%s736_s1 + $0x168] sm:$0xff]  ;;  %v208_v3 = vld [vmem:[%s736_s1 + $0x158] sm:$0xff]  ;;  %v520_v5 = vmov 0.0   ;;  %vm521_vm0 = vmmov 0   ;;  %v215_v51 = vlaneseq  ;;  %p434_p5 = scmp.ne.s32.totalorder %s548_s13, 1 }
  0x14   : > { %230 = vmatprep.subr.mxu0 %v211_v1  ;;  %v207_v4 = vld [vmem:[%s736_s1 + $0x150] sm:$0xff]  ;;  %294 = vmatprep.mubr.f32.mxu0 %v520_v5  ;;  %v205_v6 = vld [vmem:[%s736_s1 + $0x140] sm:$0xff]  ;;  %v204_v7 = vld [vmem:[%s736_s1 + $0x138] sm:$0xff] }
  0x15   : > { %231 = vmatpush1.msra.mxu0 %v210_v2  ;;  %454 = vmatprep.subr.mxu1 %v520_v5  ;;  %v202_v8 = vld [vmem:[%s736_s1 + $0x128] sm:$0xff]  ;;  %v201_v9 = vld [vmem:[%s736_s1 + $0x120] sm:$0xff]  ;;  %v199_v10 = vld [vmem:[%s736_s1 + $0x110] sm:$0xff]  ;;  %v216_v52 = vshrl.u32 %v215_v51, 7 }
  0x16   : > { %232 = vmatprep.subr.mxu0 %v208_v3  ;;  %486 = vmatprep.mubr.msk.f32.mxu1 %vm521_vm0, %v520_v5  ;;  %v198_v11 = vld [vmem:[%s736_s1 + $0x108] sm:$0xff]  ;;  %v196_v12 = vld [vmem:[%s736_s1 + $0xf8] sm:$0xff]  ;;  %v195_v13 = vld [vmem:[%s736_s1 + $0xf0] sm:$0xff] }
  0x17   : > { %233 = vmatpush1.msra.mxu0 %v207_v4  ;;  %v193_v14 = vld [vmem:[%s736_s1 + $0xe0] sm:$0xff]  ;;  %v192_v15 = vld [vmem:[%s736_s1 + $0xd8] sm:$0xff]  ;;  %v190_v18 = vld [vmem:[%s736_s1 + $0xc8] sm:$0xff]  ;;  %v217_v53 = vsub.s32 0, %v216_v52  ;;  %v221_v56 = vsub.s32 1, %v216_v52 }
  0x18   : > { %234 = vmatprep.subr.mxu0 %v205_v6  ;;  %v212_v16 = vld [vmem:[%s736_s1 + $0x178] sm:$0xff]  ;;  %v209_v17 = vld [vmem:[%s736_s1 + $0x160] sm:$0xff]  ;;  %v206_v20 = vld [vmem:[%s736_s1 + $0x148] sm:$0xff] }
  0x19   : > { %235 = vmatpush1.msra.mxu0 %v204_v7  ;;  %455 = vmatpush3.msra.mxu1 %v212_v16  ;;  %v189_v19 = vld [vmem:[%s736_s1 + $0xc0] sm:$0xff]  ;;  %v187_v21 = vld [vmem:[%s736_s1 + $0xb0] sm:$0xff]  ;;  %v186_v22 = vld [vmem:[%s736_s1 + $0xa8] sm:$0xff] }
  0x1a   : > { %236 = vmatprep.subr.mxu0 %v202_v8  ;;  %456 = vmatprep.subr.mxu1 %v520_v5  ;;  %v203_v23 = vld [vmem:[%s736_s1 + $0x130] sm:$0xff]  ;;  %v184_v24 = vld [vmem:[%s736_s1 + $0x98] sm:$0xff]  ;;  %v181_v27 = vld [vmem:[%s736_s1 + $0x80] sm:$0xff]  ;;  %v225_v8 = vsub.s32 2, %v216_v52 }
  0x1b   : > { %237 = vmatpush1.msra.mxu0 %v201_v9  ;;  %457 = vmatpush3.msra.mxu1 %v209_v17  ;;  %v183_v25 = vld [vmem:[%s736_s1 + $0x90] sm:$0xff]  ;;  %v200_v26 = vld [vmem:[%s736_s1 + $0x118] sm:$0xff]  ;;  %v197_v29 = vld [vmem:[%s736_s1 + $0x100] sm:$0xff] }
  0x1c   : > { %238 = vmatprep.subr.mxu0 %v199_v10  ;;  %458 = vmatprep.subr.mxu1 %v520_v5  ;;  %v180_v28 = vld [vmem:[%s736_s1 + $0x78] sm:$0xff]  ;;  %v178_v30 = vld [vmem:[%s736_s1 + $0x68] sm:$0xff]  ;;  %v177_v31 = vld [vmem:[%s736_s1 + $0x60] sm:$0xff] }
  0x1d   : > { %239 = vmatpush1.msra.mxu0 %v198_v11  ;;  %459 = vmatpush3.msra.mxu1 %v206_v20  ;;  %v194_v32 = vld [vmem:[%s736_s1 + $0xe8] sm:$0xff]  ;;  %v175_v33 = vld [vmem:[%s736_s1 + $0x50] sm:$0xff]  ;;  %v172_v36 = vld [vmem:[%s736_s1 + $0x38] sm:$0xff] }
  0x1e   : > { %240 = vmatprep.subr.mxu0 %v196_v12  ;;  %460 = vmatprep.subr.mxu1 %v520_v5  ;;  %v174_v34 = vld [vmem:[%s736_s1 + $0x48] sm:$0xff]  ;;  %v191_v35 = vld [vmem:[%s736_s1 + $0xd0] sm:$0xff]  ;;  %v188_v38 = vld [vmem:[%s736_s1 + $0xb8] sm:$0xff] }
  0x1f   : > { %241 = vmatpush1.msra.mxu0 %v195_v13  ;;  %461 = vmatpush3.msra.mxu1 %v203_v23  ;;  %v171_v37 = vld [vmem:[%s736_s1 + $0x30] sm:$0xff]  ;;  %v169_v39 = vld [vmem:[%s736_s1 + $0x20] sm:$0xff]  ;;  %v168_v40 = vld [vmem:[%s736_s1 + $0x18] sm:$0xff] }
  0x20   : > { %242 = vmatprep.subr.mxu0 %v193_v14  ;;  %462 = vmatprep.subr.mxu1 %v520_v5  ;;  %v185_v41 = vld [vmem:[%s736_s1 + $0xa0] sm:$0xff]  ;;  %v166_v42 = vld [vmem:[%s736_s1 + $0x8] sm:$0xff]  ;;  %v179_v46 = vld [vmem:[%s736_s1 + $0x70] sm:$0xff] }
  0x21   : > { %243 = vmatpush1.msra.mxu0 %v192_v15  ;;  %463 = vmatpush3.msra.mxu1 %v200_v26  ;;  %v165_v43 = vld [vmem:[%s736_s1] sm:$0xff]  ;;  %v182_v44 = vld [vmem:[%s736_s1 + $0x88] sm:$0xff]  ;;  %v176_v47 = vld [vmem:[%s736_s1 + $0x58] sm:$0xff] }
  0x22   : > { %244 = vmatprep.subr.mxu0 %v190_v18  ;;  %464 = vmatprep.subr.mxu1 %v520_v5  ;;  %v161_v45 = vld [vmem:[#allocation2] sm:$0xff]  ;;  %v170_v49 = vld [vmem:[%s736_s1 + $0x28] sm:$0xff]  ;;  %v167_v50 = vld [vmem:[%s736_s1 + $0x10] sm:$0xff] }
  0x23   : > { %245 = vmatpush1.msra.mxu0 %v189_v19  ;;  %465 = vmatpush3.msra.mxu1 %v197_v29  ;;  %v173_v48 = vld [vmem:[%s736_s1 + $0x40] sm:$0xff]  ;;  %v163_v1 = vld [vmem:[%s557_s18 + $0x8] sm:$0xff]  ;;  %v164_v14 = vld [vmem:[%s557_s18 + $0x10] sm:$0xff] }
  0x24   : > { %246 = vmatprep.subr.mxu0 %v187_v21  ;;  %466 = vmatprep.subr.mxu1 %v520_v5  ;;  %v213_v54 = vld [vmem:[%s737_s2] sm:$0x7] }
  0x25   : > { %247 = vmatpush1.msra.mxu0 %v186_v22  ;;  %467 = vmatpush3.msra.mxu1 %v194_v32  ;;  %v218_v55 = vrot.slane %v213_v54, %v217_v53  ;;  %v162_v57 = vld [vmem:[%s557_s18] sm:$0xff]  ;;  %v222_v60 = vrot.slane %v213_v54, %v221_v56  ;;  %v226_v9 = vrot.slane %v213_v54, %v225_v8 }
  0x26   : > { %248 = vmatprep.subr.mxu0 %v184_v24  ;;  %468 = vmatprep.subr.mxu1 %v520_v5 }
  0x27   : > { %249 = vmatpush1.msra.mxu0 %v183_v25  ;;  %469 = vmatpush3.msra.mxu1 %v191_v35 }
  0x28   : > { %250 = vmatprep.subr.mxu0 %v181_v27  ;;  %470 = vmatprep.subr.mxu1 %v520_v5 }
  0x29   : > { %251 = vmatpush1.msra.mxu0 %v180_v28  ;;  %471 = vmatpush3.msra.mxu1 %v188_v38 }
  0x2a   : > { %252 = vmatprep.subr.mxu0 %v178_v30  ;;  %472 = vmatprep.subr.mxu1 %v520_v5 }
  0x2b   : > { %253 = vmatpush1.msra.mxu0 %v177_v31  ;;  %473 = vmatpush3.msra.mxu1 %v185_v41 }
  0x2c   : > { %254 = vmatprep.subr.mxu0 %v175_v33  ;;  %474 = vmatprep.subr.mxu1 %v520_v5 }
  0x2d   : > { %255 = vmatpush1.msra.mxu0 %v174_v34  ;;  %475 = vmatpush3.msra.mxu1 %v182_v44 }
  0x2e   : > { %256 = vmatprep.subr.mxu0 %v172_v36  ;;  %476 = vmatprep.subr.mxu1 %v520_v5 }
  0x2f   : > { %257 = vmatpush1.msra.mxu0 %v171_v37  ;;  %477 = vmatpush3.msra.mxu1 %v179_v46 }
  0x30   : > { %258 = vmatprep.subr.mxu0 %v169_v39  ;;  %478 = vmatprep.subr.mxu1 %v520_v5 }
  0x31   : > { %259 = vmatpush1.msra.mxu0 %v168_v40  ;;  %479 = vmatpush3.msra.mxu1 %v176_v47 }
  0x32   : > { %260 = vmatprep.subr.mxu0 %v166_v42  ;;  %480 = vmatprep.subr.mxu1 %v520_v5 }
  0x33   : > { %261 = vmatpush1.msra.mxu0 %v165_v43  ;;  %481 = vmatpush3.msra.mxu1 %v173_v48 }
  0x34   : > { %295 = vmatmul.mubr.f32.vlgmr.msra.gmra.mxu0 %v161_v45  ;;  %482 = vmatprep.subr.mxu1 %v520_v5 }
  0x35   : > { %483 = vmatpush3.msra.mxu1 %v170_v49 }
  0x36   : > { %484 = vmatprep.subr.mxu1 %v520_v5 }
  0x37   : > { %485 = vmatpush3.msra.mxu1 %v167_v50 }
  0x38   : > { %487 = vmatmul.mubr.f32.vlgmr.msra.gmra.mxu1 %v161_v45 }
  0xf4   : > { %v296_v58 = vpop.f32.mrf.mxu0 }
  0xf5   : > { %v297_v59 = vadd.f32 %v296_v58, %v218_v55 }
  0xf6   : > { %v298_v61 = vpop.f32.mrf.mxu0 }
  0xf7   : > { %v371_v62 = vadd.f32 %v297_v59, %v162_v57  ;;  %v299_v0 = vadd.f32 %v298_v61, %v222_v60 }
  0xf8   : > { %v367_v3 = vpop.f32.mrf.mxu1 }
  0xf9   : > { %v432_v63 = vmul.f32 -1.442695, %v371_v62  ;;  %v378_v2 = vadd.f32 %v299_v0, %v163_v1  ;;  %v368_v12 = vadd.f32 %v367_v3, %v226_v9 }
  0xfa   : > { %v488_v4 = vpop.f32.mrf.mxu1 }
  0xfb   : > { %501 = vpow2.f32 %v432_v63  ;;  %v433_v5 = vmul.f32 -1.442695, %v378_v2 }
  0xfd   : > { %503 = vpow2.f32 %v433_v5 }
 0x108   : > { %v502_v6 = vpop.eup %501 }
 0x109   : > { %v375_v7 = vadd.f32 1.0, %v502_v6 }
 0x10a   : > { %v504_v10 = vpop.eup %503 }
 0x10b   : > { %505 = vrcp.f32 %v375_v7  ;;  %v382_v11 = vadd.f32 1.0, %v504_v10 }
 0x10d   : > { %507 = vrcp.f32 %v382_v11 }
 0x118   : > { %v506_v13 = vpop.eup %505 }
 0x119   : > { %v385_v15 = vmul.f32 %v506_v13, %v368_v12 }
 0x11a   : > { %v508_v17 = vpop.eup %507 }
 0x11b   : > { %v386_v16 = vadd.f32 %v385_v15, %v164_v14  ;;  %v388_v18 = vsub.f32 1.0, %v508_v17  ;;  %v390_v20 = vmul.f32 %v508_v17, %v161_v45 }
 0x11d   : > { %509 = vtanh.f32 %v386_v16 }
 0x12a   : > { %v510_v19 = vpop.eup %509 }
 0x12b   : > { %v389_v21 = vmul.f32 %v510_v19, %v388_v18  ;;  %396 = sbr.rel (%p434_p5) target bundleno = 305 (0x131), region = 40 }
 0x12d   : > { %v391_v22 = vadd.f32 %v390_v20, %v389_v21 }
 0x12f   : > { %392 = vst [vmem:[#allocation2] sm:$0xff] %v391_v22 }
 0x130   : > { %397 = vst [vmem:[%s738_s3] sm:$0xff] %v391_v22 }
 0x131 PF: > { %s13_s12 = sadd.s32 1, %s517_s12  }
 0x132   : > { %p10_p6 = scmp.ge.s32.totalorder %s13_s12, 4  }
 0x134   :  { %12 = sbr.rel (!%p10_p6) target bundleno = 1 (0x1), region = 66 }

</bundles_post_ra>
